<compile_context>
chip_gen: v7x
topology: tpu7x:2x2x1
jax: 0.10.0
libtpu: 0.0.40
codegen_flags: <defaults>
</compile_context>

<pallas_src>
import functools

import jax
import jax.numpy as jnp
import numpy as np
from jax.experimental import pallas as pl
from jax.experimental.pallas import tpu as pltpu


def _round_up(v, m):
    return (v + m - 1) // m * m


# ---------------------------------------------------------------------------
# Fused kernel: conv1 -> conv2(s2) -> conv3 -> maxpool(k) -> 1x1 head
# One batch element per grid step.
# ---------------------------------------------------------------------------
def _fused_forward_kernel(x_ref, w1_ref, b1_ref, w2_ref, b2_ref, w3_ref,
                          b3_ref, wl_ref, bl_ref, s1_ref, s2_ref, pool_ref,
                          o_ref, *, hp1, wp1, g1, hp3, wp3, g3):
    """Activations are [C, guard + (H+2)*(W+2) + guard] f32 values; the flat
    zero-padded spatial frame lives on the lane axis (lane-dense)."""

    def conv3x3(a, w_ref, b_ref, hp, wp, g):
        # a: [Cin, buf]; w_ref: [9, Cout, Cin].  Returns relu(conv + bias) as
        # [Cout, hp*wp], evaluated at every frame position (frame-border
        # columns are garbage and get zeroed by the next selection matmul).
        m = hp * wp
        acc = None
        for t in range(9):
            di, dj = divmod(t, 3)
            start = g + (di - 1) * wp + (dj - 1)   # static, in-bounds slice
            part = jnp.dot(w_ref[t], a[:, start:start + m],
                           preferred_element_type=jnp.float32)
            acc = part if acc is None else acc + part
        return jnp.maximum(acc + b_ref[...], 0.0)

    # conv1 (3x3, stride 1, pad 1) on the pre-padded input frame.
    a1 = x_ref[...]
    y1 = conv3x3(a1, w1_ref, b1_ref, hp1, wp1, g1)               # [C1, hp1*wp1]
    # Re-insert zero padding + drop garbage border -> conv2 input buffer.
    a2 = jnp.dot(y1, s1_ref[...], preferred_element_type=jnp.float32)
    # conv2 (3x3, stride 2, pad 1): evaluate stride-1 everywhere; the stride-2
    # subsample + re-padding is a single selection matmul.
    y2 = conv3x3(a2, w2_ref, b2_ref, hp1, wp1, g1)               # [C2, hp1*wp1]
    a3 = jnp.dot(y2, s2_ref[...], preferred_element_type=jnp.float32)
    # conv3 (3x3, stride 1, pad 1).
    y3 = conv3x3(a3, w3_ref, b3_ref, hp3, wp3, g3)               # [C3, hp3*wp3]

    # MaxPool2d(k): gather the k*k shifted grids (selection matmuls) and max.
    pooled = None
    for t in range(pool_ref.shape[0]):
        g_t = jnp.dot(y3, pool_ref[t], preferred_element_type=jnp.float32)
        pooled = g_t if pooled is None else jnp.maximum(pooled, g_t)

    # `last` head: 1x1 conv == per-pixel matmul over channels.
    o_ref[...] = (jnp.dot(wl_ref[...], pooled,
                          preferred_element_type=jnp.float32) + bl_ref[...])


# ---------------------------------------------------------------------------
# Host-side constant builders (tiny 0/1 selection matrices, built once)
# ---------------------------------------------------------------------------
def _pad_selector(h, w, g):
    """[(h+2)*(w+2), 2g+(h+2)*(w+2)]: put a stride-1 conv output (valid at
    interior frame positions) back into a zero-padded, guarded frame buffer."""
    hp, wp = h + 2, w + 2
    m = hp * wp
    s = np.zeros((m, 2 * g + m), np.float32)
    for r in range(1, h + 1):
        for c in range(1, w + 1):
            o = r * wp + c
            s[o, g + o] = 1.0
    return s


def _stride2_selector(h_in, w_in, h_out, w_out, g_out):
    """Stride-2 subsample of a stride-1 conv evaluated on the (h_in+2)x(w_in+2)
    frame, scattered (zero-padded) into the next guarded frame buffer."""
    wp_in = w_in + 2
    m_in = (h_in + 2) * wp_in
    hp_o, wp_o = h_out + 2, w_out + 2
    m_out = hp_o * wp_o
    s = np.zeros((m_in, 2 * g_out + m_out), np.float32)
    for i in range(h_out):
        for j in range(w_out):
            s[(2 * i + 1) * wp_in + (2 * j + 1),
              g_out + (i + 1) * wp_o + (j + 1)] = 1.0
    return s


def _pool_selectors(h, w, k):
    """[k*k, (h+2)*(w+2), (h//k)*(w//k)]: k*k row-gather matrices whose
    elementwise max implements MaxPool2d(k) (kernel=stride=k, floor mode)."""
    wp = w + 2
    m_in = (h + 2) * wp
    ho, wo = h // k, w // k
    p = np.zeros((k * k, m_in, ho * wo), np.float32)
    for a in range(k):
        for b in range(k):
            for i in range(ho):
                for j in range(wo):
                    p[a * k + b, (k * i + a + 1) * wp + (k * j + b + 1),
                      i * wo + j] = 1.0
    return p


# ---------------------------------------------------------------------------
# Model.forward equivalent
# ---------------------------------------------------------------------------
def model_forward(params, x):
    """x: NCHW float32 -> NCHW float32 (trunk -> MaxPool2d(W//3) -> 1x1 head)."""
    n, c0, h, w = x.shape
    w1, b1 = params["w1"], params["b1"]
    w2, b2 = params["w2"], params["b2"]
    w3, b3 = params["w3"], params["b3"]
    wl, bl = params["wl"], params["bl"]
    c1, c2, c3, cl = w1.shape[0], w2.shape[0], w3.shape[0], wl.shape[0]

    # Pad the tiny input-channel contraction dim up to a sublane multiple.
    c0p = max(c0, 8)
    if c0p != c0:
        x = jnp.pad(x, ((0, 0), (0, c0p - c0), (0, 0), (0, 0)))
        w1 = jnp.pad(w1, ((0, 0), (0, c0p - c0), (0, 0), (0, 0)))

    # Trunk geometry: conv1 (s1 p1) -> conv2 (s2 p1) -> conv3 (s1 p1) -> pool(k)
    h1, w1sp = h, w
    h2, w2sp = (h1 - 1) // 2 + 1, (w1sp - 1) // 2 + 1
    h3, w3sp = h2, w2sp
    k = w3sp // 3                       # nn.MaxPool2d(x.shape[-1] // 3)
    ho, wo = h3 // k, w3sp // k

    hp1, wp1 = h1 + 2, w1sp + 2
    hp3, wp3 = h3 + 2, w3sp + 2
    g1 = _round_up(wp1 + 1, 8)          # guard >= wp+1: every 3x3 shift is an
    g3 = _round_up(wp3 + 1, 8)          # in-bounds static lane slice
    m1, m3 = hp1 * wp1, hp3 * wp3
    buf1, buf3 = 2 * g1 + m1, 2 * g3 + m3

    s1 = jnp.asarray(_pad_selector(h1, w1sp, g1))                 # [m1, buf1]
    s2 = jnp.asarray(_stride2_selector(h1, w1sp, h2, w2sp, g3))   # [m1, buf3]
    pools = jnp.asarray(_pool_selectors(h3, w3sp, k))             # [k*k, m3, ho*wo]

    def conv_w(wc):                     # [Cout, Cin, 3, 3] -> [9, Cout, Cin]
        return jnp.transpose(wc, (2, 3, 0, 1)).reshape(
            9, wc.shape[0], wc.shape[1])

    # NCHW -> channels-first flat padded frame with guard columns.
    xp = jnp.pad(x, ((0, 0), (0, 0), (1, 1), (1, 1))).reshape(n, c0p, m1)
    xp = jnp.pad(xp, ((0, 0), (0, 0), (g1, g1)))                  # [n, c0p, buf1]

    kernel = functools.partial(_fused_forward_kernel, hp1=hp1, wp1=wp1, g1=g1,
                               hp3=hp3, wp3=wp3, g3=g3)

    out = pl.pallas_call(
        kernel,
        out_shape=jax.ShapeDtypeStruct((n, cl, ho * wo), jnp.float32),
        grid=(n,),
        in_specs=[
            pl.BlockSpec((None, c0p, buf1), lambda b: (b, 0, 0)),
            pl.BlockSpec((9, c1, c0p), lambda b: (0, 0, 0)),
            pl.BlockSpec((c1, 1), lambda b: (0, 0)),
            pl.BlockSpec((9, c2, c1), lambda b: (0, 0, 0)),
            pl.BlockSpec((c2, 1), lambda b: (0, 0)),
            pl.BlockSpec((9, c3, c2), lambda b: (0, 0, 0)),
            pl.BlockSpec((c3, 1), lambda b: (0, 0)),
            pl.BlockSpec((cl, c3), lambda b: (0, 0)),
            pl.BlockSpec((cl, 1), lambda b: (0, 0)),
            pl.BlockSpec((m1, buf1), lambda b: (0, 0)),
            pl.BlockSpec((m1, buf3), lambda b: (0, 0)),
            pl.BlockSpec((k * k, m3, ho * wo), lambda b: (0, 0, 0)),
        ],
        out_specs=pl.BlockSpec((None, cl, ho * wo), lambda b: (b, 0, 0)),
        compiler_params=pltpu.CompilerParams(
            dimension_semantics=("parallel",)),   # megacore batch split (v7x)
    )(xp, conv_w(w1), b1.reshape(-1, 1), conv_w(w2), b2.reshape(-1, 1),
      conv_w(w3), b3.reshape(-1, 1), wl.reshape(cl, c3), bl.reshape(-1, 1),
      s1, s2, pools)

    return out.reshape(n, cl, ho, wo)   # already NCHW: [N, Cl, Ho, Wo]


# ---------------------------------------------------------------------------
# Pure-JAX reference for verification
# ---------------------------------------------------------------------------
def ref_forward(params, x):
    def conv(x, w, b, s, p):
        y = jax.lax.conv_general_dilated(
            x, w, (s, s), [(p, p), (p, p)],
            dimension_numbers=("NCHW", "OIHW", "NCHW"))
        return y + b.reshape(1, -1, 1, 1)

    x = jax.nn.relu(conv(x, params["w1"], params["b1"], 1, 1))
    x = jax.nn.relu(conv(x, params["w2"], params["b2"], 2, 1))
    x = jax.nn.relu(conv(x, params["w3"], params["b3"], 1, 1))
    k = x.shape[-1] // 3
    x = jax.lax.reduce_window(x, -jnp.inf, jax.lax.max,
                              (1, 1, k, k), (1, 1, k, k), "VALID")
    x = conv(x, params["wl"], params["bl"], 1, 0)
    return x


# ---------------------------------------------------------------------------
if __name__ == "__main__":
    key = jax.random.PRNGKey(0)
    ks = jax.random.split(key, 10)

    def init_conv(k, cout, cin, kh, kw):
        std = (2.0 / (cin * kh * kw)) ** 0.5
        return jax.random.normal(k, (cout, cin, kh, kw), jnp.float32) * std

    params = {
        "w1": init_conv(ks[0], 16, 4, 3, 3),
        "b1": jax.random.normal(ks[1], (16,), jnp.float32) * 0.01,
        "w2": init_conv(ks[2], 32, 16, 3, 3),
        "b2": jax.random.normal(ks[3], (32,), jnp.float32) * 0.01,
        "w3": init_conv(ks[4], 32, 32, 3, 3),
        "b3": jax.random.normal(ks[5], (32,), jnp.float32) * 0.01,
        "wl": init_conv(ks[6], 6, 32, 1, 1),     # `last`: 1x1 conv, 6 actions
        "bl": jax.random.normal(ks[7], (6,), jnp.float32) * 0.01,
    }

    # batch=2, channels=4 (stacked frames), spatial=16x16
    x = jax.random.normal(ks[8], (2, 4, 16, 16), jnp.float32)

    out = jax.block_until_ready(model_forward(params, x))
    ref = jax.block_until_ready(ref_forward(params, x))

    assert out.shape == ref.shape == (2, 6, 4, 4), (out.shape, ref.shape)
    # Tolerance accommodates MXU default-precision differences vs the XLA conv
    # reference (both sides may use reduced-precision matmul passes for f32).
    np.testing.assert_allclose(np.asarray(out), np.asarray(ref),
                               rtol=1e-2, atol=1e-2)

    print("KERNEL_OK")
</pallas_src>

<mosaic_0001>
module attributes {stable_mosaic.version = 11 : i64} {
  func.func @_fused_forward_kernel(%arg0: i32, %arg1: memref<1x8x372xf32, #tpu.memory_space<vmem>>, %arg2: memref<9x16x8xf32, #tpu.memory_space<vmem>>, %arg3: memref<16x1xf32, #tpu.memory_space<vmem>>, %arg4: memref<9x32x16xf32, #tpu.memory_space<vmem>>, %arg5: memref<32x1xf32, #tpu.memory_space<vmem>>, %arg6: memref<9x32x32xf32, #tpu.memory_space<vmem>>, %arg7: memref<32x1xf32, #tpu.memory_space<vmem>>, %arg8: memref<6x32xf32, #tpu.memory_space<vmem>>, %arg9: memref<6x1xf32, #tpu.memory_space<vmem>>, %arg10: memref<324x372xf32, #tpu.memory_space<vmem>>, %arg11: memref<324x132xf32, #tpu.memory_space<vmem>>, %arg12: memref<4x100x16xf32, #tpu.memory_space<vmem>>, %arg13: memref<1x6x16xf32, #tpu.memory_space<vmem>>) attributes {dimension_semantics = [#tpu.dimension_semantics<parallel>], iteration_bounds = array<i64: 2>, scalar_prefetch = 0 : i64, scratch_operands = 0 : i64, tpu.core_type = #tpu.core_type<tc>, window_params = [{transform_indices = @transform_0, window_bounds = array<i64: 1, 8, 372>}, {pipeline_mode = #tpu.pipeline_mode<synchronous>, transform_indices = @transform_1, window_bounds = array<i64: 9, 16, 8>}, {pipeline_mode = #tpu.pipeline_mode<synchronous>, transform_indices = @transform_2, window_bounds = array<i64: 16, 1>}, {pipeline_mode = #tpu.pipeline_mode<synchronous>, transform_indices = @transform_3, window_bounds = array<i64: 9, 32, 16>}, {pipeline_mode = #tpu.pipeline_mode<synchronous>, transform_indices = @transform_4, window_bounds = array<i64: 32, 1>}, {pipeline_mode = #tpu.pipeline_mode<synchronous>, transform_indices = @transform_5, window_bounds = array<i64: 9, 32, 32>}, {pipeline_mode = #tpu.pipeline_mode<synchronous>, transform_indices = @transform_6, window_bounds = array<i64: 32, 1>}, {pipeline_mode = #tpu.pipeline_mode<synchronous>, transform_indices = @transform_7, window_bounds = array<i64: 6, 32>}, {pipeline_mode = #tpu.pipeline_mode<synchronous>, transform_indices = @transform_8, window_bounds = array<i64: 6, 1>}, {pipeline_mode = #tpu.pipeline_mode<synchronous>, transform_indices = @transform_9, window_bounds = array<i64: 324, 372>}, {pipeline_mode = #tpu.pipeline_mode<synchronous>, transform_indices = @transform_10, window_bounds = array<i64: 324, 132>}, {pipeline_mode = #tpu.pipeline_mode<synchronous>, transform_indices = @transform_11, window_bounds = array<i64: 4, 100, 16>}, {transform_indices = @transform_12, window_bounds = array<i64: 1, 6, 16>}]} {
    %c0 = arith.constant 0 : index
    %c0_0 = arith.constant 0 : index
    %c0_1 = arith.constant 0 : index
    %0 = vector.load %arg1[%c0, %c0_0, %c0_1] : memref<1x8x372xf32, #tpu.memory_space<vmem>>, vector<1x8x372xf32>
    %1 = vector.shape_cast %0 : vector<1x8x372xf32> to vector<8x372xf32>
    %c0_2 = arith.constant 0 : index
    %c0_3 = arith.constant 0 : index
    %c0_4 = arith.constant 0 : index
    %2 = vector.load %arg2[%c0_2, %c0_3, %c0_4] : memref<9x16x8xf32, #tpu.memory_space<vmem>>, vector<1x16x8xf32>
    %3 = vector.shape_cast %2 : vector<1x16x8xf32> to vector<16x8xf32>
    %4 = vector.extract_strided_slice %1 {offsets = [0, 5], sizes = [8, 324], strides = [1, 1]} : vector<8x372xf32> to vector<8x324xf32>
    %cst = arith.constant dense<0.000000e+00> : vector<16x324xf32>
    %5 = tpu.matmul %3, %4, %cst {dimension_numbers = #tpu.dot_dimension_numbers<[1], [0], [0], [1], [0, 0, 1, 1], [], []>} : vector<16x8xf32>, vector<8x324xf32>, vector<16x324xf32> -> vector<16x324xf32>
    %c1 = arith.constant 1 : index
    %c0_5 = arith.constant 0 : index
    %c0_6 = arith.constant 0 : index
    %6 = vector.load %arg2[%c1, %c0_5, %c0_6] : memref<9x16x8xf32, #tpu.memory_space<vmem>>, vector<1x16x8xf32>
    %7 = vector.shape_cast %6 : vector<1x16x8xf32> to vector<16x8xf32>
    %8 = vector.extract_strided_slice %1 {offsets = [0, 6], sizes = [8, 324], strides = [1, 1]} : vector<8x372xf32> to vector<8x324xf32>
    %cst_7 = arith.constant dense<0.000000e+00> : vector<16x324xf32>
    %9 = tpu.matmul %7, %8, %cst_7 {dimension_numbers = #tpu.dot_dimension_numbers<[1], [0], [0], [1], [0, 0, 1, 1], [], []>} : vector<16x8xf32>, vector<8x324xf32>, vector<16x324xf32> -> vector<16x324xf32>
    %10 = arith.addf %5, %9 : vector<16x324xf32>
    %c2 = arith.constant 2 : index
    %c0_8 = arith.constant 0 : index
    %c0_9 = arith.constant 0 : index
    %11 = vector.load %arg2[%c2, %c0_8, %c0_9] : memref<9x16x8xf32, #tpu.memory_space<vmem>>, vector<1x16x8xf32>
    %12 = vector.shape_cast %11 : vector<1x16x8xf32> to vector<16x8xf32>
    %13 = vector.extract_strided_slice %1 {offsets = [0, 7], sizes = [8, 324], strides = [1, 1]} : vector<8x372xf32> to vector<8x324xf32>
    %cst_10 = arith.constant dense<0.000000e+00> : vector<16x324xf32>
    %14 = tpu.matmul %12, %13, %cst_10 {dimension_numbers = #tpu.dot_dimension_numbers<[1], [0], [0], [1], [0, 0, 1, 1], [], []>} : vector<16x8xf32>, vector<8x324xf32>, vector<16x324xf32> -> vector<16x324xf32>
    %15 = arith.addf %10, %14 : vector<16x324xf32>
    %c3 = arith.constant 3 : index
    %c0_11 = arith.constant 0 : index
    %c0_12 = arith.constant 0 : index
    %16 = vector.load %arg2[%c3, %c0_11, %c0_12] : memref<9x16x8xf32, #tpu.memory_space<vmem>>, vector<1x16x8xf32>
    %17 = vector.shape_cast %16 : vector<1x16x8xf32> to vector<16x8xf32>
    %18 = vector.extract_strided_slice %1 {offsets = [0, 23], sizes = [8, 324], strides = [1, 1]} : vector<8x372xf32> to vector<8x324xf32>
    %cst_13 = arith.constant dense<0.000000e+00> : vector<16x324xf32>
    %19 = tpu.matmul %17, %18, %cst_13 {dimension_numbers = #tpu.dot_dimension_numbers<[1], [0], [0], [1], [0, 0, 1, 1], [], []>} : vector<16x8xf32>, vector<8x324xf32>, vector<16x324xf32> -> vector<16x324xf32>
    %20 = arith.addf %15, %19 : vector<16x324xf32>
    %c4 = arith.constant 4 : index
    %c0_14 = arith.constant 0 : index
    %c0_15 = arith.constant 0 : index
    %21 = vector.load %arg2[%c4, %c0_14, %c0_15] : memref<9x16x8xf32, #tpu.memory_space<vmem>>, vector<1x16x8xf32>
    %22 = vector.shape_cast %21 : vector<1x16x8xf32> to vector<16x8xf32>
    %23 = vector.extract_strided_slice %1 {offsets = [0, 24], sizes = [8, 324], strides = [1, 1]} : vector<8x372xf32> to vector<8x324xf32>
    %cst_16 = arith.constant dense<0.000000e+00> : vector<16x324xf32>
    %24 = tpu.matmul %22, %23, %cst_16 {dimension_numbers = #tpu.dot_dimension_numbers<[1], [0], [0], [1], [0, 0, 1, 1], [], []>} : vector<16x8xf32>, vector<8x324xf32>, vector<16x324xf32> -> vector<16x324xf32>
    %25 = arith.addf %20, %24 : vector<16x324xf32>
    %c5 = arith.constant 5 : index
    %c0_17 = arith.constant 0 : index
    %c0_18 = arith.constant 0 : index
    %26 = vector.load %arg2[%c5, %c0_17, %c0_18] : memref<9x16x8xf32, #tpu.memory_space<vmem>>, vector<1x16x8xf32>
    %27 = vector.shape_cast %26 : vector<1x16x8xf32> to vector<16x8xf32>
    %28 = vector.extract_strided_slice %1 {offsets = [0, 25], sizes = [8, 324], strides = [1, 1]} : vector<8x372xf32> to vector<8x324xf32>
    %cst_19 = arith.constant dense<0.000000e+00> : vector<16x324xf32>
    %29 = tpu.matmul %27, %28, %cst_19 {dimension_numbers = #tpu.dot_dimension_numbers<[1], [0], [0], [1], [0, 0, 1, 1], [], []>} : vector<16x8xf32>, vector<8x324xf32>, vector<16x324xf32> -> vector<16x324xf32>
    %30 = arith.addf %25, %29 : vector<16x324xf32>
    %c6 = arith.constant 6 : index
    %c0_20 = arith.constant 0 : index
    %c0_21 = arith.constant 0 : index
    %31 = vector.load %arg2[%c6, %c0_20, %c0_21] : memref<9x16x8xf32, #tpu.memory_space<vmem>>, vector<1x16x8xf32>
    %32 = vector.shape_cast %31 : vector<1x16x8xf32> to vector<16x8xf32>
    %33 = vector.extract_strided_slice %1 {offsets = [0, 41], sizes = [8, 324], strides = [1, 1]} : vector<8x372xf32> to vector<8x324xf32>
    %cst_22 = arith.constant dense<0.000000e+00> : vector<16x324xf32>
    %34 = tpu.matmul %32, %33, %cst_22 {dimension_numbers = #tpu.dot_dimension_numbers<[1], [0], [0], [1], [0, 0, 1, 1], [], []>} : vector<16x8xf32>, vector<8x324xf32>, vector<16x324xf32> -> vector<16x324xf32>
    %35 = arith.addf %30, %34 : vector<16x324xf32>
    %c7 = arith.constant 7 : index
    %c0_23 = arith.constant 0 : index
    %c0_24 = arith.constant 0 : index
    %36 = vector.load %arg2[%c7, %c0_23, %c0_24] : memref<9x16x8xf32, #tpu.memory_space<vmem>>, vector<1x16x8xf32>
    %37 = vector.shape_cast %36 : vector<1x16x8xf32> to vector<16x8xf32>
    %38 = vector.extract_strided_slice %1 {offsets = [0, 42], sizes = [8, 324], strides = [1, 1]} : vector<8x372xf32> to vector<8x324xf32>
    %cst_25 = arith.constant dense<0.000000e+00> : vector<16x324xf32>
    %39 = tpu.matmul %37, %38, %cst_25 {dimension_numbers = #tpu.dot_dimension_numbers<[1], [0], [0], [1], [0, 0, 1, 1], [], []>} : vector<16x8xf32>, vector<8x324xf32>, vector<16x324xf32> -> vector<16x324xf32>
    %40 = arith.addf %35, %39 : vector<16x324xf32>
    %c8 = arith.constant 8 : index
    %c0_26 = arith.constant 0 : index
    %c0_27 = arith.constant 0 : index
    %41 = vector.load %arg2[%c8, %c0_26, %c0_27] : memref<9x16x8xf32, #tpu.memory_space<vmem>>, vector<1x16x8xf32>
    %42 = vector.shape_cast %41 : vector<1x16x8xf32> to vector<16x8xf32>
    %43 = vector.extract_strided_slice %1 {offsets = [0, 43], sizes = [8, 324], strides = [1, 1]} : vector<8x372xf32> to vector<8x324xf32>
    %cst_28 = arith.constant dense<0.000000e+00> : vector<16x324xf32>
    %44 = tpu.matmul %42, %43, %cst_28 {dimension_numbers = #tpu.dot_dimension_numbers<[1], [0], [0], [1], [0, 0, 1, 1], [], []>} : vector<16x8xf32>, vector<8x324xf32>, vector<16x324xf32> -> vector<16x324xf32>
    %45 = arith.addf %40, %44 : vector<16x324xf32>
    %c0_29 = arith.constant 0 : index
    %c0_30 = arith.constant 0 : index
    %46 = vector.load %arg3[%c0_29, %c0_30] : memref<16x1xf32, #tpu.memory_space<vmem>>, vector<16x1xf32>
    %47 = vector.broadcast %46 : vector<16x1xf32> to vector<16x324xf32>
    %48 = arith.addf %45, %47 : vector<16x324xf32>
    %cst_31 = arith.constant 0.000000e+00 : f32
    %49 = vector.broadcast %cst_31 : f32 to vector<16x324xf32>
    %50 = arith.maximumf %48, %49 : vector<16x324xf32>
    %c0_32 = arith.constant 0 : index
    %c0_33 = arith.constant 0 : index
    %51 = vector.load %arg10[%c0_32, %c0_33] : memref<324x372xf32, #tpu.memory_space<vmem>>, vector<324x372xf32>
    %cst_34 = arith.constant dense<0.000000e+00> : vector<16x372xf32>
    %52 = tpu.matmul %50, %51, %cst_34 {dimension_numbers = #tpu.dot_dimension_numbers<[1], [0], [0], [1], [0, 0, 1, 1], [], []>} : vector<16x324xf32>, vector<324x372xf32>, vector<16x372xf32> -> vector<16x372xf32>
    %c0_35 = arith.constant 0 : index
    %c0_36 = arith.constant 0 : index
    %c0_37 = arith.constant 0 : index
    %53 = vector.load %arg4[%c0_35, %c0_36, %c0_37] : memref<9x32x16xf32, #tpu.memory_space<vmem>>, vector<1x32x16xf32>
    %54 = vector.shape_cast %53 : vector<1x32x16xf32> to vector<32x16xf32>
    %55 = vector.extract_strided_slice %52 {offsets = [0, 5], sizes = [16, 324], strides = [1, 1]} : vector<16x372xf32> to vector<16x324xf32>
    %cst_38 = arith.constant dense<0.000000e+00> : vector<32x324xf32>
    %56 = tpu.matmul %54, %55, %cst_38 {dimension_numbers = #tpu.dot_dimension_numbers<[1], [0], [0], [1], [0, 0, 1, 1], [], []>} : vector<32x16xf32>, vector<16x324xf32>, vector<32x324xf32> -> vector<32x324xf32>
    %c1_39 = arith.constant 1 : index
    %c0_40 = arith.constant 0 : index
    %c0_41 = arith.constant 0 : index
    %57 = vector.load %arg4[%c1_39, %c0_40, %c0_41] : memref<9x32x16xf32, #tpu.memory_space<vmem>>, vector<1x32x16xf32>
    %58 = vector.shape_cast %57 : vector<1x32x16xf32> to vector<32x16xf32>
    %59 = vector.extract_strided_slice %52 {offsets = [0, 6], sizes = [16, 324], strides = [1, 1]} : vector<16x372xf32> to vector<16x324xf32>
    %cst_42 = arith.constant dense<0.000000e+00> : vector<32x324xf32>
    %60 = tpu.matmul %58, %59, %cst_42 {dimension_numbers = #tpu.dot_dimension_numbers<[1], [0], [0], [1], [0, 0, 1, 1], [], []>} : vector<32x16xf32>, vector<16x324xf32>, vector<32x324xf32> -> vector<32x324xf32>
    %61 = arith.addf %56, %60 : vector<32x324xf32>
    %c2_43 = arith.constant 2 : index
    %c0_44 = arith.constant 0 : index
    %c0_45 = arith.constant 0 : index
    %62 = vector.load %arg4[%c2_43, %c0_44, %c0_45] : memref<9x32x16xf32, #tpu.memory_space<vmem>>, vector<1x32x16xf32>
    %63 = vector.shape_cast %62 : vector<1x32x16xf32> to vector<32x16xf32>
    %64 = vector.extract_strided_slice %52 {offsets = [0, 7], sizes = [16, 324], strides = [1, 1]} : vector<16x372xf32> to vector<16x324xf32>
    %cst_46 = arith.constant dense<0.000000e+00> : vector<32x324xf32>
    %65 = tpu.matmul %63, %64, %cst_46 {dimension_numbers = #tpu.dot_dimension_numbers<[1], [0], [0], [1], [0, 0, 1, 1], [], []>} : vector<32x16xf32>, vector<16x324xf32>, vector<32x324xf32> -> vector<32x324xf32>
    %66 = arith.addf %61, %65 : vector<32x324xf32>
    %c3_47 = arith.constant 3 : index
    %c0_48 = arith.constant 0 : index
    %c0_49 = arith.constant 0 : index
    %67 = vector.load %arg4[%c3_47, %c0_48, %c0_49] : memref<9x32x16xf32, #tpu.memory_space<vmem>>, vector<1x32x16xf32>
    %68 = vector.shape_cast %67 : vector<1x32x16xf32> to vector<32x16xf32>
    %69 = vector.extract_strided_slice %52 {offsets = [0, 23], sizes = [16, 324], strides = [1, 1]} : vector<16x372xf32> to vector<16x324xf32>
    %cst_50 = arith.constant dense<0.000000e+00> : vector<32x324xf32>
    %70 = tpu.matmul %68, %69, %cst_50 {dimension_numbers = #tpu.dot_dimension_numbers<[1], [0], [0], [1], [0, 0, 1, 1], [], []>} : vector<32x16xf32>, vector<16x324xf32>, vector<32x324xf32> -> vector<32x324xf32>
    %71 = arith.addf %66, %70 : vector<32x324xf32>
    %c4_51 = arith.constant 4 : index
    %c0_52 = arith.constant 0 : index
    %c0_53 = arith.constant 0 : index
    %72 = vector.load %arg4[%c4_51, %c0_52, %c0_53] : memref<9x32x16xf32, #tpu.memory_space<vmem>>, vector<1x32x16xf32>
    %73 = vector.shape_cast %72 : vector<1x32x16xf32> to vector<32x16xf32>
    %74 = vector.extract_strided_slice %52 {offsets = [0, 24], sizes = [16, 324], strides = [1, 1]} : vector<16x372xf32> to vector<16x324xf32>
    %cst_54 = arith.constant dense<0.000000e+00> : vector<32x324xf32>
    %75 = tpu.matmul %73, %74, %cst_54 {dimension_numbers = #tpu.dot_dimension_numbers<[1], [0], [0], [1], [0, 0, 1, 1], [], []>} : vector<32x16xf32>, vector<16x324xf32>, vector<32x324xf32> -> vector<32x324xf32>
    %76 = arith.addf %71, %75 : vector<32x324xf32>
    %c5_55 = arith.constant 5 : index
    %c0_56 = arith.constant 0 : index
    %c0_57 = arith.constant 0 : index
    %77 = vector.load %arg4[%c5_55, %c0_56, %c0_57] : memref<9x32x16xf32, #tpu.memory_space<vmem>>, vector<1x32x16xf32>
    %78 = vector.shape_cast %77 : vector<1x32x16xf32> to vector<32x16xf32>
    %79 = vector.extract_strided_slice %52 {offsets = [0, 25], sizes = [16, 324], strides = [1, 1]} : vector<16x372xf32> to vector<16x324xf32>
    %cst_58 = arith.constant dense<0.000000e+00> : vector<32x324xf32>
    %80 = tpu.matmul %78, %79, %cst_58 {dimension_numbers = #tpu.dot_dimension_numbers<[1], [0], [0], [1], [0, 0, 1, 1], [], []>} : vector<32x16xf32>, vector<16x324xf32>, vector<32x324xf32> -> vector<32x324xf32>
    %81 = arith.addf %76, %80 : vector<32x324xf32>
    %c6_59 = arith.constant 6 : index
    %c0_60 = arith.constant 0 : index
    %c0_61 = arith.constant 0 : index
    %82 = vector.load %arg4[%c6_59, %c0_60, %c0_61] : memref<9x32x16xf32, #tpu.memory_space<vmem>>, vector<1x32x16xf32>
    %83 = vector.shape_cast %82 : vector<1x32x16xf32> to vector<32x16xf32>
    %84 = vector.extract_strided_slice %52 {offsets = [0, 41], sizes = [16, 324], strides = [1, 1]} : vector<16x372xf32> to vector<16x324xf32>
    %cst_62 = arith.constant dense<0.000000e+00> : vector<32x324xf32>
    %85 = tpu.matmul %83, %84, %cst_62 {dimension_numbers = #tpu.dot_dimension_numbers<[1], [0], [0], [1], [0, 0, 1, 1], [], []>} : vector<32x16xf32>, vector<16x324xf32>, vector<32x324xf32> -> vector<32x324xf32>
    %86 = arith.addf %81, %85 : vector<32x324xf32>
    %c7_63 = arith.constant 7 : index
    %c0_64 = arith.constant 0 : index
    %c0_65 = arith.constant 0 : index
    %87 = vector.load %arg4[%c7_63, %c0_64, %c0_65] : memref<9x32x16xf32, #tpu.memory_space<vmem>>, vector<1x32x16xf32>
    %88 = vector.shape_cast %87 : vector<1x32x16xf32> to vector<32x16xf32>
    %89 = vector.extract_strided_slice %52 {offsets = [0, 42], sizes = [16, 324], strides = [1, 1]} : vector<16x372xf32> to vector<16x324xf32>
    %cst_66 = arith.constant dense<0.000000e+00> : vector<32x324xf32>
    %90 = tpu.matmul %88, %89, %cst_66 {dimension_numbers = #tpu.dot_dimension_numbers<[1], [0], [0], [1], [0, 0, 1, 1], [], []>} : vector<32x16xf32>, vector<16x324xf32>, vector<32x324xf32> -> vector<32x324xf32>
    %91 = arith.addf %86, %90 : vector<32x324xf32>
    %c8_67 = arith.constant 8 : index
    %c0_68 = arith.constant 0 : index
    %c0_69 = arith.constant 0 : index
    %92 = vector.load %arg4[%c8_67, %c0_68, %c0_69] : memref<9x32x16xf32, #tpu.memory_space<vmem>>, vector<1x32x16xf32>
    %93 = vector.shape_cast %92 : vector<1x32x16xf32> to vector<32x16xf32>
    %94 = vector.extract_strided_slice %52 {offsets = [0, 43], sizes = [16, 324], strides = [1, 1]} : vector<16x372xf32> to vector<16x324xf32>
    %cst_70 = arith.constant dense<0.000000e+00> : vector<32x324xf32>
    %95 = tpu.matmul %93, %94, %cst_70 {dimension_numbers = #tpu.dot_dimension_numbers<[1], [0], [0], [1], [0, 0, 1, 1], [], []>} : vector<32x16xf32>, vector<16x324xf32>, vector<32x324xf32> -> vector<32x324xf32>
    %96 = arith.addf %91, %95 : vector<32x324xf32>
    %c0_71 = arith.constant 0 : index
    %c0_72 = arith.constant 0 : index
    %97 = vector.load %arg5[%c0_71, %c0_72] : memref<32x1xf32, #tpu.memory_space<vmem>>, vector<32x1xf32>
    %98 = vector.broadcast %97 : vector<32x1xf32> to vector<32x324xf32>
    %99 = arith.addf %96, %98 : vector<32x324xf32>
    %cst_73 = arith.constant 0.000000e+00 : f32
    %100 = vector.broadcast %cst_73 : f32 to vector<32x324xf32>
    %101 = arith.maximumf %99, %100 : vector<32x324xf32>
    %c0_74 = arith.constant 0 : index
    %c0_75 = arith.constant 0 : index
    %102 = vector.load %arg11[%c0_74, %c0_75] : memref<324x132xf32, #tpu.memory_space<vmem>>, vector<324x132xf32>
    %cst_76 = arith.constant dense<0.000000e+00> : vector<32x132xf32>
    %103 = tpu.matmul %101, %102, %cst_76 {dimension_numbers = #tpu.dot_dimension_numbers<[1], [0], [0], [1], [0, 0, 1, 1], [], []>} : vector<32x324xf32>, vector<324x132xf32>, vector<32x132xf32> -> vector<32x132xf32>
    %c0_77 = arith.constant 0 : index
    %c0_78 = arith.constant 0 : index
    %c0_79 = arith.constant 0 : index
    %104 = vector.load %arg6[%c0_77, %c0_78, %c0_79] : memref<9x32x32xf32, #tpu.memory_space<vmem>>, vector<1x32x32xf32>
    %105 = vector.shape_cast %104 : vector<1x32x32xf32> to vector<32x32xf32>
    %106 = vector.extract_strided_slice %103 {offsets = [0, 5], sizes = [32, 100], strides = [1, 1]} : vector<32x132xf32> to vector<32x100xf32>
    %cst_80 = arith.constant dense<0.000000e+00> : vector<32x100xf32>
    %107 = tpu.matmul %105, %106, %cst_80 {dimension_numbers = #tpu.dot_dimension_numbers<[1], [0], [0], [1], [0, 0, 1, 1], [], []>} : vector<32x32xf32>, vector<32x100xf32>, vector<32x100xf32> -> vector<32x100xf32>
    %c1_81 = arith.constant 1 : index
    %c0_82 = arith.constant 0 : index
    %c0_83 = arith.constant 0 : index
    %108 = vector.load %arg6[%c1_81, %c0_82, %c0_83] : memref<9x32x32xf32, #tpu.memory_space<vmem>>, vector<1x32x32xf32>
    %109 = vector.shape_cast %108 : vector<1x32x32xf32> to vector<32x32xf32>
    %110 = vector.extract_strided_slice %103 {offsets = [0, 6], sizes = [32, 100], strides = [1, 1]} : vector<32x132xf32> to vector<32x100xf32>
    %cst_84 = arith.constant dense<0.000000e+00> : vector<32x100xf32>
    %111 = tpu.matmul %109, %110, %cst_84 {dimension_numbers = #tpu.dot_dimension_numbers<[1], [0], [0], [1], [0, 0, 1, 1], [], []>} : vector<32x32xf32>, vector<32x100xf32>, vector<32x100xf32> -> vector<32x100xf32>
    %112 = arith.addf %107, %111 : vector<32x100xf32>
    %c2_85 = arith.constant 2 : index
    %c0_86 = arith.constant 0 : index
    %c0_87 = arith.constant 0 : index
    %113 = vector.load %arg6[%c2_85, %c0_86, %c0_87] : memref<9x32x32xf32, #tpu.memory_space<vmem>>, vector<1x32x32xf32>
    %114 = vector.shape_cast %113 : vector<1x32x32xf32> to vector<32x32xf32>
    %115 = vector.extract_strided_slice %103 {offsets = [0, 7], sizes = [32, 100], strides = [1, 1]} : vector<32x132xf32> to vector<32x100xf32>
    %cst_88 = arith.constant dense<0.000000e+00> : vector<32x100xf32>
    %116 = tpu.matmul %114, %115, %cst_88 {dimension_numbers = #tpu.dot_dimension_numbers<[1], [0], [0], [1], [0, 0, 1, 1], [], []>} : vector<32x32xf32>, vector<32x100xf32>, vector<32x100xf32> -> vector<32x100xf32>
    %117 = arith.addf %112, %116 : vector<32x100xf32>
    %c3_89 = arith.constant 3 : index
    %c0_90 = arith.constant 0 : index
    %c0_91 = arith.constant 0 : index
    %118 = vector.load %arg6[%c3_89, %c0_90, %c0_91] : memref<9x32x32xf32, #tpu.memory_space<vmem>>, vector<1x32x32xf32>
    %119 = vector.shape_cast %118 : vector<1x32x32xf32> to vector<32x32xf32>
    %120 = vector.extract_strided_slice %103 {offsets = [0, 15], sizes = [32, 100], strides = [1, 1]} : vector<32x132xf32> to vector<32x100xf32>
    %cst_92 = arith.constant dense<0.000000e+00> : vector<32x100xf32>
    %121 = tpu.matmul %119, %120, %cst_92 {dimension_numbers = #tpu.dot_dimension_numbers<[1], [0], [0], [1], [0, 0, 1, 1], [], []>} : vector<32x32xf32>, vector<32x100xf32>, vector<32x100xf32> -> vector<32x100xf32>
    %122 = arith.addf %117, %121 : vector<32x100xf32>
    %c4_93 = arith.constant 4 : index
    %c0_94 = arith.constant 0 : index
    %c0_95 = arith.constant 0 : index
    %123 = vector.load %arg6[%c4_93, %c0_94, %c0_95] : memref<9x32x32xf32, #tpu.memory_space<vmem>>, vector<1x32x32xf32>
    %124 = vector.shape_cast %123 : vector<1x32x32xf32> to vector<32x32xf32>
    %125 = vector.extract_strided_slice %103 {offsets = [0, 16], sizes = [32, 100], strides = [1, 1]} : vector<32x132xf32> to vector<32x100xf32>
    %cst_96 = arith.constant dense<0.000000e+00> : vector<32x100xf32>
    %126 = tpu.matmul %124, %125, %cst_96 {dimension_numbers = #tpu.dot_dimension_numbers<[1], [0], [0], [1], [0, 0, 1, 1], [], []>} : vector<32x32xf32>, vector<32x100xf32>, vector<32x100xf32> -> vector<32x100xf32>
    %127 = arith.addf %122, %126 : vector<32x100xf32>
    %c5_97 = arith.constant 5 : index
    %c0_98 = arith.constant 0 : index
    %c0_99 = arith.constant 0 : index
    %128 = vector.load %arg6[%c5_97, %c0_98, %c0_99] : memref<9x32x32xf32, #tpu.memory_space<vmem>>, vector<1x32x32xf32>
    %129 = vector.shape_cast %128 : vector<1x32x32xf32> to vector<32x32xf32>
    %130 = vector.extract_strided_slice %103 {offsets = [0, 17], sizes = [32, 100], strides = [1, 1]} : vector<32x132xf32> to vector<32x100xf32>
    %cst_100 = arith.constant dense<0.000000e+00> : vector<32x100xf32>
    %131 = tpu.matmul %129, %130, %cst_100 {dimension_numbers = #tpu.dot_dimension_numbers<[1], [0], [0], [1], [0, 0, 1, 1], [], []>} : vector<32x32xf32>, vector<32x100xf32>, vector<32x100xf32> -> vector<32x100xf32>
    %132 = arith.addf %127, %131 : vector<32x100xf32>
    %c6_101 = arith.constant 6 : index
    %c0_102 = arith.constant 0 : index
    %c0_103 = arith.constant 0 : index
    %133 = vector.load %arg6[%c6_101, %c0_102, %c0_103] : memref<9x32x32xf32, #tpu.memory_space<vmem>>, vector<1x32x32xf32>
    %134 = vector.shape_cast %133 : vector<1x32x32xf32> to vector<32x32xf32>
    %135 = vector.extract_strided_slice %103 {offsets = [0, 25], sizes = [32, 100], strides = [1, 1]} : vector<32x132xf32> to vector<32x100xf32>
    %cst_104 = arith.constant dense<0.000000e+00> : vector<32x100xf32>
    %136 = tpu.matmul %134, %135, %cst_104 {dimension_numbers = #tpu.dot_dimension_numbers<[1], [0], [0], [1], [0, 0, 1, 1], [], []>} : vector<32x32xf32>, vector<32x100xf32>, vector<32x100xf32> -> vector<32x100xf32>
    %137 = arith.addf %132, %136 : vector<32x100xf32>
    %c7_105 = arith.constant 7 : index
    %c0_106 = arith.constant 0 : index
    %c0_107 = arith.constant 0 : index
    %138 = vector.load %arg6[%c7_105, %c0_106, %c0_107] : memref<9x32x32xf32, #tpu.memory_space<vmem>>, vector<1x32x32xf32>
    %139 = vector.shape_cast %138 : vector<1x32x32xf32> to vector<32x32xf32>
    %140 = vector.extract_strided_slice %103 {offsets = [0, 26], sizes = [32, 100], strides = [1, 1]} : vector<32x132xf32> to vector<32x100xf32>
    %cst_108 = arith.constant dense<0.000000e+00> : vector<32x100xf32>
    %141 = tpu.matmul %139, %140, %cst_108 {dimension_numbers = #tpu.dot_dimension_numbers<[1], [0], [0], [1], [0, 0, 1, 1], [], []>} : vector<32x32xf32>, vector<32x100xf32>, vector<32x100xf32> -> vector<32x100xf32>
    %142 = arith.addf %137, %141 : vector<32x100xf32>
    %c8_109 = arith.constant 8 : index
    %c0_110 = arith.constant 0 : index
    %c0_111 = arith.constant 0 : index
    %143 = vector.load %arg6[%c8_109, %c0_110, %c0_111] : memref<9x32x32xf32, #tpu.memory_space<vmem>>, vector<1x32x32xf32>
    %144 = vector.shape_cast %143 : vector<1x32x32xf32> to vector<32x32xf32>
    %145 = vector.extract_strided_slice %103 {offsets = [0, 27], sizes = [32, 100], strides = [1, 1]} : vector<32x132xf32> to vector<32x100xf32>
    %cst_112 = arith.constant dense<0.000000e+00> : vector<32x100xf32>
    %146 = tpu.matmul %144, %145, %cst_112 {dimension_numbers = #tpu.dot_dimension_numbers<[1], [0], [0], [1], [0, 0, 1, 1], [], []>} : vector<32x32xf32>, vector<32x100xf32>, vector<32x100xf32> -> vector<32x100xf32>
    %147 = arith.addf %142, %146 : vector<32x100xf32>
    %c0_113 = arith.constant 0 : index
    %c0_114 = arith.constant 0 : index
    %148 = vector.load %arg7[%c0_113, %c0_114] : memref<32x1xf32, #tpu.memory_space<vmem>>, vector<32x1xf32>
    %149 = vector.broadcast %148 : vector<32x1xf32> to vector<32x100xf32>
    %150 = arith.addf %147, %149 : vector<32x100xf32>
    %cst_115 = arith.constant 0.000000e+00 : f32
    %151 = vector.broadcast %cst_115 : f32 to vector<32x100xf32>
    %152 = arith.maximumf %150, %151 : vector<32x100xf32>
    %c0_116 = arith.constant 0 : index
    %c0_117 = arith.constant 0 : index
    %c0_118 = arith.constant 0 : index
    %153 = vector.load %arg12[%c0_116, %c0_117, %c0_118] : memref<4x100x16xf32, #tpu.memory_space<vmem>>, vector<1x100x16xf32>
    %154 = vector.shape_cast %153 : vector<1x100x16xf32> to vector<100x16xf32>
    %cst_119 = arith.constant dense<0.000000e+00> : vector<32x16xf32>
    %155 = tpu.matmul %152, %154, %cst_119 {dimension_numbers = #tpu.dot_dimension_numbers<[1], [0], [0], [1], [0, 0, 1, 1], [], []>} : vector<32x100xf32>, vector<100x16xf32>, vector<32x16xf32> -> vector<32x16xf32>
    %c1_120 = arith.constant 1 : index
    %c0_121 = arith.constant 0 : index
    %c0_122 = arith.constant 0 : index
    %156 = vector.load %arg12[%c1_120, %c0_121, %c0_122] : memref<4x100x16xf32, #tpu.memory_space<vmem>>, vector<1x100x16xf32>
    %157 = vector.shape_cast %156 : vector<1x100x16xf32> to vector<100x16xf32>
    %cst_123 = arith.constant dense<0.000000e+00> : vector<32x16xf32>
    %158 = tpu.matmul %152, %157, %cst_123 {dimension_numbers = #tpu.dot_dimension_numbers<[1], [0], [0], [1], [0, 0, 1, 1], [], []>} : vector<32x100xf32>, vector<100x16xf32>, vector<32x16xf32> -> vector<32x16xf32>
    %159 = arith.maximumf %155, %158 : vector<32x16xf32>
    %c2_124 = arith.constant 2 : index
    %c0_125 = arith.constant 0 : index
    %c0_126 = arith.constant 0 : index
    %160 = vector.load %arg12[%c2_124, %c0_125, %c0_126] : memref<4x100x16xf32, #tpu.memory_space<vmem>>, vector<1x100x16xf32>
    %161 = vector.shape_cast %160 : vector<1x100x16xf32> to vector<100x16xf32>
    %cst_127 = arith.constant dense<0.000000e+00> : vector<32x16xf32>
    %162 = tpu.matmul %152, %161, %cst_127 {dimension_numbers = #tpu.dot_dimension_numbers<[1], [0], [0], [1], [0, 0, 1, 1], [], []>} : vector<32x100xf32>, vector<100x16xf32>, vector<32x16xf32> -> vector<32x16xf32>
    %163 = arith.maximumf %159, %162 : vector<32x16xf32>
    %c3_128 = arith.constant 3 : index
    %c0_129 = arith.constant 0 : index
    %c0_130 = arith.constant 0 : index
    %164 = vector.load %arg12[%c3_128, %c0_129, %c0_130] : memref<4x100x16xf32, #tpu.memory_space<vmem>>, vector<1x100x16xf32>
    %165 = vector.shape_cast %164 : vector<1x100x16xf32> to vector<100x16xf32>
    %cst_131 = arith.constant dense<0.000000e+00> : vector<32x16xf32>
    %166 = tpu.matmul %152, %165, %cst_131 {dimension_numbers = #tpu.dot_dimension_numbers<[1], [0], [0], [1], [0, 0, 1, 1], [], []>} : vector<32x100xf32>, vector<100x16xf32>, vector<32x16xf32> -> vector<32x16xf32>
    %167 = arith.maximumf %163, %166 : vector<32x16xf32>
    %c0_132 = arith.constant 0 : index
    %c0_133 = arith.constant 0 : index
    %168 = vector.load %arg8[%c0_132, %c0_133] : memref<6x32xf32, #tpu.memory_space<vmem>>, vector<6x32xf32>
    %cst_134 = arith.constant dense<0.000000e+00> : vector<6x16xf32>
    %169 = tpu.matmul %168, %167, %cst_134 {dimension_numbers = #tpu.dot_dimension_numbers<[1], [0], [0], [1], [0, 0, 1, 1], [], []>} : vector<6x32xf32>, vector<32x16xf32>, vector<6x16xf32> -> vector<6x16xf32>
    %c0_135 = arith.constant 0 : index
    %c0_136 = arith.constant 0 : index
    %170 = vector.load %arg9[%c0_135, %c0_136] : memref<6x1xf32, #tpu.memory_space<vmem>>, vector<6x1xf32>
    %171 = vector.broadcast %170 : vector<6x1xf32> to vector<6x16xf32>
    %172 = arith.addf %169, %171 : vector<6x16xf32>
    %c0_137 = arith.constant 0 : index
    %c0_138 = arith.constant 0 : index
    %c0_139 = arith.constant 0 : index
    %173 = vector.load %arg13[%c0_137, %c0_138, %c0_139] : memref<1x6x16xf32, #tpu.memory_space<vmem>>, vector<1x6x16xf32>
    %174 = vector.shape_cast %173 : vector<1x6x16xf32> to vector<6x16xf32>
    %175 = vector.shape_cast %172 : vector<6x16xf32> to vector<1x6x16xf32>
    tpu.vector_store %arg13[%c0_137, %c0_138, %c0_139], %175 {strides = array<i32>} : memref<1x6x16xf32, #tpu.memory_space<vmem>>, vector<1x6x16xf32>,
    return
  }
  func.func @transform_0(%arg0: i32) -> (i32, i32, i32) {
    %c0_i32 = arith.constant 0 : i32
    %c0_i32_0 = arith.constant 0 : i32
    %c0_i32_1 = arith.constant 0 : i32
    return %arg0, %c0_i32, %c0_i32_0 : i32, i32, i32
  }
  func.func @transform_1(%arg0: i32) -> (i32, i32, i32) {
    %c0_i32 = arith.constant 0 : i32
    %c0_i32_0 = arith.constant 0 : i32
    %c0_i32_1 = arith.constant 0 : i32
    %c0_i32_2 = arith.constant 0 : i32
    return %c0_i32, %c0_i32_0, %c0_i32_1 : i32, i32, i32
  }
  func.func @transform_2(%arg0: i32) -> (i32, i32) {
    %c0_i32 = arith.constant 0 : i32
    %c0_i32_0 = arith.constant 0 : i32
    %c0_i32_1 = arith.constant 0 : i32
    return %c0_i32, %c0_i32_0 : i32, i32
  }
  func.func @transform_3(%arg0: i32) -> (i32, i32, i32) {
    %c0_i32 = arith.constant 0 : i32
    %c0_i32_0 = arith.constant 0 : i32
    %c0_i32_1 = arith.constant 0 : i32
    %c0_i32_2 = arith.constant 0 : i32
    return %c0_i32, %c0_i32_0, %c0_i32_1 : i32, i32, i32
  }
  func.func @transform_4(%arg0: i32) -> (i32, i32) {
    %c0_i32 = arith.constant 0 : i32
    %c0_i32_0 = arith.constant 0 : i32
    %c0_i32_1 = arith.constant 0 : i32
    return %c0_i32, %c0_i32_0 : i32, i32
  }
  func.func @transform_5(%arg0: i32) -> (i32, i32, i32) {
    %c0_i32 = arith.constant 0 : i32
    %c0_i32_0 = arith.constant 0 : i32
    %c0_i32_1 = arith.constant 0 : i32
    %c0_i32_2 = arith.constant 0 : i32
    return %c0_i32, %c0_i32_0, %c0_i32_1 : i32, i32, i32
  }
  func.func @transform_6(%arg0: i32) -> (i32, i32) {
    %c0_i32 = arith.constant 0 : i32
    %c0_i32_0 = arith.constant 0 : i32
    %c0_i32_1 = arith.constant 0 : i32
    return %c0_i32, %c0_i32_0 : i32, i32
  }
  func.func @transform_7(%arg0: i32) -> (i32, i32) {
    %c0_i32 = arith.constant 0 : i32
    %c0_i32_0 = arith.constant 0 : i32
    %c0_i32_1 = arith.constant 0 : i32
    return %c0_i32, %c0_i32_0 : i32, i32
  }
  func.func @transform_8(%arg0: i32) -> (i32, i32) {
    %c0_i32 = arith.constant 0 : i32
    %c0_i32_0 = arith.constant 0 : i32
    %c0_i32_1 = arith.constant 0 : i32
    return %c0_i32, %c0_i32_0 : i32, i32
  }
  func.func @transform_9(%arg0: i32) -> (i32, i32) {
    %c0_i32 = arith.constant 0 : i32
    %c0_i32_0 = arith.constant 0 : i32
    %c0_i32_1 = arith.constant 0 : i32
    return %c0_i32, %c0_i32_0 : i32, i32
  }
  func.func @transform_10(%arg0: i32) -> (i32, i32) {
    %c0_i32 = arith.constant 0 : i32
    %c0_i32_0 = arith.constant 0 : i32
    %c0_i32_1 = arith.constant 0 : i32
    return %c0_i32, %c0_i32_0 : i32, i32
  }
  func.func @transform_11(%arg0: i32) -> (i32, i32, i32) {
    %c0_i32 = arith.constant 0 : i32
    %c0_i32_0 = arith.constant 0 : i32
    %c0_i32_1 = arith.constant 0 : i32
    %c0_i32_2 = arith.constant 0 : i32
    return %c0_i32, %c0_i32_0, %c0_i32_1 : i32, i32, i32
  }
  func.func @transform_12(%arg0: i32) -> (i32, i32, i32) {
    %c0_i32 = arith.constant 0 : i32
    %c0_i32_0 = arith.constant 0 : i32
    %c0_i32_1 = arith.constant 0 : i32
    return %arg0, %c0_i32, %c0_i32_0 : i32, i32, i32
  }
}

</mosaic_0001>

<bundles_post_ra>
// kernel: tpu_custom_call.1
= control target key start
LH: loop header
LB: loop body
LE: loop exit
PB: predicated region body
PF: predicated region fallthrough
CT: control target
= control target key end

     0   :  { %s8456_s21 = smov 0   ;;  %s10198_s0 = inlined_call_operand.vmem [shape: f32[2,8,372], index: 0, kind: input, shape index: {}]   ;;  %s10199_s1 = inlined_call_operand.vmem [shape: f32[9,16,8], index: 1, kind: input, shape index: {}]   ;;  %s10200_s2 = inlined_call_operand.vmem [shape: f32[16,1], index: 2, kind: input, shape index: {}]   ;;  %s10201_s3 = inlined_call_operand.vmem [shape: f32[9,32,16], index: 3, kind: input, shape index: {}]   ;;  %s10202_s4 = inlined_call_operand.vmem [shape: f32[32,1], index: 4, kind: input, shape index: {}]   ;;  %s10203_s5 = inlined_call_operand.vmem [shape: f32[9,32,32], index: 5, kind: input, shape index: {}]   ;;  %s10204_s6 = inlined_call_operand.vmem [shape: f32[32,1], index: 6, kind: input, shape index: {}]   ;;  %s10205_s7 = inlined_call_operand.vmem [shape: f32[6,32], index: 7, kind: input, shape index: {}]   ;;  %s10206_s8 = inlined_call_operand.vmem [shape: f32[6,1], index: 8, kind: input, shape index: {}]   ;;  %s10207_s9 = inlined_call_operand.vmem [shape: f32[324,372], index: 9, kind: input, shape index: {}]   ;;  %s10208_s10 = inlined_call_operand.vmem [shape: f32[324,132], index: 10, kind: input, shape index: {}]   ;;  %s10209_s11 = inlined_call_operand.vmem [shape: f32[4,100,16], index: 11, kind: input, shape index: {}]   ;;  %s10210_s12 = inlined_call_operand.vmem [shape: f32[2,6,16], index: 12, kind: output, shape index: {}]  }
   0x1 LB: > { %s6467_s22 = sadd.s32 4294967295, %s8371_s21   ;;  %p6471_p0 = scmp.ge.s32.totalorder %s8371_s21, 1  ;;  %s8371_s21 = sphi %s8456_s21, %s22_s21  }
   0x2   : > { %p362_p1 = scmp.lt.s32.totalorder %s8371_s21, 3 }
   0x4   : > { %p363_p2 = pnand %p6471_p0, %p362_p1 }
   0x5   : > { %p403_p3 = scmp.lt.s32.totalorder (!%p363_p2), %s6467_s22, 1  ;;  %v8467_v0 = vld [vmem:[%s10199_s1 + $0x10] sm:$0xff] (!%p363_p2)  ;;  %vm435_vm0 = vcmask (!%p363_p2), 64512   ;;  %v8373_v1 = vmov (!%p363_p2), 0.0   ;;  %s8374_s29 = smov (!%p363_p2), 122   ;;  %v2018_v5 = vld [vmem:[%s10200_s2 + $0x8] sm:$0xff] (!%p363_p2) }
   0x6   : > { %366 = sbr.rel (%p363_p2) target bundleno = 2273 (0x8e1), region = 68  ;;  %7050 = vmatprep.mubr.msk.f32.mxu1 (!%p363_p2), %vm435_vm0, %v8467_v0  ;;  %506 = vmatprep.mubr.f32.mxu0 (!%p363_p2), %v8373_v1  ;;  %s8375_s30 = smov (!%p363_p2), 123   ;;  %v2017_v6 = vld [vmem:[%s10200_s2] sm:$0xff] (!%p363_p2)  ;;  %v8383_v7 = vmov (!%p363_p2), 0   ;;  %vm429_vm1 = vcmask (!%p363_p2), 998400   ;;  %v6475_v12 = vld [vmem:[%s10199_s1 + $0x18] sm:$0xff] (!%p363_p2) }
   0x7   : > { %s8376_s13 = smov (!%p363_p2), 121   ;;  %s8377_s14 = smov (!%p363_p2), 105   ;;  %8139 = vset.pattern.permute.xlu0 (!%p363_p2), %v8383_v7  ;;  %8138 = vset.pattern.permute.xlu1 (!%p363_p2), %v8383_v7  ;;  %v415_v14 = vld [vmem:[%s10199_s1] sm:$0xff] (!%p363_p2)  ;;  %vm600_vm2 = vcmask (!%p363_p2), 1006592   ;;  %vm773_vm3 = vcmask (!%p363_p2), 990208   ;;  %v416_v21 = vld [vmem:[%s10199_s1 + $0x8] sm:$0xff] (!%p363_p2) }
   0x8   : > { %s8378_s15 = smov (!%p363_p2), 104   ;;  %s10217_s16 = smov (!%p363_p2), 103   ;;  %v6484_v24 = vld [vmem:[%s10199_s1 + $0x20] sm:$0xff] (!%p363_p2)  ;;  %vm952_vm4 = vcmask (!%p363_p2), 859136   ;;  %v6485_v29 = vld [vmem:[%s10199_s1 + $0x28] sm:$0xff] (!%p363_p2)  ;;  %vm1131_vm5 = vcmask (!%p363_p2), 850944  }
   0x9   : > { %s10215_s17 = smov (!%p363_p2), 87   ;;  %s10213_s18 = smov (!%p363_p2), 86   ;;  %v6490_v33 = vld [vmem:[%s10199_s1 + $0x30] sm:$0xff] (!%p363_p2)  ;;  %v6491_v38 = vld [vmem:[%s10199_s1 + $0x38] sm:$0xff] (!%p363_p2)  ;;  %vm1310_vm6 = vcmask (!%p363_p2), 842752   ;;  %v6496_v41 = vld [vmem:[%s10199_s1 + $0x40] sm:$0xff] (!%p363_p2) }
   0xa   : > { %s10211_s19 = smov (!%p363_p2), 85   ;;  %v6497_v45 = vld [vmem:[%s10199_s1 + $0x48] sm:$0xff] (!%p363_p2)  ;;  %vm1489_vm7 = vcmask (!%p363_p2), 711680   ;;  %v6502_v49 = vld [vmem:[%s10199_s1 + $0x50] sm:$0xff] (!%p363_p2)  ;;  %v6503_v53 = vld [vmem:[%s10199_s1 + $0x58] sm:$0xff] (!%p363_p2)  ;;  %vm1668_vm8 = vcmask (!%p363_p2), 703488  }
   0xb   : > { %v6508_v56 = vld [vmem:[%s10199_s1 + $0x60] sm:$0xff] (!%p363_p2)  ;;  %v6509_v59 = vld [vmem:[%s10199_s1 + $0x68] sm:$0xff] (!%p363_p2)  ;;  %vm1847_vm9 = vcmask (!%p363_p2), 695296   ;;  %v6514_v63 = vld [vmem:[%s10199_s1 + $0x70] sm:$0xff] (!%p363_p2)  ;;  %vm2164_vm10 = vcmask (!%p363_p2), 556032   ;;  %vm2171_vm11 = vcmask (!%p363_p2), 1043456  }
   0xc   : > { %v2094_v7 = vld [vmem:[%s10207_s9 + $0x1a8] sm:$0xff] (!%p363_p2)  ;;  %vm2522_vm12 = vcmask (!%p363_p2), 130048   ;;  %s10219_s26 = smov (!%p363_p2), 103   ;;  %s10221_s27 = smov (!%p363_p2), 86   ;;  %vm4835_vm13 = vcmask (!%p363_p2), 261120   ;;  %vm5913_vm14 = vcmask (!%p363_p2), 818176  }
   0xd   : > { %s10224_s22 = smov (!%p403_p3, %s6467_s22), 1  ;;  %s8385_s20 = smov 112   ;;  %vm8390_vm15 = vmmov 0  }
   0xe   : > { %s8111_s25 = smul.u32 24, %s10224_s22  ;;  %s8386_s23 = smov 111  }
   0xf   : > { %s8387_s24 = smov 102  }
  0x10   : > { %s407_s28 = scalar_lea.vmem %s10198_s0, %s8111_s25  ;;  %s8388_s25 = smov 101  }
  0x11   : > { %v413_v2 = vld [vmem:[%s407_s28 + $0x8] sm:$0xff]  ;;  %v412_v3 = vld [vmem:[%s407_s28] sm:$0xff]  ;;  %v414_v4 = vld [vmem:[%s407_s28 + $0x10] sm:$0xff]  ;;  %s8384_s28 = smov 113  }
  0x12   : > { %425 = vrot.lane.b32.xlu0 %v413_v2, %s8374_s29  ;;  %423 = vrot.lane.b32.xlu1 %v412_v3, %s8374_s29 }
  0x16   : > { %427 = vrot.lane.b32.xlu0 %v414_v4, %s8374_s29  ;;  %596 = vrot.lane.b32.xlu1 %v413_v2, %s8375_s30 }
  0x1a   : > { %598 = vrot.lane.b32.xlu0 %v414_v4, %s8375_s30  ;;  %594 = vrot.lane.b32.xlu1 %v412_v3, %s8375_s30 }
  0x1e   : > { %769 = vrot.lane.b32.xlu0 %v413_v2, %s8376_s13  ;;  %771 = vrot.lane.b32.xlu1 %v414_v4, %s8376_s13 }
  0x22   : > { %767 = vrot.lane.b32.xlu0 %v412_v3, %s8376_s13  ;;  %948 = vrot.lane.b32.xlu1 %v413_v2, %s8377_s14 }
  0x26   : > { %950 = vrot.lane.b32.xlu0 %v414_v4, %s8377_s14  ;;  %946 = vrot.lane.b32.xlu1 %v412_v3, %s8377_s14 }
  0x2a   : > { %1127 = vrot.lane.b32.xlu0 %v413_v2, %s8378_s15  ;;  %1129 = vrot.lane.b32.xlu1 %v414_v4, %s8378_s15 }
  0x2e   : > { %1125 = vrot.lane.b32.xlu0 %v412_v3, %s8378_s15  ;;  %1306 = vrot.lane.b32.xlu1 %v413_v2, %s10217_s16 }
  0x32   : > { %1308 = vrot.lane.b32.xlu0 %v414_v4, %s10217_s16  ;;  %1304 = vrot.lane.b32.xlu1 %v412_v3, %s10217_s16  ;;  %s10220_s16 = smov 87  }
  0x36   : > { %1485 = vrot.lane.b32.xlu0 %v413_v2, %s10215_s17  ;;  %1487 = vrot.lane.b32.xlu1 %v414_v4, %s10215_s17 }
  0x3a   : > { %1483 = vrot.lane.b32.xlu0 %v412_v3, %s10215_s17  ;;  %1664 = vrot.lane.b32.xlu1 %v413_v2, %s10213_s18 }
  0x3e   : > { %1666 = vrot.lane.b32.xlu0 %v414_v4, %s10213_s18  ;;  %1662 = vrot.lane.b32.xlu1 %v412_v3, %s10213_s18 }
  0x42   : > { %1843 = vrot.lane.b32.xlu0 %v413_v2, %s10211_s19  ;;  %1845 = vrot.lane.b32.xlu1 %v414_v4, %s10211_s19  ;;  %v2045_v4 = vld [vmem:[%s10207_s9 + $0x20] sm:$0xff] }
  0x46   : > { %1841 = vrot.lane.b32.xlu0 %v412_v3, %s10211_s19  ;;  %2021 = vperm.xlu1 %8138, %v2017_v6   ;;  %v2042_v3 = vld [vmem:[%s10207_s9 + $0x8] sm:$0xff]  ;;  %v2091_v6 = vld [vmem:[%s10207_s9 + $0x190] sm:$0xff]  ;;  %s6473_s19 = sshll.u32 %s10224_s22, 3 }
  0x4a   : > { %2026 = vperm.xlu0 %8139, %v2018_v5   ;;  %v6515_v5 = vld [vmem:[%s10199_s1 + $0x78] sm:$0xff] }
  0x84   : > { %v426_v8 = vpop.permute.xlu0 %425  ;;  %v424_v9 = vpop.permute.xlu1 %423 }
  0x85   : > { %v430_v15 = vsel %vm429_vm1, %v424_v9, %v426_v8  ;;  %v7469_v9 = vpack.c.bf16 %v2045_v4, %v2042_v3  ;;  %v2070_v3 = vld [vmem:[%s10207_s9 + $0xe8] sm:$0xff] }
  0x88   : > { %v428_v10 = vpop.permute.xlu0 %427  ;;  %v597_v11 = vpop.permute.xlu1 %596 }
  0x89   : > { %7048 = vmatprep.subr.mxu1 %v428_v10  ;;  %v431_v13 = vsel %vm429_vm1, %v426_v8, %v428_v10 }
  0x8a   : > { %442 = vmatprep.subr.mxu0 %v431_v13  ;;  %7049 = vmatpush3.msra.mxu1 %v428_v10  ;;  %v6520_v10 = vld [vmem:[%s10199_s1 + $0x80] sm:$0xff]  ;;  %v2044_v13 = vld [vmem:[%s10207_s9 + $0x18] sm:$0xff] }
  0x8b   : > { %443 = vmatpush1.msra.mxu0 %v430_v15  ;;  %7051 = vmatmul.mubr.msk.f32.vlgmr.msra.gmra.mrb[0].mxu1 %vm435_vm0, %v6475_v12  ;;  %v2051_v15 = vld [vmem:[%s10207_s9 + $0x50] sm:$0xff] }
  0x8c   : > { %v599_v16 = vpop.permute.xlu0 %598  ;;  %6476 = vmatmul.mubr.msk.f32.vlgmr.msra.gmra.mrb[0].mxu0 %vm435_vm0, %v8467_v0  ;;  %v595_v17 = vpop.permute.xlu1 %594  ;;  %7055 = vmatprep.mubr.msk.f32.mxu1 %vm435_vm0, %v415_v14 }
  0x8d   : > { %v601_v18 = vsel %vm600_vm2, %v595_v17, %v597_v11  ;;  %v602_v19 = vsel %vm600_vm2, %v597_v11, %v599_v16  ;;  %7053 = vmatprep.subr.mxu1 %v599_v16  ;;  %512 = vmatprep.mubr.f32.mxu0 %v8373_v1  ;;  %v7549_v11 = vpack.c.bf16 %v2094_v7, %v2091_v6  ;;  %v2046_v17 = vld [vmem:[%s10207_s9 + $0x28] sm:$0xff]  ;;  %v2124_v6 = vld [vmem:[%s10207_s9 + $0x298] sm:$0xff] }
  0x8e   : > { %612 = vmatprep.subr.mxu0 %v602_v19  ;;  %7054 = vmatpush3.msra.mxu1 %v599_v16  ;;  %v2043_v16 = vld [vmem:[%s10207_s9 + $0x10] sm:$0xff] }
  0x8f   : > { %613 = vmatpush1.msra.mxu0 %v601_v18  ;;  %v6521_v18 = vld [vmem:[%s10199_s1 + $0x88] sm:$0xff] }
  0x90   : > { %v770_v20 = vpop.permute.xlu0 %769  ;;  %6477 = vmatmul.mubr.msk.f32.gmra.mrb[2].mxu0 %vm435_vm0, %v6475_v12  ;;  %v772_v22 = vpop.permute.xlu1 %771  ;;  %v2041_v12 = vld [vmem:[%s10207_s9] sm:$0xff] }
  0x91   : > { %676 = vmatprep.mubr.f32.mxu0 %v8373_v1  ;;  %v775_v23 = vsel %vm773_vm3, %v770_v20, %v772_v22  ;;  %7058 = vmatprep.subr.mxu1 %v772_v22  ;;  %v7471_v19 = vpack.c.bf16 %v2044_v13, %v2041_v12 }
  0x92   : > { %785 = vmatprep.subr.mxu0 %v775_v23  ;;  %v2047_v23 = vld [vmem:[%s10207_s9 + $0x30] sm:$0xff] }
  0x93   : > { %7056 = vmatmul.mubr.msk.f32.vlgmr.msra.gmra.mrb[0].mxu1 %vm435_vm0, %v416_v21 }
  0x94   : > { %v768_v25 = vpop.permute.xlu0 %767  ;;  %6480 = vmatmul.mubr.msk.f32.vlgmr.msra.gmra.mrb[0].mxu0 %vm435_vm0, %v415_v14  ;;  %7059 = vmatpush3.msra.mxu1 %v772_v22  ;;  %v949_v26 = vpop.permute.xlu1 %948  ;;  %v2048_v14 = vld [vmem:[%s10207_s9 + $0x38] sm:$0xff] }
  0x95   : > { %v774_v27 = vsel %vm773_vm3, %v768_v25, %v770_v20  ;;  %682 = vmatprep.mubr.f32.mxu0 %v8373_v1  ;;  %7060 = vmatprep.mubr.msk.f32.mxu1 %vm435_vm0, %v6484_v24  ;;  %v2097_v20 = vld [vmem:[%s10207_s9 + $0x1c0] sm:$0xff]  ;;  %v7473_v22 = vpack.c.bf16 %v2051_v15, %v2048_v14  ;;  %v2054_v25 = vld [vmem:[%s10207_s9 + $0x68] sm:$0xff]  ;;  %v2076_v15 = vld [vmem:[%s10207_s9 + $0x118] sm:$0xff] }
  0x96   : > { %786 = vmatpush1.msra.mxu0 %v774_v27  ;;  %v7551_v27 = vpack.c.bf16 %v2046_v17, %v2043_v16  ;;  %v2073_v14 = vld [vmem:[%s10207_s9 + $0x100] sm:$0xff]  ;;  %v2127_v17 = vld [vmem:[%s10207_s9 + $0x2b0] sm:$0xff] }
  0x98   : > { %6481 = vmatmul.mubr.msk.f32.gmra.mrb[2].mxu0 %vm435_vm0, %v416_v21  ;;  %v951_v28 = vpop.permute.xlu0 %950  ;;  %v947_v30 = vpop.permute.xlu1 %946  ;;  %v2100_v21 = vld [vmem:[%s10207_s9 + $0x1d8] sm:$0xff] }
  0x99   : > { %849 = vmatprep.mubr.f32.mxu0 %v8373_v1  ;;  %v954_v31 = vsel %vm952_vm4, %v949_v26, %v951_v28  ;;  %7063 = vmatprep.subr.mxu1 %v951_v28  ;;  %v953_v32 = vsel %vm952_vm4, %v947_v30, %v949_v26  ;;  %v2057_v26 = vld [vmem:[%s10207_s9 + $0x80] sm:$0xff]  ;;  %v2052_v30 = vld [vmem:[%s10207_s9 + $0x58] sm:$0xff] }
  0x9a   : > { %964 = vmatprep.subr.mxu0 %v954_v31 }
  0x9b   : > { %7061 = vmatmul.mubr.msk.f32.vlgmr.msra.gmra.mrb[0].mxu1 %vm435_vm0, %v6485_v29 }
  0x9c   : > { %6486 = vmatmul.mubr.msk.f32.vlgmr.msra.gmra.mrb[0].mxu0 %vm435_vm0, %v6484_v24  ;;  %v1128_v34 = vpop.permute.xlu0 %1127  ;;  %7064 = vmatpush3.msra.mxu1 %v951_v28  ;;  %v1130_v35 = vpop.permute.xlu1 %1129  ;;  %v2050_v24 = vld [vmem:[%s10207_s9 + $0x48] sm:$0xff]  ;;  %v7553_v28 = vpack.c.bf16 %v2100_v21, %v2097_v20  ;;  %v2077_v20 = vld [vmem:[%s10207_s9 + $0x120] sm:$0xff]  ;;  %v2080_v21 = vld [vmem:[%s10207_s9 + $0x138] sm:$0xff] }
  0x9d   : > { %965 = vmatpush1.msra.mxu0 %v953_v32  ;;  %855 = vmatprep.mubr.f32.mxu0 %v8373_v1  ;;  %v1133_v36 = vsel %vm1131_vm5, %v1128_v34, %v1130_v35  ;;  %v7475_v31 = vpack.c.bf16 %v2050_v24, %v2047_v23  ;;  %v2103_v32 = vld [vmem:[%s10207_s9 + $0x1f0] sm:$0xff]  ;;  %v7571_v24 = vpack.c.bf16 %v2076_v15, %v2073_v14  ;;  %v2133_v15 = vld [vmem:[%s10207_s9 + $0x2e0] sm:$0xff] }
  0x9e   : > { %7065 = vmatprep.mubr.msk.f32.mxu1 %vm435_vm0, %v6490_v33  ;;  %1143 = vmatprep.subr.mxu0 %v1133_v36  ;;  %v2056_v36 = vld [vmem:[%s10207_s9 + $0x78] sm:$0xff]  ;;  %v2087_v23 = vld [vmem:[%s10207_s9 + $0x170] sm:$0xff] }
  0x9f   : > { %7068 = vmatprep.subr.mxu1 %v1130_v35  ;;  %v2135_v14 = vld [vmem:[%s10207_s9 + $0x2f0] sm:$0xff] }
  0xa0   : > { %6487 = vmatmul.mubr.msk.f32.gmra.mrb[2].mxu0 %vm435_vm0, %v6485_v29  ;;  %v1126_v37 = vpop.permute.xlu0 %1125  ;;  %v1307_v39 = vpop.permute.xlu1 %1306  ;;  %v2049_v29 = vld [vmem:[%s10207_s9 + $0x40] sm:$0xff] }
  0xa1   : > { %1028 = vmatprep.mubr.f32.mxu0 %v8373_v1  ;;  %v1132_v40 = vsel %vm1131_vm5, %v1126_v37, %v1128_v34  ;;  %v7477_v34 = vpack.c.bf16 %v2057_v26, %v2054_v25  ;;  %v2060_v37 = vld [vmem:[%s10207_s9 + $0x98] sm:$0xff]  ;;  %v7495_v26 = vpack.c.bf16 %v2080_v21, %v2077_v20 }
  0xa3   : > { %7066 = vmatmul.mubr.msk.f32.vlgmr.msra.gmra.mrb[0].mxu1 %vm435_vm0, %v6491_v38 }
  0xa4   : > { %6492 = vmatmul.mubr.msk.f32.vlgmr.msra.gmra.mrb[0].mxu0 %vm435_vm0, %v6490_v33  ;;  %7069 = vmatpush3.msra.mxu1 %v1130_v35  ;;  %v1309_v42 = vpop.permute.xlu0 %1308  ;;  %v1305_v43 = vpop.permute.xlu1 %1304  ;;  %v2106_v33 = vld [vmem:[%s10207_s9 + $0x208] sm:$0xff]  ;;  %v2053_v35 = vld [vmem:[%s10207_s9 + $0x60] sm:$0xff] }
  0xa5   : > { %1144 = vmatpush1.msra.mxu0 %v1132_v40  ;;  %1034 = vmatprep.mubr.f32.mxu0 %v8373_v1  ;;  %v1312_v44 = vsel %vm1310_vm6, %v1307_v39, %v1309_v42  ;;  %v1311_v48 = vsel %vm1310_vm6, %v1305_v43, %v1307_v39  ;;  %v7555_v39 = vpack.c.bf16 %v2052_v30, %v2049_v29  ;;  %v2086_v29 = vld [vmem:[%s10207_s9 + $0x168] sm:$0xff] }
  0xa6   : > { %7070 = vmatprep.mubr.msk.f32.mxu1 %vm435_vm0, %v6496_v41  ;;  %1322 = vmatprep.subr.mxu0 %v1312_v44  ;;  %v7557_v40 = vpack.c.bf16 %v2106_v33, %v2103_v32  ;;  %v7479_v43 = vpack.c.bf16 %v2056_v36, %v2053_v35  ;;  %v2109_v44 = vld [vmem:[%s10207_s9 + $0x220] sm:$0xff]  ;;  %v2090_v30 = vld [vmem:[%s10207_s9 + $0x188] sm:$0xff]  ;;  %v2092_v35 = vld [vmem:[%s10207_s9 + $0x198] sm:$0xff] }
  0xa7   : > { %7073 = vmatprep.subr.mxu1 %v1309_v42  ;;  %v2096_v36 = vld [vmem:[%s10207_s9 + $0x1b8] sm:$0xff] }
  0xa8   : > { %6493 = vmatmul.mubr.msk.f32.gmra.mrb[2].mxu0 %vm435_vm0, %v6491_v38  ;;  %v1486_v46 = vpop.permute.xlu0 %1485  ;;  %v1488_v47 = vpop.permute.xlu1 %1487  ;;  %v2063_v38 = vld [vmem:[%s10207_s9 + $0xb0] sm:$0xff] }
  0xa9   : > { %1207 = vmatprep.mubr.f32.mxu0 %v8373_v1  ;;  %v1491_v50 = vsel %vm1489_vm7, %v1486_v46, %v1488_v47 }
  0xab   : > { %7071 = vmatmul.mubr.msk.f32.vlgmr.msra.gmra.mrb[0].mxu1 %vm435_vm0, %v6497_v45 }
  0xac   : > { %6498 = vmatmul.mubr.msk.f32.vlgmr.msra.gmra.mrb[0].mxu0 %vm435_vm0, %v6496_v41  ;;  %7074 = vmatpush3.msra.mxu1 %v1309_v42  ;;  %v1484_v51 = vpop.permute.xlu0 %1483  ;;  %v1665_v52 = vpop.permute.xlu1 %1664  ;;  %v2055_v41 = vld [vmem:[%s10207_s9 + $0x70] sm:$0xff]  ;;  %v2058_v42 = vld [vmem:[%s10207_s9 + $0x88] sm:$0xff] }
  0xad   : > { %1323 = vmatpush1.msra.mxu0 %v1311_v48  ;;  %1213 = vmatprep.mubr.f32.mxu0 %v8373_v1  ;;  %v1490_v55 = vsel %vm1489_vm7, %v1484_v51, %v1486_v46  ;;  %v7481_v46 = vpack.c.bf16 %v2063_v38, %v2060_v37  ;;  %v2062_v48 = vld [vmem:[%s10207_s9 + $0xa8] sm:$0xff]  ;;  %v7559_v51 = vpack.c.bf16 %v2058_v42, %v2055_v41  ;;  %v2099_v37 = vld [vmem:[%s10207_s9 + $0x1d0] sm:$0xff] }
  0xae   : > { %7075 = vmatprep.mubr.msk.f32.mxu1 %vm435_vm0, %v6502_v49  ;;  %1501 = vmatprep.subr.mxu0 %v1491_v50  ;;  %v2069_v50 = vld [vmem:[%s10207_s9 + $0xe0] sm:$0xff]  ;;  %v2098_v41 = vld [vmem:[%s10207_s9 + $0x1c8] sm:$0xff] }
  0xaf   : > { %7078 = vmatprep.subr.mxu1 %v1488_v47  ;;  %v2102_v42 = vld [vmem:[%s10207_s9 + $0x1e8] sm:$0xff] }
  0xb0   : > { %6499 = vmatmul.mubr.msk.f32.gmra.mrb[2].mxu0 %vm435_vm0, %v6497_v45  ;;  %v1667_v54 = vpop.permute.xlu0 %1666  ;;  %v1663_v58 = vpop.permute.xlu1 %1662  ;;  %v2112_v45 = vld [vmem:[%s10207_s9 + $0x238] sm:$0xff] }
  0xb1   : > { %1386 = vmatprep.mubr.f32.mxu0 %v8373_v1  ;;  %v1670_v57 = vsel %vm1668_vm8, %v1665_v52, %v1667_v54  ;;  %v1669_v62 = vsel %vm1668_vm8, %v1663_v58, %v1665_v52  ;;  %v7561_v52 = vpack.c.bf16 %v2112_v45, %v2109_v44 }
  0xb3   : > { %7076 = vmatmul.mubr.msk.f32.vlgmr.msra.gmra.mrb[0].mxu1 %vm435_vm0, %v6503_v53 }
  0xb4   : > { %6504 = vmatmul.mubr.msk.f32.vlgmr.msra.gmra.mrb[0].mxu0 %vm435_vm0, %v6502_v49  ;;  %7079 = vmatpush3.msra.mxu1 %v1488_v47  ;;  %v1846_v60 = vpop.permute.xlu1 %1845  ;;  %v1844_v61 = vpop.permute.xlu0 %1843  ;;  %v2059_v47 = vld [vmem:[%s10207_s9 + $0x90] sm:$0xff]  ;;  %v2066_v49 = vld [vmem:[%s10207_s9 + $0xc8] sm:$0xff] }
  0xb5   : > { %1502 = vmatpush1.msra.mxu0 %v1490_v55  ;;  %1392 = vmatprep.mubr.f32.mxu0 %v8373_v1  ;;  %v1849_v0 = vsel %vm1847_vm9, %v1844_v61, %v1846_v60  ;;  %v7483_v55 = vpack.c.bf16 %v2062_v48, %v2059_v47  ;;  %v7485_v58 = vpack.c.bf16 %v2069_v50, %v2066_v49  ;;  %v2104_v47 = vld [vmem:[%s10207_s9 + $0x1f8] sm:$0xff]  ;;  %v2111_v49 = vld [vmem:[%s10207_s9 + $0x230] sm:$0xff] }
  0xb6   : > { %7080 = vmatprep.mubr.msk.f32.mxu1 %vm435_vm0, %v6508_v56  ;;  %1680 = vmatprep.subr.mxu0 %v1670_v57  ;;  %v2118_v57 = vld [vmem:[%s10207_s9 + $0x268] sm:$0xff]  ;;  %v2108_v48 = vld [vmem:[%s10207_s9 + $0x218] sm:$0xff] }
  0xb7   : > { %7083 = vmatprep.subr.mxu1 %v1667_v54 }
  0xb8   : > { %6505 = vmatmul.mubr.msk.f32.gmra.mrb[2].mxu0 %vm435_vm0, %v6503_v53  ;;  %v1842_v2 = vpop.permute.xlu0 %1841  ;;  %v2061_v53 = vld [vmem:[%s10207_s9 + $0xa0] sm:$0xff] }
  0xb9   : > { %1565 = vmatprep.mubr.f32.mxu0 %v8373_v1  ;;  %v1848_v8 = vsel %vm1847_vm9, %v1842_v2, %v1844_v61  ;;  %v2072_v61 = vld [vmem:[%s10207_s9 + $0xf8] sm:$0xff]  ;;  %v2067_v2 = vld [vmem:[%s10207_s9 + $0xd0] sm:$0xff] }
  0xba   : > { %v7567_v12 = vpack.c.bf16 %v2070_v3, %v2067_v2  ;;  %v2122_v2 = vld [vmem:[%s10207_s9 + $0x288] sm:$0xff] }
  0xbb   : > { %7081 = vmatmul.mubr.msk.f32.vlgmr.msra.gmra.mrb[0].mxu1 %vm435_vm0, %v6509_v59  ;;  %v2126_v3 = vld [vmem:[%s10207_s9 + $0x2a8] sm:$0xff] }
  0xbc   : > { %6510 = vmatmul.mubr.msk.f32.vlgmr.msra.gmra.mrb[0].mxu0 %vm435_vm0, %v6508_v56  ;;  %7084 = vmatpush3.msra.mxu1 %v1667_v54  ;;  %v2064_v54 = vld [vmem:[%s10207_s9 + $0xb8] sm:$0xff]  ;;  %v2115_v56 = vld [vmem:[%s10207_s9 + $0x250] sm:$0xff] }
  0xbd   : > { %1681 = vmatpush1.msra.mxu0 %v1669_v62  ;;  %1571 = vmatprep.mubr.f32.mxu0 %v8373_v1  ;;  %v2075_v62 = vld [vmem:[%s10207_s9 + $0x110] sm:$0xff] }
  0xbe   : > { %7085 = vmatprep.mubr.msk.f32.mxu1 %vm435_vm0, %v6514_v63  ;;  %1859 = vmatprep.subr.mxu0 %v1849_v0  ;;  %v7565_v0 = vpack.c.bf16 %v2118_v57, %v2115_v56  ;;  %v7489_v7 = vpack.c.bf16 %v2075_v62, %v2072_v61  ;;  %v2123_v61 = vld [vmem:[%s10207_s9 + $0x290] sm:$0xff] }
  0xbf   : > { %7088 = vmatprep.subr.mxu1 %v1846_v60 }
  0xc0   : > { %6511 = vmatmul.mubr.msk.f32.gmra.mrb[2].mxu0 %vm435_vm0, %v6509_v59  ;;  %v2065_v59 = vld [vmem:[%s10207_s9 + $0xc0] sm:$0xff] }
  0xc1   : > { %1744 = vmatprep.mubr.f32.mxu0 %v8373_v1 }
  0xc3   : > { %7086 = vmatmul.mubr.msk.f32.vlgmr.msra.gmra.mrb[0].mxu1 %vm435_vm0, %v6515_v5 }
  0xc4   : > { %6516 = vmatmul.mubr.msk.f32.vlgmr.msra.gmra.mrb[0].mxu0 %vm435_vm0, %v6514_v63  ;;  %7089 = vmatpush3.msra.mxu1 %v1846_v60  ;;  %v2068_v60 = vld [vmem:[%s10207_s9 + $0xd8] sm:$0xff]  ;;  %v7563_v63 = vpack.c.bf16 %v2064_v54, %v2061_v53  ;;  %v2110_v53 = vld [vmem:[%s10207_s9 + $0x228] sm:$0xff] }
  0xc5   : > { %1860 = vmatpush1.msra.mxu0 %v1848_v8  ;;  %1750 = vmatprep.mubr.f32.mxu0 %v8373_v1  ;;  %v7487_v4 = vpack.c.bf16 %v2068_v60, %v2065_v59  ;;  %v2071_v8 = vld [vmem:[%s10207_s9 + $0xf0] sm:$0xff]  ;;  %v2114_v54 = vld [vmem:[%s10207_s9 + $0x248] sm:$0xff]  ;;  %v2116_v59 = vld [vmem:[%s10207_s9 + $0x258] sm:$0xff] }
  0xc6   : > { %7090 = vmatprep.mubr.msk.f32.mxu1 %vm435_vm0, %v6520_v10  ;;  %7470 = vmatprep.subr.bf16.mxu1 %v7469_v9  ;;  %v2074_v9 = vld [vmem:[%s10207_s9 + $0x108] sm:$0xff]  ;;  %v2120_v60 = vld [vmem:[%s10207_s9 + $0x278] sm:$0xff] }
  0xc7   : > { %7550 = vmatprep.subr.bf16.mxu0 %v7549_v11  ;;  %v2081_v11 = vld [vmem:[%s10207_s9 + $0x140] sm:$0xff]  ;;  %v7491_v16 = vpack.c.bf16 %v2074_v9, %v2071_v8  ;;  %v2128_v8 = vld [vmem:[%s10207_s9 + $0x2b8] sm:$0xff]  ;;  %v2079_v9 = vld [vmem:[%s10207_s9 + $0x130] sm:$0xff] }
  0xc8   : > { %6517 = vmatmul.mubr.msk.f32.gmra.mrb[2].mxu0 %vm435_vm0, %v6515_v5  ;;  %v2121_v5 = vld [vmem:[%s10207_s9 + $0x280] sm:$0xff] }
  0xc9   : > { %1923 = vmatprep.mubr.f32.mxu0 %v8373_v1  ;;  %v7569_v13 = vpack.c.bf16 %v2124_v6, %v2121_v5 }
  0xcb   : > { %7091 = vmatmul.mubr.msk.f32.vlgmr.msra.gmra.mrb[0].mxu1 %vm435_vm0, %v6521_v18 }
  0xcc   : > { %6522 = vmatmul.mubr.msk.f32.vlgmr.msra.gmra.mrb[0].mxu0 %vm435_vm0, %v6520_v10  ;;  %7472 = vmatpush1.bf16.msra.mxu1 %v7471_v19  ;;  %v2078_v10 = vld [vmem:[%s10207_s9 + $0x128] sm:$0xff] }
  0xcd   : > { %1929 = vmatprep.mubr.f32.mxu0 %v8373_v1  ;;  %7474 = vmatprep.subr.bf16.mxu1 %v7473_v22  ;;  %v7493_v19 = vpack.c.bf16 %v2081_v11, %v2078_v10  ;;  %v2084_v22 = vld [vmem:[%s10207_s9 + $0x158] sm:$0xff]  ;;  %v2082_v11 = vld [vmem:[%s10207_s9 + $0x148] sm:$0xff] }
  0xce   : > { %7552 = vmatpush3.bf16.msra.mxu0 %v7551_v27  ;;  %v7497_v27 = vpack.c.bf16 %v2087_v23, %v2084_v22  ;;  %v2085_v22 = vld [vmem:[%s10207_s9 + $0x160] sm:$0xff]  ;;  %v2088_v23 = vld [vmem:[%s10207_s9 + $0x178] sm:$0xff] }
  0xcf   : > { %7554 = vmatprep.subr.bf16.mxu0 %v7553_v28  ;;  %v2083_v28 = vld [vmem:[%s10207_s9 + $0x150] sm:$0xff] }
  0xd0   : > { %6523 = vmatmul.mubr.msk.f32.gmra.mrb[2].mxu0 %vm435_vm0, %v6521_v18  ;;  %7476 = vmatpush1.bf16.msra.mxu1 %v7475_v31  ;;  %v2130_v18 = vld [vmem:[%s10207_s9 + $0x2c8] sm:$0xff]  ;;  %v2093_v31 = vld [vmem:[%s10207_s9 + $0x1a0] sm:$0xff]  ;;  %v7499_v32 = vpack.c.bf16 %v2086_v29, %v2083_v28  ;;  %vm6412_vm0 = vcmask 128000  }
  0xd1   : > { %7478 = vmatprep.subr.bf16.mxu1 %v7477_v34  ;;  %v7573_v25 = vpack.c.bf16 %v2130_v18, %v2127_v17  ;;  %v7501_v33 = vpack.c.bf16 %v2093_v31, %v2090_v30  ;;  %v2089_v34 = vld [vmem:[%s10207_s9 + $0x180] sm:$0xff]  ;;  %v2136_v17 = vld [vmem:[%s10207_s9 + $0x2f8] sm:$0xff]  ;;  %v2131_v18 = vld [vmem:[%s10207_s9 + $0x2d0] sm:$0xff]  ;;  %v2022_v31 = vpop.permute.xlu1 %2021 }
  0xd2   : > { %7556 = vmatpush3.bf16.msra.mxu0 %v7555_v39  ;;  %v7503_v38 = vpack.c.bf16 %v2092_v35, %v2089_v34  ;;  %v7505_v39 = vpack.c.bf16 %v2099_v37, %v2096_v36  ;;  %v7577_v20 = vpack.c.bf16 %v2136_v17, %v2133_v15  ;;  %v2142_v29 = vld [vmem:[%s10207_s9 + $0x328] sm:$0xff]  ;;  %v2137_v37 = vld [vmem:[%s10207_s9 + $0x300] sm:$0xff]  ;;  %v2163_v17 = vld [vmem:[%s10207_s9 + $0x3d0] sm:$0xf] }
  0xd3   : > { %7558 = vmatprep.subr.bf16.mxu0 %v7557_v40  ;;  %v2095_v40 = vld [vmem:[%s10207_s9 + $0x1b0] sm:$0xff] }
  0xd4   : > { %7480 = vmatpush1.bf16.msra.mxu1 %v7479_v43  ;;  %v2105_v43 = vld [vmem:[%s10207_s9 + $0x200] sm:$0xff]  ;;  %v7507_v44 = vpack.c.bf16 %v2098_v41, %v2095_v40  ;;  %v2147_v41 = vld [vmem:[%s10207_s9 + $0x350] sm:$0xff] }
  0xd5   : > { %7482 = vmatprep.subr.bf16.mxu1 %v7481_v46  ;;  %v7509_v45 = vpack.c.bf16 %v2105_v43, %v2102_v42  ;;  %v2101_v46 = vld [vmem:[%s10207_s9 + $0x1e0] sm:$0xff]  ;;  %v2148_v43 = vld [vmem:[%s10207_s9 + $0x358] sm:$0xff] }
  0xd6   : > { %7560 = vmatpush3.bf16.msra.mxu0 %v7559_v51  ;;  %v7511_v50 = vpack.c.bf16 %v2104_v47, %v2101_v46  ;;  %v7513_v51 = vpack.c.bf16 %v2111_v49, %v2108_v48  ;;  %v2145_v42 = vld [vmem:[%s10207_s9 + $0x340] sm:$0xff] }
  0xd7   : > { %7562 = vmatprep.subr.bf16.mxu0 %v7561_v52  ;;  %v2107_v52 = vld [vmem:[%s10207_s9 + $0x210] sm:$0xff] }
  0xd8   : > { %7484 = vmatpush1.bf16.msra.mxu1 %v7483_v55  ;;  %v2117_v55 = vld [vmem:[%s10207_s9 + $0x260] sm:$0xff]  ;;  %v7515_v56 = vpack.c.bf16 %v2110_v53, %v2107_v52  ;;  %v7585_v52 = vpack.c.bf16 %v2148_v43, %v2145_v42  ;;  %v2143_v53 = vld [vmem:[%s10207_s9 + $0x330] sm:$0xff] }
  0xd9   : > { %7486 = vmatprep.subr.bf16.mxu1 %v7485_v58  ;;  %v7517_v57 = vpack.c.bf16 %v2117_v55, %v2114_v54  ;;  %v2113_v58 = vld [vmem:[%s10207_s9 + $0x240] sm:$0xff]  ;;  %v2146_v54 = vld [vmem:[%s10207_s9 + $0x348] sm:$0xff]  ;;  %v4494_v42 = vld [vmem:[%s10202_s4 + $0x10] sm:$0xff] }
  0xda   : > { %7564 = vmatpush3.bf16.msra.mxu0 %v7563_v63  ;;  %v7519_v62 = vpack.c.bf16 %v2116_v59, %v2113_v58  ;;  %v7521_v63 = vpack.c.bf16 %v2123_v61, %v2120_v60  ;;  %v2151_v59 = vld [vmem:[%s10207_s9 + $0x370] sm:$0xff]  ;;  %v2154_v60 = vld [vmem:[%s10207_s9 + $0x388] sm:$0xff] }
  0xdb   : > { %7566 = vmatprep.subr.bf16.mxu0 %v7565_v0  ;;  %v2119_v0 = vld [vmem:[%s10207_s9 + $0x270] sm:$0xff] }
  0xdc   : > { %7488 = vmatpush1.bf16.msra.mxu1 %v7487_v4  ;;  %v2129_v4 = vld [vmem:[%s10207_s9 + $0x2c0] sm:$0xff]  ;;  %v7523_v5 = vpack.c.bf16 %v2122_v2, %v2119_v0 }
  0xdd   : > { %7490 = vmatprep.subr.bf16.mxu1 %v7489_v7  ;;  %v7525_v6 = vpack.c.bf16 %v2129_v4, %v2126_v3  ;;  %v2125_v7 = vld [vmem:[%s10207_s9 + $0x2a0] sm:$0xff]  ;;  %v2152_v3 = vld [vmem:[%s10207_s9 + $0x378] sm:$0xff] }
  0xde   : > { %7568 = vmatpush3.bf16.msra.mxu0 %v7567_v12  ;;  %v7527_v10 = vpack.c.bf16 %v2128_v8, %v2125_v7  ;;  %v7575_v12 = vpack.c.bf16 %v2082_v11, %v2079_v9  ;;  %v2149_v2 = vld [vmem:[%s10207_s9 + $0x360] sm:$0xff]  ;;  %v2156_v4 = vld [vmem:[%s10207_s9 + $0x398] sm:$0xff] }
  0xdf   : > { %7570 = vmatprep.subr.bf16.mxu0 %v7569_v13  ;;  %v2132_v13 = vld [vmem:[%s10207_s9 + $0x2d8] sm:$0xff]  ;;  %v2157_v7 = vld [vmem:[%s10207_s9 + $0x3a0] sm:$0xff] }
  0xe0   : > { %7492 = vmatpush1.bf16.msra.mxu1 %v7491_v16  ;;  %v7529_v16 = vpack.c.bf16 %v2135_v14, %v2132_v13  ;;  %v2160_v8 = vld [vmem:[%s10207_s9 + $0x3b8] sm:$0xff]  ;;  %v2155_v13 = vld [vmem:[%s10207_s9 + $0x390] sm:$0xff]  ;;  %v2158_v14 = vld [vmem:[%s10207_s9 + $0x3a8] sm:$0xff] }
  0xe1   : > { %7494 = vmatprep.subr.bf16.mxu1 %v7493_v19  ;;  %v2134_v19 = vld [vmem:[%s10207_s9 + $0x2e8] sm:$0xff]  ;;  %v7547_v15 = vpack.c.bf16 %v2158_v14, %v2155_v13  ;;  %v6536_v13 = vld [vmem:[%s10201_s3 + $0x38] sm:$0xff] }
  0xe2   : > { %7572 = vmatpush3.bf16.msra.mxu0 %v7571_v24  ;;  %v7531_v21 = vpack.c.bf16 %v2134_v19, %v2131_v18  ;;  %v7579_v24 = vpack.c.bf16 %v2088_v23, %v2085_v22  ;;  %v2161_v19 = vld [vmem:[%s10207_s9 + $0x3c0] sm:$0xf] }
  0xe3   : > { %7574 = vmatprep.subr.bf16.mxu0 %v7573_v25  ;;  %v2138_v25 = vld [vmem:[%s10207_s9 + $0x308] sm:$0xff] }
  0xe4   : > { %7496 = vmatpush1.bf16.msra.mxu1 %v7495_v26  ;;  %v2141_v26 = vld [vmem:[%s10207_s9 + $0x320] sm:$0xff] }
  0xe5   : > { %7498 = vmatprep.subr.bf16.mxu1 %v7497_v27  ;;  %v2139_v27 = vld [vmem:[%s10207_s9 + $0x310] sm:$0xff]  ;;  %v7533_v28 = vpack.c.bf16 %v2141_v26, %v2138_v25 }
  0xe6   : > { %7576 = vmatpush3.bf16.msra.mxu0 %v7575_v12  ;;  %v7581_v30 = vpack.c.bf16 %v2142_v29, %v2139_v27  ;;  %v7593_v12 = vpack.c.bf16 %v2160_v8, %v2157_v7 }
  0xe7   : > { %7578 = vmatprep.subr.bf16.mxu0 %v7577_v20 }
  0xe8   : > { %7500 = vmatpush1.bf16.msra.mxu1 %v7499_v32 }
  0xe9   : > { %7502 = vmatprep.subr.bf16.mxu1 %v7501_v33 }
  0xea   : > { %7580 = vmatpush3.bf16.msra.mxu0 %v7579_v24 }
  0xeb   : > { %7582 = vmatprep.subr.bf16.mxu0 %v7581_v30 }
  0xec   : > { %7504 = vmatpush1.bf16.msra.mxu1 %v7503_v38  ;;  %v2140_v38 = vld [vmem:[%s10207_s9 + $0x318] sm:$0xff] }
  0xed   : > { %7506 = vmatprep.subr.bf16.mxu1 %v7505_v39  ;;  %v2144_v39 = vld [vmem:[%s10207_s9 + $0x338] sm:$0xff]  ;;  %v7535_v47 = vpack.c.bf16 %v2140_v38, %v2137_v37 }
  0xf0   : > { %7508 = vmatpush1.bf16.msra.mxu1 %v7507_v44  ;;  %v2027_v44 = vpop.permute.xlu0 %2026 }
  0xf1   : > { %7510 = vmatprep.subr.bf16.mxu1 %v7509_v45 }
  0xf4   : > { %7512 = vmatpush1.bf16.msra.mxu1 %v7511_v50 }
  0xf5   : > { %7514 = vmatprep.subr.bf16.mxu1 %v7513_v51  ;;  %v7537_v51 = vpack.c.bf16 %v2147_v41, %v2144_v39  ;;  %v4493_v39 = vld [vmem:[%s10202_s4 + $0x8] sm:$0xff]  ;;  %v4495_v41 = vld [vmem:[%s10202_s4 + $0x18] sm:$0xff] }
  0xf8   : > { %7516 = vmatpush1.bf16.msra.mxu1 %v7515_v56  ;;  %v2150_v56 = vld [vmem:[%s10207_s9 + $0x368] sm:$0xff] }
  0xf9   : > { %7518 = vmatprep.subr.bf16.mxu1 %v7517_v57  ;;  %v2153_v57 = vld [vmem:[%s10207_s9 + $0x380] sm:$0xff] }
  0xfa   : > { %v7541_v0 = vpack.c.bf16 %v2153_v57, %v2150_v56 }
  0xfc   : > { %7520 = vmatpush1.bf16.msra.mxu1 %v7519_v62  ;;  %v7539_v62 = vpack.c.bf16 %v2146_v54, %v2143_v53 }
  0xfd   : > { %7522 = vmatprep.subr.bf16.mxu1 %v7521_v63 }
 0x100   : > { %7524 = vmatpush1.bf16.msra.mxu1 %v7523_v5  ;;  %v7589_v5 = vpack.c.bf16 %v2154_v60, %v2151_v59 }
 0x101   : > { %7526 = vmatprep.subr.bf16.mxu1 %v7525_v6  ;;  %v2159_v6 = vld [vmem:[%s10207_s9 + $0x3b0] sm:$0xff] }
 0x102   : > { %v7545_v11 = vpack.c.bf16 %v2159_v6, %v2156_v4 }
 0x104   : > { %7528 = vmatpush1.bf16.msra.mxu1 %v7527_v10  ;;  %v7543_v10 = vpack.c.bf16 %v2152_v3, %v2149_v2  ;;  %v6534_v3 = vld [vmem:[%s10201_s3 + $0x28] sm:$0xff] }
 0x105   : > { %7530 = vmatprep.subr.bf16.mxu1 %v7529_v16  ;;  %v2162_v16 = vld [vmem:[%s10207_s9 + $0x3c8] sm:$0xf] }
 0x108   : > { %7532 = vmatpush1.bf16.msra.mxu1 %v7531_v21 }
 0x109   : > { %7534 = vmatprep.subr.bf16.mxu1 %v7533_v28 }
 0x19e   : > { %v8933_v32 = vpop.f32.mrb[0].mxu1 }
 0x19f   : > { %v1925_v33 = vpop.f32.mrb[0].mxu0  ;;  %v2002_v34 = vpop.f32.mrb[1].mxu1  ;;  %v2034_v18 = vadd.f32 %v8933_v32, %v2027_v44 }
 0x1a0   : > { %v2029_v35 = vadd.f32 %v2022_v31, %v1925_v33  ;;  %v1927_v36 = vpop.f32.mrb[1].mxu0  ;;  %v2031_v58 = vadd.f32 %v2022_v31, %v2002_v34  ;;  %v9019_v33 = vld [vmem:[%s10201_s3 + $0x20] sm:$0xff] }
 0x1a1   : > { %v2030_v40 = vadd.f32 %v2022_v31, %v1927_v36  ;;  %v2040_v20 = vmax.f32 %v2034_v18, 0.0  ;;  %v2485_v18 = vld [vmem:[%s10201_s3] sm:$0xff] }
 0x1a2   : > { %v2035_v48 = vmax.f32 %v2029_v35, 0.0  ;;  %v2037_v9 = vmax.f32 %v2031_v58, 0.0 }
 0x1a3   : > { %v2036_v45 = vmax.f32 %v2030_v40, 0.0  ;;  %v1931_v46 = vpop.f32.mrb[2].mxu0  ;;  %v4492_v40 = vld [vmem:[%s10202_s4] sm:$0xff] }
 0x1a4   : > { %v2032_v49 = vadd.f32 %v2027_v44, %v1931_v46  ;;  %v1933_v50 = vpop.f32.mrb[3].mxu0 }
 0x1a5   : > { %v2033_v55 = vadd.f32 %v2027_v44, %v1933_v50  ;;  %2245 = vmatprep.mubr.f32.mxu1 %v2036_v45  ;;  %2399 = vmatprep.mubr.f32.mxu0 %v2036_v45 }
 0x1a6   : > { %2246 = vmatmul.mubr.f32.vlgmr.msra.gmra.mrb[2].mxu1 %v2035_v48  ;;  %2400 = vmatmul.mubr.f32.vlgmr.msra.gmra.mrb[4].mxu0 %v2035_v48  ;;  %v2038_v63 = vmax.f32 %v2032_v49, 0.0 }
 0x1a7   : > { %v2039_v61 = vmax.f32 %v2033_v55, 0.0  ;;  %7536 = vmatpush1.bf16.msra.mxu1 %v7535_v47  ;;  %7584 = vmatpush3.bf16.msra.mxu0 %v7581_v30 }
 0x1a8   : > { %7538 = vmatprep.subr.bf16.mxu1 %v7537_v51  ;;  %7586 = vmatprep.subr.bf16.mxu0 %v7585_v52 }
 0x1a9   : > { %2251 = vmatprep.mubr.f32.mxu1 %v2039_v61  ;;  %2404 = vmatprep.mubr.f32.mxu0 %v2039_v61 }
 0x1aa   : > { %2252 = vmatmul.mubr.f32.gmra.mrb[4].mxu1 %v2038_v63  ;;  %2405 = vmatmul.mubr.f32.gmra.mrb[6].mxu0 %v2038_v63 }
 0x1ab   : > { %7540 = vmatpush1.bf16.msra.mxu1 %v7539_v62  ;;  %7588 = vmatpush3.bf16.msra.mxu0 %v7585_v52 }
 0x1ac   : > { %7111 = vmatprep.mubr.msk.f32.mxu0 %vm2164_vm10, %v2037_v9  ;;  %7542 = vmatprep.subr.bf16.mxu1 %v7541_v0 }
 0x1ad   : > { %7590 = vmatprep.subr.bf16.mxu0 %v7589_v5  ;;  %2322 = vmatprep.mubr.f32.mxu1 %v8373_v1 }
 0x1af   : > { %7544 = vmatpush1.bf16.msra.mxu1 %v7543_v10  ;;  %7592 = vmatpush3.bf16.msra.mxu0 %v7589_v5 }
 0x1b0   : > { %7546 = vmatprep.subr.bf16.mxu1 %v7545_v11  ;;  %7594 = vmatprep.subr.bf16.mxu0 %v7593_v12 }
 0x1b3   : > { %7548 = vmatpush1.bf16.msra.mxu1 %v7547_v15  ;;  %7596 = vmatpush3.bf16.msra.mxu0 %v7593_v12 }
 0x1b4   : > { %6526 = vmatprep.subr.msk.mxu1 %vm2171_vm11, %v2162_v16  ;;  %7109 = vmatprep.subr.msk.mxu0 %vm2171_vm11, %v2163_v17 }
 0x1b7   : > { %6527 = vmatpush1.msk.msra.mxu1 %vm2171_vm11, %v2161_v19  ;;  %7110 = vmatpush3.msk.msra.mxu0 %vm2171_vm11, %v2163_v17 }
 0x1b8   : > { %6528 = vmatmul.mubr.msk.f32.vlgmr.msra.gmra.mrb[2].mxu1 %vm2164_vm10, %v2037_v9  ;;  %7112 = vmatmul.mubr.msk.f32.vlgmr.msra.gmra.mrb[8].mxu0 %vm2164_vm10, %v2040_v20  ;;  %v6535_v9 = vld [vmem:[%s10201_s3 + $0x30] sm:$0xff] }
 0x1b9   : > { %2328 = vmatprep.mubr.f32.mxu1 %v8373_v1  ;;  %2599 = vmatprep.mubr.f32.mxu0 %v8373_v1 }
 0x1bc   : > { %6529 = vmatmul.mubr.msk.f32.gmra.mrb[4].mxu1 %vm2164_vm10, %v2040_v20 }
 0x1bd   : > { %7118 = vmatprep.mubr.msk.f32.mxu1 %vm2522_vm12, %v9019_v33 }
 0x279   : > { %v6832_v21 = vpop.f32.mrb[4].mxu0 }
 0x27a   : > { %v6833_v22 = vpop.f32.mrb[5].mxu0 }
 0x27b   : > { %v6834_v23 = vadd.f32 %v6833_v22, %v6832_v21 }
 0x27d   : > { %v6835_v24 = vpop.f32.mrb[6].mxu0 }
 0x27e   : > { %v6836_v25 = vpop.f32.mrb[7].mxu0 }
 0x27f   : > { %v6837_v26 = vadd.f32 %v6836_v25, %v6835_v24  ;;  %v2486_v24 = vld [vmem:[%s10201_s3 + $0x8] sm:$0xff] }
 0x28b   : > { %v2324_v27 = vpop.f32.mrb[2].mxu1  ;;  %v7113_v28 = vpop.f32.mrb[8].mxu0 }
 0x28c   : > { %v2482_v29 = vadd.f32 %v7113_v28, %v6837_v26  ;;  %v2326_v30 = vpop.f32.mrb[3].mxu1  ;;  %v2476_v31 = vpop.f32.mrb[9].mxu0 }
 0x28d   : > { %v2477_v32 = vadd.f32 %v6834_v23, %v2476_v31 }
 0x28f   : > { %v2330_v34 = vpop.f32.mrb[4].mxu1  ;;  %v8140_v35 = vpack.i.bf16 %v2477_v32, %v2326_v30  ;;  %v9107_v30 = vld [vmem:[%s10201_s3 + $0x10] sm:$0xff] }
 0x290   : > { %v2332_v36 = vpop.f32.mrb[5].mxu1  ;;  %v8150_v37 = vpack.i.bf16 %v2330_v34, %v2324_v27  ;;  %v9118_v34 = vld [vmem:[%s10201_s3 + $0x18] sm:$0xff] }
 0x291   : > { %8141 = vrot.lane.b32.xlu1 %v8140_v35, %s8374_s29  ;;  %v8145_v38 = vpack.i.bf16 %v2482_v29, %v2332_v36 }
 0x292   : > { %8151 = vrot.lane.b32.xlu0 %v8150_v37, %s8374_s29 }
 0x295   : > { %8146 = vrot.lane.b32.xlu1 %v8145_v38, %s8374_s29 }
 0x296   : > { %8161 = vrot.lane.b32.xlu0 %v8145_v38, %s8375_s30 }
 0x299   : > { %8156 = vrot.lane.b32.xlu1 %v8140_v35, %s8375_s30 }
 0x29a   : > { %8171 = vrot.lane.b32.xlu0 %v8140_v35, %s8376_s13 }
 0x29d   : > { %8166 = vrot.lane.b32.xlu1 %v8150_v37, %s8375_s30 }
 0x29e   : > { %8181 = vrot.lane.b32.xlu0 %v8150_v37, %s8376_s13 }
 0x2a1   : > { %8176 = vrot.lane.b32.xlu1 %v8145_v38, %s8376_s13 }
 0x2a2   : > { %8191 = vrot.lane.b32.xlu0 %v8145_v38, %s8377_s14 }
 0x2a5   : > { %8186 = vrot.lane.b32.xlu1 %v8140_v35, %s8377_s14 }
 0x2a6   : > { %8201 = vrot.lane.b32.xlu0 %v8140_v35, %s8378_s15 }
 0x2a9   : > { %8196 = vrot.lane.b32.xlu1 %v8150_v37, %s8377_s14  ;;  %s10222_s14 = smov 85  }
 0x2aa   : > { %8211 = vrot.lane.b32.xlu0 %v8150_v37, %s8378_s15 }
 0x2ad   : > { %8206 = vrot.lane.b32.xlu1 %v8145_v38, %s8378_s15 }
 0x2ae   : > { %8221 = vrot.lane.b32.xlu0 %v8145_v38, %s10219_s26 }
 0x2b1   : > { %8216 = vrot.lane.b32.xlu1 %v8140_v35, %s10219_s26 }
 0x2b2   : > { %8231 = vrot.lane.b32.xlu0 %v8140_v35, %s10220_s16 }
 0x2b5   : > { %8226 = vrot.lane.b32.xlu1 %v8150_v37, %s10219_s26 }
 0x2b6   : > { %8241 = vrot.lane.b32.xlu0 %v8150_v37, %s10220_s16 }
 0x2b9   : > { %8236 = vrot.lane.b32.xlu1 %v8145_v38, %s10220_s16 }
 0x2ba   : > { %8251 = vrot.lane.b32.xlu0 %v8145_v38, %s10221_s27 }
 0x2bd   : > { %8246 = vrot.lane.b32.xlu1 %v8140_v35, %s10221_s27 }
 0x2be   : > { %8261 = vrot.lane.b32.xlu0 %v8140_v35, %s10222_s14 }
 0x2c1   : > { %8256 = vrot.lane.b32.xlu1 %v8150_v37, %s10221_s27 }
 0x2c2   : > { %8271 = vrot.lane.b32.xlu0 %v8150_v37, %s10222_s14  ;;  %v9126_v37 = vld [vmem:[%s10201_s3 + $0x40] sm:$0xff] }
 0x2c5   : > { %8266 = vrot.lane.b32.xlu1 %v8145_v38, %s10222_s14 }
 0x2c6   : > { %4503 = vperm.xlu0 %8139, %v4493_v39  }
 0x2c9   : > { %4498 = vperm.xlu1 %8138, %v4492_v40  }
 0x2ca   : > { %4513 = vperm.xlu0 %8139, %v4495_v41  }
 0x2cd   : > { %4508 = vperm.xlu1 %8138, %v4494_v42  }
 0x303   : > { %v8142_v43 = vpop.permute.xlu1 %8141 }
 0x304   : > { %v8152_v44 = vpop.permute.xlu0 %8151  ;;  %v8144_v45 = vunpack.i.h.bf16 %v8142_v43  ;;  %v8143_v46 = vunpack.i.l.bf16 %v8142_v43 }
 0x305   : > { %v8153_v47 = vunpack.i.l.bf16 %v8152_v44  ;;  %v8154_v49 = vunpack.i.h.bf16 %v8152_v44  ;;  %v9143_v44 = vld [vmem:[%s10201_s3 + $0x48] sm:$0xff] }
 0x306   : > { %v2513_v55 = vsel %vm429_vm1, %v8143_v46, %v8144_v45 }
 0x307   : > { %v8147_v48 = vpop.permute.xlu1 %8146  ;;  %v2512_v53 = vsel %vm429_vm1, %v8153_v47, %v8143_v46 }
 0x308   : > { %v8149_v50 = vunpack.i.h.bf16 %v8147_v48  ;;  %v8148_v51 = vunpack.i.l.bf16 %v8147_v48  ;;  %v8162_v52 = vpop.permute.xlu0 %8161  ;;  %v9155_v48 = vld [vmem:[%s10201_s3 + $0x50] sm:$0xff] }
 0x309   : > { %v8164_v54 = vunpack.i.h.bf16 %v8162_v52  ;;  %v8163_v58 = vunpack.i.l.bf16 %v8162_v52 }
 0x30a   : > { %v7601_v56 = vpack.c.bf16 %v8149_v50, %v8144_v45  ;;  %v2514_v57 = vsel %vm429_vm1, %v8154_v49, %v8148_v51  ;;  %v2515_v59 = vsel %vm429_vm1, %v8148_v51, %v8149_v50 }
 0x30b   : > { %v7599_v60 = vpack.c.bf16 %v2514_v57, %v2512_v53  ;;  %v8157_v61 = vpop.permute.xlu1 %8156  ;;  %v7597_v62 = vpack.c.bf16 %v2515_v59, %v2513_v55  ;;  %v2724_v6 = vsel %vm600_vm2, %v8163_v58, %v8164_v54  ;;  %v9168_v55 = vld [vmem:[%s10201_s3 + $0x58] sm:$0xff]  ;;  %v9175_v57 = vld [vmem:[%s10201_s3 + $0x60] sm:$0xff] }
 0x30c   : > { %v8159_v63 = vunpack.i.h.bf16 %v8157_v61  ;;  %v8158_v0 = vunpack.i.l.bf16 %v8157_v61  ;;  %v9066_v2 = vpop.permute.xlu0 %8171  ;;  %7602 = vmatprep.subr.bf16.mxu1 %v7601_v56  ;;  %v9190_v61 = vld [vmem:[%s10201_s3 + $0x68] sm:$0xff] }
 0x30d   : > { %7598 = vmatprep.subr.bf16.mxu0 %v7597_v62  ;;  %7604 = vmatpush3.bf16.msra.mxu1 %v7601_v56  ;;  %v8174_v14 = vunpack.i.h.bf16 %v9066_v2  ;;  %v8173_v15 = vunpack.i.l.bf16 %v9066_v2  ;;  %v9204_v2 = vld [vmem:[%s10201_s3 + $0x70] sm:$0xff] }
 0x30e   : > { %v7609_v4 = vpack.c.bf16 %v8164_v54, %v8159_v63  ;;  %7600 = vmatpush1.bf16.msra.mxu0 %v7599_v60  ;;  %v2722_v5 = vsel %vm600_vm2, %v8158_v0, %v8159_v63 }
 0x30f   : > { %v8167_v7 = vpop.permute.xlu1 %8166  ;;  %v7605_v8 = vpack.c.bf16 %v2724_v6, %v2722_v5  ;;  %v2935_v26 = vsel %vm773_vm3, %v8173_v15, %v8174_v14  ;;  %v9215_v5 = vld [vmem:[%s10201_s3 + $0x78] sm:$0xff] }
 0x310   : > { %v8169_v10 = vunpack.i.h.bf16 %v8167_v7  ;;  %v8168_v11 = vunpack.i.l.bf16 %v8167_v7  ;;  %v8182_v12 = vpop.permute.xlu0 %8181  ;;  %7119 = vmatmul.mubr.msk.f32.vlgmr.msra.gmra.mrb[6].mxu1 %vm2522_vm12, %v6534_v3  ;;  %7610 = vmatprep.subr.bf16.mxu1 %v7609_v4  ;;  %v9223_v7 = vld [vmem:[%s10201_s3 + $0x80] sm:$0xff] }
 0x311   : > { %6537 = vmatmul.mubr.msk.f32.vlgmr.msra.gmra.mrb[10].mxu0 %vm2522_vm12, %v9019_v33  ;;  %7606 = vmatprep.subr.bf16.mxu0 %v7605_v8  ;;  %v8184_v38 = vunpack.i.h.bf16 %v8182_v12  ;;  %v8183_v39 = vunpack.i.l.bf16 %v8182_v12 }
 0x312   : > { %v2723_v16 = vsel %vm600_vm2, %v8169_v10, %v8163_v58  ;;  %v2721_v17 = vsel %vm600_vm2, %v8168_v11, %v8158_v0  ;;  %7612 = vmatpush3.bf16.msra.mxu1 %v7609_v4  ;;  %7121 = vmatprep.mubr.msk.f32.mxu1 %vm2522_vm12, %v6535_v9 }
 0x313   : > { %v7607_v19 = vpack.c.bf16 %v2723_v16, %v2721_v17  ;;  %v8177_v20 = vpop.permute.xlu1 %8176  ;;  %2605 = vmatprep.mubr.f32.mxu0 %v8373_v1  ;;  %v2934_v46 = vsel %vm773_vm3, %v8183_v39, %v8173_v15  ;;  %v9246_v15 = vld [vmem:[%s10201_s3 + $0x88] sm:$0xff] }
 0x314   : > { %v8179_v21 = vunpack.i.h.bf16 %v8177_v20  ;;  %v8178_v22 = vunpack.i.l.bf16 %v8177_v20  ;;  %v9091_v23 = vpop.permute.xlu0 %8191  ;;  %7122 = vmatmul.mubr.msk.f32.gmra.mrb[8].mxu1 %vm2522_vm12, %v6536_v13 }
 0x315   : > { %6538 = vmatmul.mubr.msk.f32.gmra.mrb[12].mxu0 %vm2522_vm12, %v6534_v3  ;;  %7128 = vmatprep.mubr.msk.f32.mxu1 %vm2522_vm12, %v2485_v18  ;;  %v8194_v31 = vunpack.i.h.bf16 %v9091_v23  ;;  %v8193_v41 = vunpack.i.l.bf16 %v9091_v23  ;;  %v9271_v23 = vld [vmem:[%s10201_s3 + $0x98] sm:$0xff] }
 0x316   : > { %v7617_v25 = vpack.c.bf16 %v8179_v21, %v8174_v14  ;;  %7608 = vmatpush1.bf16.msra.mxu0 %v7607_v19  ;;  %2611 = vmatprep.mubr.f32.mxu0 %v8373_v1  ;;  %v2937_v27 = vsel %vm773_vm3, %v8178_v22, %v8179_v21  ;;  %v2936_v43 = vsel %vm773_vm3, %v8184_v38, %v8178_v22  ;;  %v9264_v21 = vld [vmem:[%s10201_s3 + $0x90] sm:$0xff] }
 0x317   : > { %v9102_v28 = vpop.permute.xlu1 %8186  ;;  %v7613_v29 = vpack.c.bf16 %v2937_v27, %v2935_v26  ;;  %v7615_v49 = vpack.c.bf16 %v2936_v43, %v2934_v46  ;;  %v3162_v52 = vsel %vm952_vm4, %v8193_v41, %v8194_v31 }
 0x318   : > { %v8189_v32 = vunpack.i.h.bf16 %v9102_v28  ;;  %v9111_v33 = vpop.permute.xlu0 %8201  ;;  %7129 = vmatmul.mubr.msk.f32.vlgmr.msra.gmra.mrb[6].mxu1 %vm2522_vm12, %v2486_v24  ;;  %7618 = vmatprep.subr.bf16.mxu1 %v7617_v25  ;;  %v8188_v36 = vunpack.i.l.bf16 %v9102_v28  ;;  %v9295_v28 = vld [vmem:[%s10201_s3 + $0xa8] sm:$0xff] }
 0x319   : > { %6539 = vmatmul.mubr.msk.f32.gmra.mrb[14].mxu0 %vm2522_vm12, %v6535_v9  ;;  %7614 = vmatprep.subr.bf16.mxu0 %v7613_v29  ;;  %v8204_v50 = vunpack.i.h.bf16 %v9111_v33  ;;  %v8203_v9 = vunpack.i.l.bf16 %v9111_v33 }
 0x31a   : > { %v7625_v35 = vpack.c.bf16 %v8194_v31, %v8189_v32  ;;  %7620 = vmatpush3.bf16.msra.mxu1 %v7617_v25  ;;  %7131 = vmatprep.mubr.msk.f32.mxu1 %vm2522_vm12, %v9107_v30  ;;  %v3160_v45 = vsel %vm952_vm4, %v8188_v36, %v8189_v32 }
 0x31b   : > { %v9128_v40 = vpop.permute.xlu1 %8196  ;;  %2617 = vmatprep.mubr.f32.mxu0 %v8373_v1  ;;  %v7621_v54 = vpack.c.bf16 %v3162_v52, %v3160_v45  ;;  %v3385_v20 = vsel %vm1131_vm5, %v8203_v9, %v8204_v50  ;;  %v9378_v52 = vld [vmem:[%s10201_s3 + $0xe0] sm:$0xff] }
 0x31c   : > { %v9132_v42 = vpop.permute.xlu0 %8211  ;;  %7132 = vmatmul.mubr.msk.f32.gmra.mrb[8].mxu1 %vm2522_vm12, %v9118_v34  ;;  %7626 = vmatprep.subr.bf16.mxu1 %v7625_v35  ;;  %v8199_v3 = vunpack.i.h.bf16 %v9128_v40  ;;  %v8198_v4 = vunpack.i.l.bf16 %v9128_v40 }
 0x31d   : > { %6540 = vmatmul.mubr.msk.f32.gmra.mrb[16].mxu0 %vm2522_vm12, %v6536_v13  ;;  %7138 = vmatprep.mubr.msk.f32.mxu1 %vm2522_vm12, %v9126_v37  ;;  %v8213_v38 = vunpack.i.l.bf16 %v9132_v42 }
 0x31e   : > { %2807 = vmatprep.mubr.f32.mxu0 %v8373_v1  ;;  %v3161_v12 = vsel %vm952_vm4, %v8199_v3, %v8193_v41  ;;  %v3159_v13 = vsel %vm952_vm4, %v8198_v4, %v8188_v36  ;;  %v9325_v36 = vld [vmem:[%s10201_s3 + $0xc0] sm:$0xff]  ;;  %v9441_v3 = vld [vmem:[%s10201_s3 + $0x110] sm:$0xff] }
 0x31f   : > { %v9150_v47 = vpop.permute.xlu1 %8206  ;;  %v7623_v19 = vpack.c.bf16 %v3161_v12, %v3159_v13  ;;  %v3384_v46 = vsel %vm1131_vm5, %v8213_v38, %v8203_v9  ;;  %v4542_v38 = vld [vmem:[%s10208_s10 + $0x10] sm:$0xff] }
 0x320   : > { %v8209_v51 = vunpack.i.h.bf16 %v9150_v47  ;;  %7139 = vmatmul.mubr.msk.f32.vlgmr.msra.gmra.mrb[6].mxu1 %vm2522_vm12, %v9143_v44  ;;  %v9162_v53 = vpop.permute.xlu0 %8221  ;;  %v8208_v6 = vunpack.i.l.bf16 %v9150_v47 }
 0x321   : > { %7628 = vmatpush3.bf16.msra.mxu1 %v7625_v35  ;;  %6545 = vmatmul.mubr.msk.f32.vlgmr.msra.gmra.mrb[10].mxu0 %vm2522_vm12, %v2485_v18  ;;  %v8224_v59 = vunpack.i.h.bf16 %v9162_v53  ;;  %v8223_v40 = vunpack.i.l.bf16 %v9162_v53  ;;  %v9392_v53 = vld [vmem:[%s10201_s3 + $0xe8] sm:$0xff] }
 0x322   : > { %v7633_v56 = vpack.c.bf16 %v8209_v51, %v8204_v50  ;;  %7616 = vmatpush1.bf16.msra.mxu0 %v7615_v49  ;;  %7141 = vmatprep.mubr.msk.f32.mxu1 %vm2522_vm12, %v9155_v48  ;;  %v3387_v17 = vsel %vm1131_vm5, %v8208_v6, %v8209_v51  ;;  %v9366_v50 = vld [vmem:[%s10201_s3 + $0xd0] sm:$0xff]  ;;  %v9373_v51 = vld [vmem:[%s10201_s3 + $0xd8] sm:$0xff] }
 0x323   : > { %7622 = vmatprep.subr.bf16.mxu0 %v7621_v54  ;;  %v9177_v58 = vpop.permute.xlu1 %8216  ;;  %2813 = vmatprep.mubr.f32.mxu0 %v8373_v1  ;;  %v7629_v22 = vpack.c.bf16 %v3387_v17, %v3385_v20  ;;  %v3612_v49 = vsel %vm1310_vm6, %v8223_v40, %v8224_v59  ;;  %v9398_v54 = vld [vmem:[%s10201_s3 + $0xf0] sm:$0xff] }
 0x324   : > { %v8219_v60 = vunpack.i.h.bf16 %v9177_v58  ;;  %7142 = vmatmul.mubr.msk.f32.gmra.mrb[8].mxu1 %vm2522_vm12, %v9168_v55  ;;  %7634 = vmatprep.subr.bf16.mxu1 %v7633_v56  ;;  %v9197_v63 = vpop.permute.xlu0 %8231  ;;  %v8218_v35 = vunpack.i.l.bf16 %v9177_v58 }
 0x325   : > { %6546 = vmatmul.mubr.msk.f32.gmra.mrb[12].mxu0 %vm2522_vm12, %v2486_v24  ;;  %7148 = vmatprep.mubr.msk.f32.mxu1 %vm2522_vm12, %v9175_v57  ;;  %v8234_v10 = vunpack.i.h.bf16 %v9197_v63  ;;  %v9276_v24 = vld [vmem:[%s10201_s3 + $0xa0] sm:$0xff] }
 0x326   : > { %v7641_v62 = vpack.c.bf16 %v8224_v59, %v8219_v60  ;;  %2819 = vmatprep.mubr.f32.mxu0 %v8373_v1  ;;  %v3610_v45 = vsel %vm1310_vm6, %v8218_v35, %v8219_v60  ;;  %v9418_v59 = vld [vmem:[%s10201_s3 + $0x100] sm:$0xff]  ;;  %v8233_v60 = vunpack.i.l.bf16 %v9197_v63 }
 0x327   : > { %v9199_v0 = vpop.permute.xlu1 %8226  ;;  %v7637_v33 = vpack.c.bf16 %v3612_v49, %v3610_v45  ;;  %v4549_v45 = vld [vmem:[%s10208_s10 + $0x48] sm:$0xff]  ;;  %v4548_v49 = vld [vmem:[%s10208_s10 + $0x40] sm:$0xff] }
 0x328   : > { %7149 = vmatmul.mubr.msk.f32.vlgmr.msra.gmra.mrb[6].mxu1 %vm2522_vm12, %v9190_v61  ;;  %v9237_v14 = vpop.permute.xlu0 %8241 }
 0x329   : > { %7636 = vmatpush3.bf16.msra.mxu1 %v7633_v56  ;;  %6547 = vmatmul.mubr.msk.f32.gmra.mrb[14].mxu0 %vm2522_vm12, %v9107_v30  ;;  %v9302_v30 = vld [vmem:[%s10201_s3 + $0xb0] sm:$0xff]  ;;  %v8228_v56 = vunpack.i.l.bf16 %v9199_v0  ;;  %v8243_v9 = vunpack.i.l.bf16 %v9237_v14 }
 0x32a   : > { %7642 = vmatprep.subr.bf16.mxu1 %v7641_v62  ;;  %7151 = vmatprep.mubr.msk.f32.mxu1 %vm2522_vm12, %v9204_v2 }
 0x32b   : > { %v9225_v8 = vpop.permute.xlu1 %8236  ;;  %2825 = vmatprep.mubr.f32.mxu0 %v8373_v1  ;;  %v3834_v13 = vsel %vm1489_vm7, %v8243_v9, %v8233_v60  ;;  %v4564_v9 = vld [vmem:[%s10208_s10 + $0xc0] sm:$0xff] }
 0x32c   : > { %v8239_v11 = vunpack.i.h.bf16 %v9225_v8  ;;  %7152 = vmatmul.mubr.msk.f32.gmra.mrb[8].mxu1 %vm2522_vm12, %v9215_v5  ;;  %v9278_v25 = vpop.permute.xlu0 %8251  ;;  %v8238_v58 = vunpack.i.l.bf16 %v9225_v8  ;;  %v9455_v8 = vld [vmem:[%s10201_s3 + $0x118] sm:$0xff] }
 0x32d   : > { %6548 = vmatmul.mubr.msk.f32.gmra.mrb[16].mxu0 %vm2522_vm12, %v9118_v34  ;;  %7158 = vmatprep.mubr.msk.f32.mxu1 %vm2522_vm12, %v9223_v7  ;;  %v8254_v29 = vunpack.i.h.bf16 %v9278_v25  ;;  %v9317_v34 = vld [vmem:[%s10201_s3 + $0xb8] sm:$0xff] }
 0x32e   : > { %v7649_v16 = vpack.c.bf16 %v8239_v11, %v8234_v10  ;;  %3020 = vmatprep.mubr.f32.mxu0 %v8373_v1 }
 0x32f   : > { %v9254_v18 = vpop.permute.xlu1 %8246 }
 0x330   : > { %7159 = vmatmul.mubr.msk.f32.vlgmr.msra.gmra.mrb[6].mxu1 %vm2522_vm12, %v9246_v15  ;;  %v8249_v27 = vunpack.i.h.bf16 %v9254_v18  ;;  %v9329_v39 = vpop.permute.xlu0 %8261  ;;  %v8248_v63 = vunpack.i.l.bf16 %v9254_v18 }
 0x331   : > { %7644 = vmatpush3.bf16.msra.mxu1 %v7641_v62  ;;  %6557 = vmatmul.mubr.msk.f32.vlgmr.msra.gmra.mrb[10].mxu0 %vm2522_vm12, %v9126_v37  ;;  %v8214_v37 = vunpack.i.h.bf16 %v9132_v42  ;;  %v9344_v42 = vld [vmem:[%s10201_s3 + $0xc8] sm:$0xff]  ;;  %v3609_v62 = vsel %vm1310_vm6, %v8228_v56, %v8218_v35  ;;  %v8263_v20 = vunpack.i.l.bf16 %v9329_v39  ;;  %v4543_v35 = vld [vmem:[%s10208_s10 + $0x18] sm:$0xff] }
 0x332   : > { %7624 = vmatpush1.bf16.msra.mxu0 %v7623_v19  ;;  %7650 = vmatprep.subr.bf16.mxu1 %v7649_v16  ;;  %v7657_v31 = vpack.c.bf16 %v8254_v29, %v8249_v27  ;;  %v4060_v12 = vsel %vm1668_vm8, %v8248_v63, %v8249_v27  ;;  %v4557_v56 = vld [vmem:[%s10208_s10 + $0x88] sm:$0xff] }
 0x333   : > { %7630 = vmatprep.subr.bf16.mxu0 %v7629_v22  ;;  %v9280_v26 = vpop.permute.xlu1 %8256  ;;  %7161 = vmatprep.mubr.msk.f32.mxu1 %vm2522_vm12, %v9264_v21  ;;  %v3386_v43 = vsel %vm1131_vm5, %v8214_v37, %v8208_v6 }
 0x334   : > { %3026 = vmatprep.mubr.f32.mxu0 %v8373_v1  ;;  %7162 = vmatmul.mubr.msk.f32.gmra.mrb[8].mxu1 %vm2522_vm12, %v9271_v23  ;;  %v7631_v47 = vpack.c.bf16 %v3386_v43, %v3384_v46  ;;  %v8259_v17 = vunpack.i.h.bf16 %v9280_v26  ;;  %v8258_v18 = vunpack.i.l.bf16 %v9280_v26  ;;  %v8272_v27 = vpop.permute.xlu0 %8271  ;;  %v4551_v46 = vld [vmem:[%s10208_s10 + $0x58] sm:$0xff] }
 0x335   : > { %6558 = vmatmul.mubr.msk.f32.gmra.mrb[12].mxu0 %vm2522_vm12, %v9143_v44  ;;  %7168 = vmatprep.mubr.msk.f32.mxu1 %vm2522_vm12, %v9276_v24  ;;  %v8264_v44 = vunpack.i.h.bf16 %v9329_v39  ;;  %v4545_v39 = vld [vmem:[%s10208_s10 + $0x28] sm:$0xff] }
 0x336   : > { %3032 = vmatprep.mubr.f32.mxu0 %v8373_v1  ;;  %v4059_v22 = vsel %vm1668_vm8, %v8258_v18, %v8248_v63  ;;  %v4575_v18 = vld [vmem:[%s10208_s10 + $0x118] sm:$0xff] }
 0x337   : > { %v9310_v32 = vpop.permute.xlu1 %8266 }
 0x338   : > { %7169 = vmatmul.mubr.msk.f32.vlgmr.msra.gmra.mrb[6].mxu1 %vm2522_vm12, %v9295_v28  ;;  %v8269_v41 = vunpack.i.h.bf16 %v9310_v32  ;;  %v8268_v19 = vunpack.i.l.bf16 %v9310_v32 }
 0x339   : > { %7652 = vmatpush3.bf16.msra.mxu1 %v7649_v16  ;;  %6559 = vmatmul.mubr.msk.f32.gmra.mrb[14].mxu0 %vm2522_vm12, %v9155_v48 }
 0x33a   : > { %7658 = vmatprep.subr.bf16.mxu1 %v7657_v31  ;;  %7171 = vmatprep.mubr.msk.f32.mxu1 %vm2522_vm12, %v9302_v30  ;;  %v7665_v48 = vpack.c.bf16 %v8269_v41, %v8264_v44 }
 0x33b   : > { %3038 = vmatprep.mubr.f32.mxu0 %v8373_v1 }
 0x33c   : > { %7172 = vmatmul.mubr.msk.f32.gmra.mrb[8].mxu1 %vm2522_vm12, %v9317_v34 }
 0x33d   : > { %6560 = vmatmul.mubr.msk.f32.gmra.mrb[16].mxu0 %vm2522_vm12, %v9168_v55  ;;  %7178 = vmatprep.mubr.msk.f32.mxu1 %vm2522_vm12, %v9325_v36  ;;  %v8229_v55 = vunpack.i.h.bf16 %v9199_v0  ;;  %v9432_v0 = vld [vmem:[%s10201_s3 + $0x108] sm:$0xff] }
 0x33e   : > { %3245 = vmatprep.mubr.f32.mxu0 %v8373_v1 }
 0x340   : > { %7179 = vmatmul.mubr.msk.f32.vlgmr.msra.gmra.mrb[6].mxu1 %vm2522_vm12, %v9344_v42 }
 0x341   : > { %7660 = vmatpush3.bf16.msra.mxu1 %v7657_v31  ;;  %6569 = vmatmul.mubr.msk.f32.vlgmr.msra.gmra.mrb[10].mxu0 %vm2522_vm12, %v9175_v57  ;;  %v9409_v57 = vld [vmem:[%s10201_s3 + $0xf8] sm:$0xff] }
 0x342   : > { %7632 = vmatpush1.bf16.msra.mxu0 %v7631_v47  ;;  %7666 = vmatprep.subr.bf16.mxu1 %v7665_v48 }
 0x343   : > { %7638 = vmatprep.subr.bf16.mxu0 %v7637_v33  ;;  %7181 = vmatprep.mubr.msk.f32.mxu1 %vm2522_vm12, %v9366_v50  ;;  %v4553_v33 = vld [vmem:[%s10208_s10 + $0x68] sm:$0xff] }
 0x344   : > { %3251 = vmatprep.mubr.f32.mxu0 %v8373_v1  ;;  %7182 = vmatmul.mubr.msk.f32.gmra.mrb[8].mxu1 %vm2522_vm12, %v9373_v51 }
 0x345   : > { %6570 = vmatmul.mubr.msk.f32.gmra.mrb[12].mxu0 %vm2522_vm12, %v9190_v61  ;;  %7188 = vmatprep.mubr.msk.f32.mxu1 %vm2522_vm12, %v9378_v52  ;;  %v3611_v61 = vsel %vm1310_vm6, %v8229_v55, %v8223_v40  ;;  %v4547_v40 = vld [vmem:[%s10208_s10 + $0x38] sm:$0xff]  ;;  %v4554_v55 = vld [vmem:[%s10208_s10 + $0x70] sm:$0xff] }
 0x346   : > { %3257 = vmatprep.mubr.f32.mxu0 %v8373_v1  ;;  %v7639_v4 = vpack.c.bf16 %v3611_v61, %v3609_v62  ;;  %v7673_v43 = vpack.c.bf16 %v4547_v40, %v4545_v39  ;;  %v4558_v61 = vld [vmem:[%s10208_s10 + $0x90] sm:$0xff]  ;;  %v4561_v62 = vld [vmem:[%s10208_s10 + $0xa8] sm:$0xff]  ;;  %v4584_v40 = vld [vmem:[%s10208_s10 + $0x160] sm:$0xff] }
 0x348   : > { %7189 = vmatmul.mubr.msk.f32.vlgmr.msra.gmra.mrb[6].mxu1 %vm2522_vm12, %v9392_v53 }
 0x349   : > { %7668 = vmatpush3.bf16.msra.mxu1 %v7665_v48  ;;  %6571 = vmatmul.mubr.msk.f32.gmra.mrb[14].mxu0 %vm2522_vm12, %v9204_v2  ;;  %v3837_v2 = vsel %vm1489_vm7, %v8238_v58, %v8239_v11  ;;  %v7677_v48 = vpack.c.bf16 %v4551_v46, %v4549_v45  ;;  %v4588_v46 = vld [vmem:[%s10208_s10 + $0x180] sm:$0xff] }
 0x34a   : > { %7191 = vmatprep.mubr.msk.f32.mxu1 %vm2522_vm12, %v9398_v54  ;;  %3263 = vmatprep.mubr.f32.mxu0 %v8373_v1 }
 0x34c   : > { %7192 = vmatmul.mubr.msk.f32.gmra.mrb[8].mxu1 %vm2522_vm12, %v9409_v57 }
 0x34d   : > { %6572 = vmatmul.mubr.msk.f32.gmra.mrb[16].mxu0 %vm2522_vm12, %v9215_v5  ;;  %7198 = vmatprep.mubr.msk.f32.mxu1 %vm2522_vm12, %v9418_v59  ;;  %v3835_v5 = vsel %vm1489_vm7, %v8233_v60, %v8234_v10  ;;  %v8253_v10 = vunpack.i.l.bf16 %v9278_v25  ;;  %v4285_v25 = vsel %vm1847_vm9, %v8263_v20, %v8264_v44  ;;  %v4546_v44 = vld [vmem:[%s10208_s10 + $0x30] sm:$0xff]  ;;  %v4556_v60 = vld [vmem:[%s10208_s10 + $0x80] sm:$0xff] }
 0x34e   : > { %3470 = vmatprep.mubr.f32.mxu0 %v8373_v1  ;;  %v7645_v6 = vpack.c.bf16 %v3837_v2, %v3835_v5  ;;  %v7687_v2 = vpack.c.bf16 %v4558_v61, %v4556_v60  ;;  %v4562_v5 = vld [vmem:[%s10208_s10 + $0xb0] sm:$0xff]  ;;  %v4601_v60 = vld [vmem:[%s10208_s10 + $0x1e8] sm:$0xff]  ;;  %v4603_v61 = vld [vmem:[%s10208_s10 + $0x1f8] sm:$0xff] }
 0x350   : > { %7199 = vmatmul.mubr.msk.f32.vlgmr.msra.gmra.mrb[6].mxu1 %vm2522_vm12, %v9432_v0 }
 0x351   : > { %6581 = vmatmul.mubr.msk.f32.vlgmr.msra.gmra.mrb[10].mxu0 %vm2522_vm12, %v9223_v7  ;;  %7201 = vmatprep.mubr.msk.f32.mxu1 %vm2522_vm12, %v9441_v3  ;;  %v8244_v7 = vunpack.i.h.bf16 %v9237_v14  ;;  %v4062_v14 = vsel %vm1668_vm8, %v8253_v10, %v8254_v29  ;;  %v8273_v29 = vunpack.i.l.bf16 %v8272_v27 }
 0x352   : > { %7640 = vmatpush1.bf16.msra.mxu0 %v7639_v4  ;;  %3476 = vmatprep.mubr.f32.mxu0 %v8373_v1  ;;  %v7653_v16 = vpack.c.bf16 %v4062_v14, %v4060_v12  ;;  %v4560_v4 = vld [vmem:[%s10208_s10 + $0xa0] sm:$0xff]  ;;  %v4571_v12 = vld [vmem:[%s10208_s10 + $0xf8] sm:$0xff] }
 0x353   : > { %7646 = vmatprep.subr.bf16.mxu0 %v7645_v6  ;;  %v3836_v11 = vsel %vm1489_vm7, %v8244_v7, %v8238_v58  ;;  %v4284_v31 = vsel %vm1847_vm9, %v8273_v29, %v8263_v20  ;;  %v4565_v6 = vld [vmem:[%s10208_s10 + $0xc8] sm:$0xff]  ;;  %v7691_v63 = vpack.c.bf16 %v4562_v5, %v4560_v4  ;;  %v4568_v14 = vld [vmem:[%s10208_s10 + $0xe0] sm:$0xff]  ;;  %v4607_v5 = vld [vmem:[%s10208_s10 + $0x218] sm:$0xff] }
 0x354   : > { %7202 = vmatmul.mubr.msk.f32.gmra.mrb[8].mxu1 %vm2522_vm12, %v9455_v8  ;;  %v4581_v29 = vld [vmem:[%s10208_s10 + $0x148] sm:$0xff] }
 0x355   : > { %6582 = vmatmul.mubr.msk.f32.gmra.mrb[12].mxu0 %vm2522_vm12, %v9246_v15  ;;  %v7647_v15 = vpack.c.bf16 %v3836_v11, %v3834_v13  ;;  %v4569_v11 = vld [vmem:[%s10208_s10 + $0xe8] sm:$0xff] }
 0x356   : > { %3482 = vmatprep.mubr.f32.mxu0 %v8373_v1  ;;  %v4605_v4 = vld [vmem:[%s10208_s10 + $0x208] sm:$0xff] }
 0x359   : > { %6583 = vmatmul.mubr.msk.f32.gmra.mrb[14].mxu0 %vm2522_vm12, %v9264_v21  ;;  %v4061_v21 = vsel %vm1668_vm8, %v8259_v17, %v8253_v10  ;;  %v4566_v10 = vld [vmem:[%s10208_s10 + $0xd0] sm:$0xff]  ;;  %v4573_v17 = vld [vmem:[%s10208_s10 + $0x108] sm:$0xff] }
 0x35a   : > { %3488 = vmatprep.mubr.f32.mxu0 %v8373_v1  ;;  %v7695_v13 = vpack.c.bf16 %v4566_v10, %v4564_v9  ;;  %v7701_v20 = vpack.c.bf16 %v4575_v18, %v4573_v17  ;;  %v9748_v10 = vpop.permute.xlu1 %4498  ;;  %v4609_v17 = vld [vmem:[%s10208_s10 + $0x228] sm:$0xff]  ;;  %v4611_v18 = vld [vmem:[%s10208_s10 + $0x238] sm:$0xff] }
 0x35d   : > { %6584 = vmatmul.mubr.msk.f32.gmra.mrb[16].mxu0 %vm2522_vm12, %v9271_v23  ;;  %v4287_v23 = vsel %vm1847_vm9, %v8268_v19, %v8269_v41 }
 0x35e   : > { %3695 = vmatprep.mubr.f32.mxu0 %v8373_v1  ;;  %v7661_v26 = vpack.c.bf16 %v4287_v23, %v4285_v25  ;;  %v4577_v23 = vld [vmem:[%s10208_s10 + $0x128] sm:$0xff] }
 0x361   : > { %6593 = vmatmul.mubr.msk.f32.vlgmr.msra.gmra.mrb[10].mxu0 %vm2522_vm12, %v9276_v24  ;;  %v7655_v24 = vpack.c.bf16 %v4061_v21, %v4059_v22  ;;  %v4572_v21 = vld [vmem:[%s10208_s10 + $0x100] sm:$0xff]  ;;  %v4574_v22 = vld [vmem:[%s10208_s10 + $0x110] sm:$0xff] }
 0x362   : > { %7648 = vmatpush1.bf16.msra.mxu0 %v7647_v15  ;;  %3701 = vmatprep.mubr.f32.mxu0 %v8373_v1  ;;  %v7697_v15 = vpack.c.bf16 %v4571_v12, %v4569_v11  ;;  %v7703_v25 = vpack.c.bf16 %v4574_v22, %v4572_v21 }
 0x363   : > { %7654 = vmatprep.subr.bf16.mxu0 %v7653_v16  ;;  %v4570_v16 = vld [vmem:[%s10208_s10 + $0xf0] sm:$0xff] }
 0x365   : > { %6594 = vmatmul.mubr.msk.f32.gmra.mrb[12].mxu0 %vm2522_vm12, %v9295_v28  ;;  %v8274_v28 = vunpack.i.h.bf16 %v8272_v27  ;;  %v4576_v27 = vld [vmem:[%s10208_s10 + $0x120] sm:$0xff] }
 0x366   : > { %3707 = vmatprep.mubr.f32.mxu0 %v8373_v1 }
 0x369   : > { %6595 = vmatmul.mubr.msk.f32.gmra.mrb[14].mxu0 %vm2522_vm12, %v9302_v30  ;;  %v4286_v30 = vsel %vm1847_vm9, %v8274_v28, %v8268_v19  ;;  %v7699_v19 = vpack.c.bf16 %v4570_v16, %v4568_v14  ;;  %v4578_v28 = vld [vmem:[%s10208_s10 + $0x130] sm:$0xff] }
 0x36a   : > { %3713 = vmatprep.mubr.f32.mxu0 %v8373_v1  ;;  %v7663_v32 = vpack.c.bf16 %v4286_v30, %v4284_v31  ;;  %v4583_v30 = vld [vmem:[%s10208_s10 + $0x158] sm:$0xff]  ;;  %v7707_v31 = vpack.c.bf16 %v4578_v28, %v4576_v27  ;;  %v4606_v14 = vld [vmem:[%s10208_s10 + $0x210] sm:$0xff]  ;;  %v4608_v27 = vld [vmem:[%s10208_s10 + $0x220] sm:$0xff] }
 0x36b   : > { %v4610_v28 = vld [vmem:[%s10208_s10 + $0x230] sm:$0xff] }
 0x36d   : > { %6596 = vmatmul.mubr.msk.f32.gmra.mrb[16].mxu0 %vm2522_vm12, %v9317_v34  ;;  %v4541_v34 = vld [vmem:[%s10208_s10 + $0x8] sm:$0xff] }
 0x36e   : > { %3920 = vmatprep.mubr.f32.mxu0 %v8373_v1  ;;  %v7669_v37 = vpack.c.bf16 %v4543_v35, %v4541_v34  ;;  %v4580_v34 = vld [vmem:[%s10208_s10 + $0x140] sm:$0xff]  ;;  %v4582_v35 = vld [vmem:[%s10208_s10 + $0x150] sm:$0xff] }
 0x370   : > { %7670 = vmatprep.subr.bf16.mxu1 %v7669_v37  ;;  %v4587_v37 = vld [vmem:[%s10208_s10 + $0x178] sm:$0xff] }
 0x371   : > { %6605 = vmatmul.mubr.msk.f32.vlgmr.msra.gmra.mrb[10].mxu0 %vm2522_vm12, %v9325_v36  ;;  %v4540_v36 = vld [vmem:[%s10208_s10] sm:$0xff] }
 0x372   : > { %7656 = vmatpush1.bf16.msra.mxu0 %v7655_v24  ;;  %3926 = vmatprep.mubr.f32.mxu0 %v8373_v1  ;;  %v7671_v41 = vpack.c.bf16 %v4542_v38, %v4540_v36  ;;  %v4579_v24 = vld [vmem:[%s10208_s10 + $0x138] sm:$0xff]  ;;  %v4585_v36 = vld [vmem:[%s10208_s10 + $0x168] sm:$0xff]  ;;  %v7711_v38 = vpack.c.bf16 %v4582_v35, %v4580_v34 }
 0x373   : > { %7662 = vmatprep.subr.bf16.mxu0 %v7661_v26  ;;  %v7705_v26 = vpack.c.bf16 %v4579_v24, %v4577_v23  ;;  %v7713_v39 = vpack.c.bf16 %v4587_v37, %v4585_v36  ;;  %v7739_v36 = vpack.c.bf16 %v4610_v28, %v4608_v27  ;;  %v5904_v28 = vld [vmem:[%s10209_s11 + $0x20] sm:$0xff] }
 0x374   : > { %7672 = vmatpush1.bf16.msra.mxu1 %v7671_v41  ;;  %v4586_v41 = vld [vmem:[%s10208_s10 + $0x170] sm:$0xff] }
 0x375   : > { %6606 = vmatmul.mubr.msk.f32.gmra.mrb[12].mxu0 %vm2522_vm12, %v9344_v42  ;;  %v4544_v42 = vld [vmem:[%s10208_s10 + $0x20] sm:$0xff]  ;;  %7674 = vmatprep.subr.bf16.mxu1 %v7673_v43  ;;  %v4589_v43 = vld [vmem:[%s10208_s10 + $0x188] sm:$0xff] }
 0x376   : > { %3932 = vmatprep.mubr.f32.mxu0 %v8373_v1  ;;  %v7675_v47 = vpack.c.bf16 %v4546_v44, %v4544_v42  ;;  %v4591_v42 = vld [vmem:[%s10208_s10 + $0x198] sm:$0xff]  ;;  %v7715_v44 = vpack.c.bf16 %v4586_v41, %v4584_v40  ;;  %v4612_v41 = vld [vmem:[%s10208_s10 + $0x240] sm:$0xff] }
 0x377   : > { %v7717_v45 = vpack.c.bf16 %v4591_v42, %v4589_v43  ;;  %v4614_v43 = vld [vmem:[%s10208_s10 + $0x250] sm:$0xff] }
 0x378   : > { %7676 = vmatpush1.bf16.msra.mxu1 %v7675_v47  ;;  %v4590_v47 = vld [vmem:[%s10208_s10 + $0x190] sm:$0xff] }
 0x379   : > { %6607 = vmatmul.mubr.msk.f32.gmra.mrb[14].mxu0 %vm2522_vm12, %v9366_v50  ;;  %v4550_v50 = vld [vmem:[%s10208_s10 + $0x50] sm:$0xff]  ;;  %7678 = vmatprep.subr.bf16.mxu1 %v7677_v48  ;;  %v4593_v48 = vld [vmem:[%s10208_s10 + $0x1a8] sm:$0xff] }
 0x37a   : > { %3938 = vmatprep.mubr.f32.mxu0 %v8373_v1 }
 0x37d   : > { %6608 = vmatmul.mubr.msk.f32.gmra.mrb[16].mxu0 %vm2522_vm12, %v9373_v51  ;;  %v4555_v51 = vld [vmem:[%s10208_s10 + $0x78] sm:$0xff] }
 0x37e   : > { %4145 = vmatprep.mubr.f32.mxu0 %v8373_v1 }
 0x381   : > { %6617 = vmatmul.mubr.msk.f32.vlgmr.msra.gmra.mrb[10].mxu0 %vm2522_vm12, %v9378_v52  ;;  %v7679_v52 = vpack.c.bf16 %v4550_v50, %v4548_v49  ;;  %v4595_v49 = vld [vmem:[%s10208_s10 + $0x1b8] sm:$0xff]  ;;  %v7719_v50 = vpack.c.bf16 %v4590_v47, %v4588_v46 }
 0x382   : > { %7664 = vmatpush1.bf16.msra.mxu0 %v7663_v32  ;;  %4151 = vmatprep.mubr.f32.mxu0 %v8373_v1  ;;  %v7709_v32 = vpack.c.bf16 %v4583_v30, %v4581_v29  ;;  %v4613_v30 = vld [vmem:[%s10208_s10 + $0x248] sm:$0xff] }
 0x383   : > { %7680 = vmatpush1.bf16.msra.mxu1 %v7679_v52  ;;  %v4594_v52 = vld [vmem:[%s10208_s10 + $0x1b0] sm:$0xff] }
 0x385   : > { %6618 = vmatmul.mubr.msk.f32.gmra.mrb[12].mxu0 %vm2522_vm12, %v9392_v53  ;;  %v7681_v53 = vpack.c.bf16 %v4555_v51, %v4553_v33  ;;  %v7721_v33 = vpack.c.bf16 %v4595_v49, %v4593_v48  ;;  %v4592_v51 = vld [vmem:[%s10208_s10 + $0x1a0] sm:$0xff]  ;;  %v7743_v49 = vpack.c.bf16 %v4614_v43, %v4612_v41 }
 0x386   : > { %4157 = vmatprep.mubr.f32.mxu0 %v8373_v1 }
 0x387   : > { %7682 = vmatprep.subr.bf16.mxu1 %v7681_v53  ;;  %v4597_v53 = vld [vmem:[%s10208_s10 + $0x1c8] sm:$0xff] }
 0x389   : > { %6619 = vmatmul.mubr.msk.f32.gmra.mrb[14].mxu0 %vm2522_vm12, %v9398_v54  ;;  %v4552_v54 = vld [vmem:[%s10208_s10 + $0x60] sm:$0xff] }
 0x38a   : > { %4163 = vmatprep.mubr.f32.mxu0 %v8373_v1  ;;  %v7683_v58 = vpack.c.bf16 %v4554_v55, %v4552_v54  ;;  %v4599_v54 = vld [vmem:[%s10208_s10 + $0x1d8] sm:$0xff]  ;;  %v7723_v55 = vpack.c.bf16 %v4594_v52, %v4592_v51 }
 0x38c   : > { %7684 = vmatpush1.bf16.msra.mxu1 %v7683_v58  ;;  %v4598_v58 = vld [vmem:[%s10208_s10 + $0x1d0] sm:$0xff] }
 0x38d   : > { %6620 = vmatmul.mubr.msk.f32.gmra.mrb[16].mxu0 %vm2522_vm12, %v9409_v57  ;;  %v4559_v57 = vld [vmem:[%s10208_s10 + $0x98] sm:$0xff] }
 0x38e   : > { %4370 = vmatprep.mubr.f32.mxu0 %v8373_v1 }
 0x391   : > { %6629 = vmatmul.mubr.msk.f32.vlgmr.msra.gmra.mrb[10].mxu0 %vm2522_vm12, %v9418_v59  ;;  %v7685_v59 = vpack.c.bf16 %v4559_v57, %v4557_v56  ;;  %v7725_v56 = vpack.c.bf16 %v4599_v54, %v4597_v53  ;;  %v4596_v57 = vld [vmem:[%s10208_s10 + $0x1c0] sm:$0xff]  ;;  %v4618_v54 = vld [vmem:[%s10208_s10 + $0x270] sm:$0xff] }
 0x392   : > { %4376 = vmatprep.mubr.f32.mxu0 %v8373_v1  ;;  %v4616_v53 = vld [vmem:[%s10208_s10 + $0x260] sm:$0xff] }
 0x393   : > { %7686 = vmatprep.subr.bf16.mxu1 %v7685_v59  ;;  %v7727_v59 = vpack.c.bf16 %v4598_v58, %v4596_v57  ;;  %v7747_v57 = vpack.c.bf16 %v4618_v54, %v4616_v53  ;;  %v6644_v53 = vld [vmem:[%s10203_s5 + $0x28] sm:$0xff]  ;;  %v6645_v54 = vld [vmem:[%s10203_s5 + $0x30] sm:$0xff] }
 0x394   : > { %7688 = vmatpush1.bf16.msra.mxu1 %v7687_v2  ;;  %v4602_v2 = vld [vmem:[%s10208_s10 + $0x1f0] sm:$0xff] }
 0x395   : > { %6630 = vmatmul.mubr.msk.f32.gmra.mrb[12].mxu0 %vm2522_vm12, %v9432_v0  ;;  %v4563_v0 = vld [vmem:[%s10208_s10 + $0xb8] sm:$0xff] }
 0x396   : > { %4382 = vmatprep.mubr.f32.mxu0 %v8373_v1 }
 0x399   : > { %6631 = vmatmul.mubr.msk.f32.gmra.mrb[14].mxu0 %vm2522_vm12, %v9441_v3  ;;  %v7689_v3 = vpack.c.bf16 %v4563_v0, %v4561_v62  ;;  %v4600_v62 = vld [vmem:[%s10208_s10 + $0x1e0] sm:$0xff]  ;;  %v7729_v0 = vpack.c.bf16 %v4603_v61, %v4601_v60 }
 0x39a   : > { %4388 = vmatprep.mubr.f32.mxu0 %v8373_v1  ;;  %v4620_v61 = vld [vmem:[%s10208_s10 + $0x280] sm:$0xf] }
 0x39b   : > { %7690 = vmatprep.subr.bf16.mxu1 %v7689_v3  ;;  %v7731_v3 = vpack.c.bf16 %v4602_v2, %v4600_v62 }
 0x39c   : > { %7692 = vmatpush1.bf16.msra.mxu1 %v7691_v63 }
 0x39d   : > { %6632 = vmatmul.mubr.msk.f32.gmra.mrb[16].mxu0 %vm2522_vm12, %v9455_v8  ;;  %v4567_v8 = vld [vmem:[%s10208_s10 + $0xd8] sm:$0xff] }
 0x39e   : > { %v7693_v7 = vpack.c.bf16 %v4567_v8, %v4565_v6  ;;  %v7733_v6 = vpack.c.bf16 %v4607_v5, %v4605_v4 }
 0x3a0   : > { %7694 = vmatprep.subr.bf16.mxu1 %v7693_v7 }
 0x3a1   : > { %7696 = vmatpush1.bf16.msra.mxu1 %v7695_v13 }
 0x3a2   : > { %7698 = vmatprep.subr.bf16.mxu1 %v7697_v15  ;;  %v4604_v15 = vld [vmem:[%s10208_s10 + $0x200] sm:$0xff] }
 0x3a3   : > { %v7735_v22 = vpack.c.bf16 %v4606_v14, %v4604_v15 }
 0x3a5   : > { %7700 = vmatpush1.bf16.msra.mxu1 %v7699_v19  ;;  %v4504_v19 = vpop.permute.xlu0 %4503 }
 0x3a6   : > { %7702 = vmatprep.subr.bf16.mxu1 %v7701_v20 }
 0x3a9   : > { %7704 = vmatpush1.bf16.msra.mxu1 %v7703_v25  ;;  %v4514_v46 = vpop.permute.xlu0 %4513 }
 0x3aa   : > { %7706 = vmatprep.subr.bf16.mxu1 %v7705_v26  ;;  %v7737_v26 = vpack.c.bf16 %v4611_v18, %v4609_v17  ;;  %v5868_v17 = vld [vmem:[%s10204_s6] sm:$0xff]  ;;  %v5870_v18 = vld [vmem:[%s10204_s6 + $0x10] sm:$0xff] }
 0x3ad   : > { %7708 = vmatpush1.bf16.msra.mxu1 %v7707_v31  ;;  %v4615_v31 = vld [vmem:[%s10208_s10 + $0x258] sm:$0xff] }
 0x3ae   : > { %7710 = vmatprep.subr.bf16.mxu1 %v7709_v32  ;;  %v4509_v32 = vpop.permute.xlu1 %4508  ;;  %v7741_v40 = vpack.c.bf16 %v4615_v31, %v4613_v30  ;;  %v5906_v31 = vld [vmem:[%s10209_s11 + $0x30] sm:$0xff] }
 0x3b1   : > { %7712 = vmatpush1.bf16.msra.mxu1 %v7711_v38 }
 0x3b2   : > { %7714 = vmatprep.subr.bf16.mxu1 %v7713_v39 }
 0x3b5   : > { %7716 = vmatpush1.bf16.msra.mxu1 %v7715_v44  ;;  %v4617_v44 = vld [vmem:[%s10208_s10 + $0x268] sm:$0xff] }
 0x3b6   : > { %7718 = vmatprep.subr.bf16.mxu1 %v7717_v45  ;;  %v4619_v45 = vld [vmem:[%s10208_s10 + $0x278] sm:$0xff] }
 0x3b7   : > { %v7745_v52 = vpack.c.bf16 %v4619_v45, %v4617_v44 }
 0x3b9   : > { %7720 = vmatpush1.bf16.msra.mxu1 %v7719_v50 }
 0x3ba   : > { %7722 = vmatprep.subr.bf16.mxu1 %v7721_v33 }
 0x3bd   : > { %7724 = vmatpush1.bf16.msra.mxu1 %v7723_v55 }
 0x3be   : > { %7726 = vmatprep.subr.bf16.mxu1 %v7725_v56 }
 0x3c1   : > { %7728 = vmatpush1.bf16.msra.mxu1 %v7727_v59  ;;  %v4621_v59 = vld [vmem:[%s10208_s10 + $0x288] sm:$0xf] }
 0x3c2   : > { %7730 = vmatprep.subr.bf16.mxu1 %v7729_v0 }
 0x3c5   : > { %7732 = vmatpush1.bf16.msra.mxu1 %v7731_v3 }
 0x3c6   : > { %7734 = vmatprep.subr.bf16.mxu1 %v7733_v6 }
 0x423   : > { %v9740_v8 = vpop.f32.mrb[6].mxu1 }
 0x424   : > { %v9742_v63 = vpop.f32.mrb[7].mxu1  ;;  %v4521_v62 = vadd.f32 %v9740_v8, %v4504_v19 }
 0x425   : > { %v4518_v60 = vadd.f32 %v9748_v10, %v9742_v63 }
 0x426   : > { %v4533_v2 = vmax.f32 %v4521_v62, 0.0 }
 0x427   : > { %v9744_v7 = vpop.f32.mrb[8].mxu1  ;;  %v4530_v0 = vmax.f32 %v4518_v60, 0.0  ;;  %v4810_v60 = vld [vmem:[%s10203_s5] sm:$0xff] }
 0x428   : > { %v9746_v9 = vpop.f32.mrb[9].mxu1  ;;  %v4527_v4 = vadd.f32 %v9744_v7, %v4514_v46  ;;  %v6643_v7 = vld [vmem:[%s10203_s5 + $0x20] sm:$0xff] }
 0x429   : > { %v4524_v3 = vadd.f32 %v4509_v32, %v9746_v9  ;;  %7212 = vmatprep.mubr.msk.f32.mxu0 %vm4835_vm13, %v6643_v7 }
 0x42a   : > { %v4539_v6 = vmax.f32 %v4527_v4, 0.0  ;;  %v4812_v4 = vld [vmem:[%s10203_s5 + $0x10] sm:$0xff] }
 0x42b   : > { %v4536_v5 = vmax.f32 %v4524_v3, 0.0  ;;  %v4811_v3 = vld [vmem:[%s10203_s5 + $0x8] sm:$0xff] }
 0x464   : > { %v4372_v11 = vpop.f32.mrb[10].mxu0 }
 0x465   : > { %v4516_v12 = vadd.f32 %v9748_v10, %v4372_v11  ;;  %v4374_v13 = vpop.f32.mrb[11].mxu0 }
 0x466   : > { %v4517_v16 = vadd.f32 %v9748_v10, %v4374_v13 }
 0x467   : > { %v4528_v23 = vmax.f32 %v4516_v12, 0.0 }
 0x468   : > { %v4529_v20 = vmax.f32 %v4517_v16, 0.0  ;;  %v4378_v21 = vpop.f32.mrb[12].mxu0 }
 0x469   : > { %v4519_v24 = vadd.f32 %v4504_v19, %v4378_v21  ;;  %v4380_v25 = vpop.f32.mrb[13].mxu0  ;;  %v5871_v21 = vld [vmem:[%s10204_s6 + $0x18] sm:$0xff] }
 0x46a   : > { %v4520_v29 = vadd.f32 %v4504_v19, %v4380_v25  ;;  %4704 = vmatprep.mubr.f32.mxu1 %v4529_v20  ;;  %v6333_v19 = vld [vmem:[%s10206_s8] sm:$0x3f]  ;;  %v5869_v20 = vld [vmem:[%s10204_s6 + $0x8] sm:$0xff]  ;;  %v5902_v25 = vld [vmem:[%s10209_s11 + $0x10] sm:$0xff] }
 0x46b   : > { %4705 = vmatmul.mubr.f32.vlgmr.msra.gmra.mrb[10].mxu1 %v4528_v23  ;;  %v4531_v37 = vmax.f32 %v4519_v24, 0.0  ;;  %v5901_v23 = vld [vmem:[%s10209_s11 + $0x8] sm:$0xff] }
 0x46c   : > { %v4532_v34 = vmax.f32 %v4520_v29, 0.0  ;;  %7736 = vmatpush1.bf16.msra.mxu1 %v7735_v22  ;;  %v4384_v35 = vpop.f32.mrb[14].mxu0  ;;  %v5900_v22 = vld [vmem:[%s10209_s11] sm:$0xff]  ;;  %v5905_v29 = vld [vmem:[%s10209_s11 + $0x28] sm:$0xff] }
 0x46d   : > { %v4522_v38 = vadd.f32 %v4509_v32, %v4384_v35  ;;  %v4386_v39 = vpop.f32.mrb[15].mxu0  ;;  %7738 = vmatprep.subr.bf16.mxu1 %v7737_v26  ;;  %v7821_v24 = vpack.c.bf16 %v5901_v23, %v5900_v22  ;;  %v5903_v26 = vld [vmem:[%s10209_s11 + $0x18] sm:$0xff]  ;;  %v7829_v30 = vpack.c.bf16 %v5905_v29, %v5904_v28  ;;  %v5908_v35 = vld [vmem:[%s10209_s11 + $0x40] sm:$0xff] }
 0x46e   : > { %v4523_v42 = vadd.f32 %v4509_v32, %v4386_v39  ;;  %4709 = vmatprep.mubr.f32.mxu1 %v4532_v34  ;;  %v7825_v27 = vpack.c.bf16 %v5903_v26, %v5902_v25  ;;  %v5907_v32 = vld [vmem:[%s10209_s11 + $0x38] sm:$0xff]  ;;  %v6664_v26 = vld [vmem:[%s10203_s5 + $0x68] sm:$0xff] }
 0x46f   : > { %4710 = vmatmul.mubr.f32.gmra.mrb[12].mxu1 %v4531_v37  ;;  %v4534_v50 = vmax.f32 %v4522_v38, 0.0  ;;  %v7833_v34 = vpack.c.bf16 %v5907_v32, %v5906_v31  ;;  %v6666_v32 = vld [vmem:[%s10203_s5 + $0x78] sm:$0xff] }
 0x470   : > { %v4535_v47 = vmax.f32 %v4523_v42, 0.0  ;;  %7740 = vmatpush1.bf16.msra.mxu1 %v7739_v36  ;;  %v4390_v48 = vpop.f32.mrb[16].mxu0  ;;  %v5909_v36 = vld [vmem:[%s10209_s11 + $0x48] sm:$0xff] }
 0x471   : > { %v4525_v33 = vadd.f32 %v4514_v46, %v4390_v48  ;;  %v4392_v51 = vpop.f32.mrb[17].mxu0  ;;  %7742 = vmatprep.subr.bf16.mxu1 %v7741_v40  ;;  %v7837_v37 = vpack.c.bf16 %v5909_v36, %v5908_v35 }
 0x472   : > { %v4526_v55 = vadd.f32 %v4514_v46, %v4392_v51  ;;  %4714 = vmatprep.mubr.f32.mxu1 %v4535_v47 }
 0x473   : > { %4715 = vmatmul.mubr.f32.gmra.mrb[14].mxu1 %v4534_v50  ;;  %v4537_v58 = vmax.f32 %v4525_v33, 0.0 }
 0x474   : > { %v4538_v56 = vmax.f32 %v4526_v55, 0.0  ;;  %7744 = vmatpush1.bf16.msra.mxu1 %v7743_v49 }
 0x475   : > { %7746 = vmatprep.subr.bf16.mxu1 %v7745_v52 }
 0x476   : > { %4719 = vmatprep.mubr.f32.mxu1 %v4538_v56 }
 0x477   : > { %4720 = vmatmul.mubr.f32.gmra.mrb[16].mxu1 %v4537_v58 }
 0x478   : > { %7748 = vmatpush1.bf16.msra.mxu1 %v7747_v57  ;;  %4789 = vmatprep.mubr.f32.mxu1 %v8373_v1 }
 0x479   : > { %6637 = vmatprep.subr.msk.mxu1 %vm2171_vm11, %v4621_v59  ;;  %v6646_v59 = vld [vmem:[%s10203_s5 + $0x38] sm:$0xff] }
 0x47c   : > { %6638 = vmatpush1.msk.msra.mxu1 %vm2171_vm11, %v4620_v61 }
 0x47d   : > { %6639 = vmatmul.mubr.msk.f32.vlgmr.msra.gmra.mrb[10].mxu1 %vm2164_vm10, %v4530_v0  ;;  %7822 = vmatprep.subr.bf16.mxu1 %v7821_v24 }
 0x47e   : > { %4794 = vmatprep.mubr.f32.mxu1 %v8373_v1  ;;  %7824 = vmatpush3.bf16.msra.mxu1 %v7821_v24 }
 0x47f   : > { %7826 = vmatprep.subr.bf16.mxu1 %v7825_v27 }
 0x481   : > { %6640 = vmatmul.mubr.msk.f32.gmra.mrb[12].mxu1 %vm2164_vm10, %v4533_v2 }
 0x482   : > { %4799 = vmatprep.mubr.f32.mxu1 %v8373_v1  ;;  %7828 = vmatpush3.bf16.msra.mxu1 %v7825_v27  ;;  %v6665_v27 = vld [vmem:[%s10203_s5 + $0x70] sm:$0xff] }
 0x483   : > { %7830 = vmatprep.subr.bf16.mxu1 %v7829_v30 }
 0x485   : > { %6641 = vmatmul.mubr.msk.f32.gmra.mrb[14].mxu1 %vm2164_vm10, %v4536_v5 }
 0x486   : > { %4804 = vmatprep.mubr.f32.mxu1 %v8373_v1  ;;  %7832 = vmatpush3.bf16.msra.mxu1 %v7829_v30 }
 0x487   : > { %7834 = vmatprep.subr.bf16.mxu1 %v7833_v34 }
 0x489   : > { %6642 = vmatmul.mubr.msk.f32.gmra.mrb[16].mxu1 %vm2164_vm10, %v4539_v6 }
 0x48a   : > { %7836 = vmatpush3.bf16.msra.mxu1 %v7833_v34  ;;  %v6671_v34 = vld [vmem:[%s10203_s5 + $0x80] sm:$0xff] }
 0x48b   : > { %7838 = vmatprep.subr.bf16.mxu1 %v7837_v37 }
 0x48e   : > { %7840 = vmatpush3.bf16.msra.mxu1 %v7837_v37 }
 0x550   : > { %v4791_v8 = vpop.f32.mrb[10].mxu1 }
 0x551   : > { %v4793_v63 = vpop.f32.mrb[11].mxu1 }
 0x554   : > { %v4796_v10 = vpop.f32.mrb[12].mxu1 }
 0x555   : > { %v4798_v11 = vpop.f32.mrb[13].mxu1  ;;  %v8275_v12 = vpack.i.bf16 %v4796_v10, %v4791_v8  ;;  %v4813_v10 = vld [vmem:[%s10203_s5 + $0x18] sm:$0xff] }
 0x556   : > { %v6655_v11 = vld [vmem:[%s10203_s5 + $0x40] sm:$0xff] }
 0x557   : > { %8276 = vrot.lane.b32.xlu1 %v8275_v12, %s8374_s29 }
 0x558   : > { %v4801_v9 = vpop.f32.mrb[14].mxu1 }
 0x559   : > { %v4803_v13 = vpop.f32.mrb[15].mxu1 }
 0x55b   : > { %8286 = vrot.lane.b32.xlu1 %v8275_v12, %s8375_s30 }
 0x55c   : > { %v4806_v15 = vpop.f32.mrb[16].mxu1 }
 0x55d   : > { %v4808_v14 = vpop.f32.mrb[17].mxu1  ;;  %v8280_v16 = vpack.i.bf16 %v4806_v15, %v4801_v9  ;;  %v6656_v15 = vld [vmem:[%s10203_s5 + $0x48] sm:$0xff] }
 0x55e   : > { %v6657_v14 = vld [vmem:[%s10203_s5 + $0x50] sm:$0xff] }
 0x55f   : > { %8296 = vrot.lane.b32.xlu1 %v8275_v12, %s8376_s13  ;;  %8281 = vrot.lane.b32.xlu0 %v8280_v16, %s8374_s29 }
 0x563   : > { %8306 = vrot.lane.b32.xlu1 %v8275_v12, %s8384_s28  ;;  %8291 = vrot.lane.b32.xlu0 %v8280_v16, %s8375_s30 }
 0x567   : > { %8316 = vrot.lane.b32.xlu1 %v8275_v12, %s8385_s20  ;;  %8301 = vrot.lane.b32.xlu0 %v8280_v16, %s8376_s13 }
 0x56b   : > { %8326 = vrot.lane.b32.xlu1 %v8275_v12, %s8386_s23  ;;  %8311 = vrot.lane.b32.xlu0 %v8280_v16, %s8384_s28 }
 0x56f   : > { %8336 = vrot.lane.b32.xlu1 %v8275_v12, %s10219_s26  ;;  %8321 = vrot.lane.b32.xlu0 %v8280_v16, %s8385_s20 }
 0x573   : > { %8346 = vrot.lane.b32.xlu1 %v8275_v12, %s8387_s24  ;;  %8331 = vrot.lane.b32.xlu0 %v8280_v16, %s8386_s23  ;;  %s411_s23 = scalar_lea.vmem %s10210_s12, %s6473_s19 }
 0x577   : > { %8356 = vrot.lane.b32.xlu1 %v8275_v12, %s8388_s25  ;;  %8341 = vrot.lane.b32.xlu0 %v8280_v16, %s10219_s26 }
 0x57b   : > { %5874 = vperm.xlu1 %8138, %v5868_v17   ;;  %8351 = vrot.lane.b32.xlu0 %v8280_v16, %s8387_s24 }
 0x57f   : > { %5884 = vperm.xlu1 %8138, %v5870_v18   ;;  %8361 = vrot.lane.b32.xlu0 %v8280_v16, %s8388_s25 }
 0x583   : > { %6336 = vperm.xlu1 %8138, %v6333_v19   ;;  %5879 = vperm.xlu0 %8139, %v5869_v20   ;;  %v6658_v20 = vld [vmem:[%s10203_s5 + $0x58] sm:$0xff] }
 0x587   : > { %5889 = vperm.xlu0 %8139, %v5871_v21   ;;  %v6663_v21 = vld [vmem:[%s10203_s5 + $0x60] sm:$0xff] }
 0x5c9   : > { %v8277_v38 = vpop.permute.xlu1 %8276 }
 0x5ca   : > { %v8279_v39 = vunpack.i.h.bf16 %v8277_v38  ;;  %v8278_v40 = vunpack.i.l.bf16 %v8277_v38 }
 0x5cc   : > { %v7749_v41 = vpack.c.bf16 %v8279_v39, %v8278_v40  ;;  %v6672_v39 = vld [vmem:[%s10203_s5 + $0x88] sm:$0xff]  ;;  %v6673_v40 = vld [vmem:[%s10203_s5 + $0x90] sm:$0xff] }
 0x5cd   : > { %v8287_v43 = vpop.permute.xlu1 %8286 }
 0x5ce   : > { %7750 = vmatprep.subr.bf16.mxu0 %v7749_v41  ;;  %v8289_v44 = vunpack.i.h.bf16 %v8287_v43  ;;  %v8288_v45 = vunpack.i.l.bf16 %v8287_v43 }
 0x5cf   : > { %7752 = vmatpush3.bf16.msra.mxu0 %v7749_v41 }
 0x5d0   : > { %v7757_v50 = vpack.c.bf16 %v8289_v44, %v8288_v45  ;;  %v6674_v45 = vld [vmem:[%s10203_s5 + $0x98] sm:$0xff] }
 0x5d1   : > { %v8282_v42 = vpop.permute.xlu0 %8281  ;;  %v8297_v52 = vpop.permute.xlu1 %8296 }
 0x5d2   : > { %v8284_v46 = vunpack.i.h.bf16 %v8282_v42  ;;  %v8283_v47 = vunpack.i.l.bf16 %v8282_v42  ;;  %v8299_v55 = vunpack.i.h.bf16 %v8297_v52  ;;  %v8298_v56 = vunpack.i.l.bf16 %v8297_v52 }
 0x5d4   : > { %v7753_v48 = vpack.c.bf16 %v8284_v46, %v8283_v47  ;;  %v7765_v61 = vpack.c.bf16 %v8299_v55, %v8298_v56  ;;  %v6679_v46 = vld [vmem:[%s10203_s5 + $0xa0] sm:$0xff]  ;;  %v6682_v56 = vld [vmem:[%s10203_s5 + $0xb8] sm:$0xff] }
 0x5d5   : > { %v8292_v49 = vpop.permute.xlu0 %8291  ;;  %v8307_v2 = vpop.permute.xlu1 %8306 }
 0x5d6   : > { %v8294_v33 = vunpack.i.h.bf16 %v8292_v49  ;;  %v8293_v51 = vunpack.i.l.bf16 %v8292_v49  ;;  %7754 = vmatprep.subr.bf16.mxu0 %v7753_v48  ;;  %v8309_v5 = vunpack.i.h.bf16 %v8307_v2  ;;  %v8308_v6 = vunpack.i.l.bf16 %v8307_v2 }
 0x5d7   : > { %7756 = vmatpush3.bf16.msra.mxu0 %v7753_v48 }
 0x5d8   : > { %7758 = vmatprep.subr.bf16.mxu0 %v7757_v50  ;;  %v7761_v57 = vpack.c.bf16 %v8294_v33, %v8293_v51  ;;  %v7773_v12 = vpack.c.bf16 %v8309_v5, %v8308_v6  ;;  %v6680_v33 = vld [vmem:[%s10203_s5 + $0xa8] sm:$0xff]  ;;  %v6681_v51 = vld [vmem:[%s10203_s5 + $0xb0] sm:$0xff]  ;;  %v6690_v6 = vld [vmem:[%s10203_s5 + $0xd8] sm:$0xff] }
 0x5d9   : > { %v8302_v58 = vpop.permute.xlu0 %8301  ;;  %v8317_v13 = vpop.permute.xlu1 %8316 }
 0x5da   : > { %7213 = vmatmul.mubr.msk.f32.vlgmr.msra.gmra.mrb[18].mxu0 %vm4835_vm13, %v6644_v53  ;;  %v8304_v62 = vunpack.i.h.bf16 %v8302_v58  ;;  %v8303_v0 = vunpack.i.l.bf16 %v8302_v58  ;;  %v8319_v16 = vunpack.i.h.bf16 %v8317_v13  ;;  %v8318_v17 = vunpack.i.l.bf16 %v8317_v13  ;;  %v6753_v13 = vld [vmem:[%s10209_s11 + $0x140] sm:$0xff] }
 0x5db   : > { %7760 = vmatpush3.bf16.msra.mxu0 %v7757_v50  ;;  %7215 = vmatprep.mubr.msk.f32.mxu0 %vm4835_vm13, %v6645_v54 }
 0x5dc   : > { %7762 = vmatprep.subr.bf16.mxu0 %v7761_v57  ;;  %v7769_v8 = vpack.c.bf16 %v8304_v62, %v8303_v0  ;;  %v7781_v22 = vpack.c.bf16 %v8319_v16, %v8318_v17  ;;  %v6688_v62 = vld [vmem:[%s10203_s5 + $0xc8] sm:$0xff]  ;;  %v6689_v0 = vld [vmem:[%s10203_s5 + $0xd0] sm:$0xff]  ;;  %v6703_v16 = vld [vmem:[%s10203_s5 + $0x100] sm:$0xff] }
 0x5dd   : > { %v8312_v63 = vpop.permute.xlu0 %8311  ;;  %v8327_v25 = vpop.permute.xlu1 %8326 }
 0x5de   : > { %7216 = vmatmul.mubr.msk.f32.gmra.mrb[20].mxu0 %vm4835_vm13, %v6646_v59  ;;  %v8314_v9 = vunpack.i.h.bf16 %v8312_v63  ;;  %v8313_v7 = vunpack.i.l.bf16 %v8312_v63  ;;  %v8329_v28 = vunpack.i.h.bf16 %v8327_v25  ;;  %v8328_v29 = vunpack.i.l.bf16 %v8327_v25  ;;  %v6706_v25 = vld [vmem:[%s10203_s5 + $0x118] sm:$0xff] }
 0x5df   : > { %7764 = vmatpush3.bf16.msra.mxu0 %v7761_v57  ;;  %7226 = vmatprep.mubr.msk.f32.mxu0 %vm4835_vm13, %v4810_v60  ;;  %v6687_v57 = vld [vmem:[%s10203_s5 + $0xc0] sm:$0xff] }
 0x5e0   : > { %7766 = vmatprep.subr.bf16.mxu0 %v7765_v61  ;;  %v7777_v18 = vpack.c.bf16 %v8314_v9, %v8313_v7  ;;  %v7789_v35 = vpack.c.bf16 %v8329_v28, %v8328_v29  ;;  %v6697_v9 = vld [vmem:[%s10203_s5 + $0xf0] sm:$0xff]  ;;  %v6752_v7 = vld [vmem:[%s10209_s11 + $0x138] sm:$0xff] }
 0x5e1   : > { %v8322_v19 = vpop.permute.xlu0 %8321  ;;  %v8337_v38 = vpop.permute.xlu1 %8336  ;;  %v7893_v17 = vpack.c.bf16 %v6753_v13, %v6752_v7  ;;  %v6759_v28 = vld [vmem:[%s10209_s11 + $0x170] sm:$0xff]  ;;  %v6728_v7 = vld [vmem:[%s10209_s11 + $0xc8] sm:$0xf] }
 0x5e2   : > { %7227 = vmatmul.mubr.msk.f32.vlgmr.msra.gmra.mrb[18].mxu0 %vm4835_vm13, %v4811_v3  ;;  %v8324_v23 = vunpack.i.h.bf16 %v8322_v19  ;;  %v8323_v24 = vunpack.i.l.bf16 %v8322_v19  ;;  %v8339_v41 = vunpack.i.h.bf16 %v8337_v38  ;;  %v8338_v43 = vunpack.i.l.bf16 %v8337_v38  ;;  %v6755_v19 = vld [vmem:[%s10209_s11 + $0x150] sm:$0xff] }
 0x5e3   : > { %7768 = vmatpush3.bf16.msra.mxu0 %v7765_v61  ;;  %7229 = vmatprep.mubr.msk.f32.mxu0 %vm4835_vm13, %v4812_v4  ;;  %v6763_v38 = vld [vmem:[%s10209_s11 + $0x190] sm:$0xff] }
 0x5e4   : > { %7770 = vmatprep.subr.bf16.mxu0 %v7769_v8  ;;  %v7785_v30 = vpack.c.bf16 %v8324_v23, %v8323_v24  ;;  %v7797_v47 = vpack.c.bf16 %v8339_v41, %v8338_v43  ;;  %v6756_v23 = vld [vmem:[%s10209_s11 + $0x158] sm:$0xff]  ;;  %v6757_v24 = vld [vmem:[%s10209_s11 + $0x160] sm:$0xff]  ;;  %v6716_v41 = vld [vmem:[%s10209_s11 + $0x68] sm:$0xff] }
 0x5e5   : > { %v8332_v31 = vpop.permute.xlu0 %8331  ;;  %v8347_v50 = vpop.permute.xlu1 %8346  ;;  %v6717_v43 = vld [vmem:[%s10209_s11 + $0x70] sm:$0xff] }
 0x5e6   : > { %7230 = vmatmul.mubr.msk.f32.gmra.mrb[20].mxu0 %vm4835_vm13, %v4813_v10  ;;  %v8334_v36 = vunpack.i.h.bf16 %v8332_v31  ;;  %v8333_v37 = vunpack.i.l.bf16 %v8332_v31  ;;  %v8349_v52 = vunpack.i.h.bf16 %v8347_v50  ;;  %v8348_v53 = vunpack.i.l.bf16 %v8347_v50  ;;  %v6761_v31 = vld [vmem:[%s10209_s11 + $0x180] sm:$0xff]  ;;  %v6734_v13 = vld [vmem:[%s10209_s11 + $0xd0] sm:$0xff] }
 0x5e7   : > { %7772 = vmatpush3.bf16.msra.mxu0 %v7769_v8  ;;  %7240 = vmatprep.mubr.msk.f32.mxu0 %vm4835_vm13, %v6655_v11  ;;  %v6695_v8 = vld [vmem:[%s10203_s5 + $0xe0] sm:$0xff] }
 0x5e8   : > { %7774 = vmatprep.subr.bf16.mxu0 %v7773_v12  ;;  %v7793_v42 = vpack.c.bf16 %v8334_v36, %v8333_v37  ;;  %v7805_v58 = vpack.c.bf16 %v8349_v52, %v8348_v53  ;;  %v6762_v37 = vld [vmem:[%s10209_s11 + $0x188] sm:$0xff] }
 0x5e9   : > { %v8342_v44 = vpop.permute.xlu0 %8341  ;;  %v8357_v61 = vpop.permute.xlu1 %8356 }
 0x5ea   : > { %7241 = vmatmul.mubr.msk.f32.vlgmr.msra.gmra.mrb[18].mxu0 %vm4835_vm13, %v6656_v15  ;;  %v8344_v48 = vunpack.i.h.bf16 %v8342_v44  ;;  %v8343_v49 = vunpack.i.l.bf16 %v8342_v44  ;;  %v8359_v2 = vunpack.i.h.bf16 %v8357_v61  ;;  %v8358_v3 = vunpack.i.l.bf16 %v8357_v61  ;;  %v6720_v61 = vld [vmem:[%s10209_s11 + $0x88] sm:$0xff] }
 0x5eb   : > { %7776 = vmatpush3.bf16.msra.mxu0 %v7773_v12  ;;  %7243 = vmatprep.mubr.msk.f32.mxu0 %vm4835_vm13, %v6657_v14  ;;  %v6696_v12 = vld [vmem:[%s10203_s5 + $0xe8] sm:$0xff]  ;;  %v6698_v14 = vld [vmem:[%s10203_s5 + $0xf8] sm:$0xff]  ;;  %v7845_v44 = vpack.c.bf16 %v6717_v43, %v6716_v41 }
 0x5ec   : > { %7778 = vmatprep.subr.bf16.mxu0 %v7777_v18  ;;  %v7801_v54 = vpack.c.bf16 %v8344_v48, %v8343_v49  ;;  %v7813_v63 = vpack.c.bf16 %v8359_v2, %v8358_v3 }
 0x5ed   : > { %v8352_v55 = vpop.permute.xlu0 %8351 }
 0x5ee   : > { %7244 = vmatmul.mubr.msk.f32.gmra.mrb[20].mxu0 %vm4835_vm13, %v6658_v20  ;;  %v8354_v59 = vunpack.i.h.bf16 %v8352_v55  ;;  %v8353_v60 = vunpack.i.l.bf16 %v8352_v55  ;;  %v6704_v20 = vld [vmem:[%s10203_s5 + $0x108] sm:$0xff] }
 0x5ef   : > { %7780 = vmatpush3.bf16.msra.mxu0 %v7777_v18  ;;  %7254 = vmatprep.mubr.msk.f32.mxu0 %vm4835_vm13, %v6663_v21  ;;  %v6754_v18 = vld [vmem:[%s10209_s11 + $0x148] sm:$0xff]  ;;  %v6705_v21 = vld [vmem:[%s10203_s5 + $0x110] sm:$0xff] }
 0x5f0   : > { %7782 = vmatprep.subr.bf16.mxu0 %v7781_v22  ;;  %v7809_v4 = vpack.c.bf16 %v8354_v59, %v8353_v60 }
 0x5f1   : > { %v8362_v5 = vpop.permute.xlu0 %8361 }
 0x5f2   : > { %7255 = vmatmul.mubr.msk.f32.vlgmr.msra.gmra.mrb[18].mxu0 %vm4835_vm13, %v6664_v26  ;;  %v8364_v10 = vunpack.i.h.bf16 %v8362_v5  ;;  %v8363_v11 = vunpack.i.l.bf16 %v8362_v5  ;;  %v7901_v26 = vpack.c.bf16 %v6757_v24, %v6756_v23  ;;  %v6723_v5 = vld [vmem:[%s10209_s11 + $0xa0] sm:$0xff]  ;;  %v6741_v23 = vld [vmem:[%s10209_s11 + $0x108] sm:$0xff] }
 0x5f3   : > { %7784 = vmatpush3.bf16.msra.mxu0 %v7781_v22  ;;  %7257 = vmatprep.mubr.msk.f32.mxu0 %vm4835_vm13, %v6665_v27  ;;  %v7897_v22 = vpack.c.bf16 %v6755_v19, %v6754_v18  ;;  %v6758_v27 = vld [vmem:[%s10209_s11 + $0x168] sm:$0xff]  ;;  %v6738_v19 = vld [vmem:[%s10209_s11 + $0xf0] sm:$0xff] }
 0x5f4   : > { %7786 = vmatprep.subr.bf16.mxu0 %v7785_v30  ;;  %v7817_v15 = vpack.c.bf16 %v8364_v10, %v8363_v11  ;;  %v7905_v29 = vpack.c.bf16 %v6759_v28, %v6758_v27  ;;  %v6726_v11 = vld [vmem:[%s10209_s11 + $0xb8] sm:$0xff]  ;;  %v6744_v28 = vld [vmem:[%s10209_s11 + $0x120] sm:$0xff] }
 0x5f6   : > { %7258 = vmatmul.mubr.msk.f32.gmra.mrb[20].mxu0 %vm4835_vm13, %v6666_v32 }
 0x5f7   : > { %7788 = vmatpush3.bf16.msra.mxu0 %v7785_v30  ;;  %7268 = vmatprep.mubr.msk.f32.mxu0 %vm4835_vm13, %v6671_v34  ;;  %v6760_v30 = vld [vmem:[%s10209_s11 + $0x178] sm:$0xff]  ;;  %v5910_v34 = vld [vmem:[%s10209_s11 + $0x50] sm:$0xff] }
 0x5f8   : > { %7790 = vmatprep.subr.bf16.mxu0 %v7789_v35  ;;  %v7909_v32 = vpack.c.bf16 %v6761_v31, %v6760_v30  ;;  %v6746_v31 = vld [vmem:[%s10209_s11 + $0x130] sm:$0xf] }
 0x5fa   : > { %7269 = vmatmul.mubr.msk.f32.vlgmr.msra.gmra.mrb[18].mxu0 %vm4835_vm13, %v6672_v39  ;;  %v7913_v39 = vpack.c.bf16 %v6763_v38, %v6762_v37 }
 0x5fb   : > { %7792 = vmatpush3.bf16.msra.mxu0 %v7789_v35  ;;  %7271 = vmatprep.mubr.msk.f32.mxu0 %vm4835_vm13, %v6673_v40  ;;  %v5911_v35 = vld [vmem:[%s10209_s11 + $0x58] sm:$0xff]  ;;  %v5912_v40 = vld [vmem:[%s10209_s11 + $0x60] sm:$0xf] }
 0x5fc   : > { %7794 = vmatprep.subr.bf16.mxu0 %v7793_v42  ;;  %v7841_v36 = vpack.c.bf16 %v5911_v35, %v5910_v34 }
 0x5fe   : > { %7272 = vmatmul.mubr.msk.f32.gmra.mrb[20].mxu0 %vm4835_vm13, %v6674_v45  ;;  %7842 = vmatprep.subr.bf16.mxu1 %v7841_v36 }
 0x5ff   : > { %7796 = vmatpush3.bf16.msra.mxu0 %v7793_v42  ;;  %7282 = vmatprep.mubr.msk.f32.mxu0 %vm4835_vm13, %v6679_v46  ;;  %v6764_v42 = vld [vmem:[%s10209_s11 + $0x198] sm:$0xf]  ;;  %v5875_v46 = vpop.permute.xlu1 %5874 }
 0x600   : > { %7798 = vmatprep.subr.bf16.mxu0 %v7797_v47  ;;  %7844 = vmatpush3.bf16.msra.mxu1 %v7841_v36 }
 0x601   : > { %7354 = vmatprep.subr.msk.mxu1 %vm2171_vm11, %v5912_v40 }
 0x602   : > { %7283 = vmatmul.mubr.msk.f32.vlgmr.msra.gmra.mrb[18].mxu0 %vm4835_vm13, %v6680_v33  ;;  %v5880_v45 = vpop.permute.xlu0 %5879  ;;  %v6718_v33 = vld [vmem:[%s10209_s11 + $0x78] sm:$0xff] }
 0x603   : > { %7800 = vmatpush3.bf16.msra.mxu0 %v7797_v47  ;;  %7285 = vmatprep.mubr.msk.f32.mxu0 %vm4835_vm13, %v6681_v51  ;;  %v6719_v51 = vld [vmem:[%s10209_s11 + $0x80] sm:$0xff]  ;;  %v5885_v55 = vpop.permute.xlu1 %5884 }
 0x604   : > { %7802 = vmatprep.subr.bf16.mxu0 %v7801_v54  ;;  %7355 = vmatpush3.msk.msra.mxu1 %vm2171_vm11, %v5912_v40  ;;  %v7849_v59 = vpack.c.bf16 %v6719_v51, %v6718_v33 }
 0x605   : > { %7846 = vmatprep.subr.bf16.mxu1 %v7845_v44 }
 0x606   : > { %7286 = vmatmul.mubr.msk.f32.gmra.mrb[20].mxu0 %vm4835_vm13, %v6682_v56  ;;  %v5890_v52 = vpop.permute.xlu0 %5889 }
 0x607   : > { %7804 = vmatpush3.bf16.msra.mxu0 %v7801_v54  ;;  %7296 = vmatprep.mubr.msk.f32.mxu0 %vm4835_vm13, %v6687_v57 }
 0x608   : > { %7806 = vmatprep.subr.bf16.mxu0 %v7805_v58 }
 0x60a   : > { %7297 = vmatmul.mubr.msk.f32.vlgmr.msra.gmra.mrb[18].mxu0 %vm4835_vm13, %v6688_v62  ;;  %v6721_v62 = vld [vmem:[%s10209_s11 + $0x90] sm:$0xff] }
 0x60b   : > { %7808 = vmatpush3.bf16.msra.mxu0 %v7805_v58  ;;  %7299 = vmatprep.mubr.msk.f32.mxu0 %vm4835_vm13, %v6689_v0  ;;  %v7853_v3 = vpack.c.bf16 %v6721_v62, %v6720_v61  ;;  %v6332_v62 = vld [vmem:[%s10205_s7] sm:$0x3f] }
 0x60c   : > { %7810 = vmatprep.subr.bf16.mxu0 %v7809_v4 }
 0x60e   : > { %7300 = vmatmul.mubr.msk.f32.gmra.mrb[20].mxu0 %vm4835_vm13, %v6690_v6 }
 0x60f   : > { %7812 = vmatpush3.bf16.msra.mxu0 %v7809_v4  ;;  %7310 = vmatprep.mubr.msk.f32.mxu0 %vm4835_vm13, %v6695_v8  ;;  %v6722_v4 = vld [vmem:[%s10209_s11 + $0x98] sm:$0xff]  ;;  %v6724_v8 = vld [vmem:[%s10209_s11 + $0xa8] sm:$0xff] }
 0x610   : > { %7814 = vmatprep.subr.bf16.mxu0 %v7813_v63  ;;  %v7857_v6 = vpack.c.bf16 %v6723_v5, %v6722_v4 }
 0x612   : > { %7311 = vmatmul.mubr.msk.f32.vlgmr.msra.gmra.mrb[18].mxu0 %vm4835_vm13, %v6696_v12  ;;  %v6727_v12 = vld [vmem:[%s10209_s11 + $0xc0] sm:$0xff] }
 0x613   : > { %7816 = vmatpush3.bf16.msra.mxu0 %v7813_v63  ;;  %7313 = vmatprep.mubr.msk.f32.mxu0 %vm4835_vm13, %v6697_v9  ;;  %v6725_v63 = vld [vmem:[%s10209_s11 + $0xb0] sm:$0xff]  ;;  %v7865_v9 = vpack.c.bf16 %v6727_v12, %v6726_v11 }
 0x614   : > { %7818 = vmatprep.subr.bf16.mxu0 %v7817_v15  ;;  %v7861_v10 = vpack.c.bf16 %v6725_v63, %v6724_v8 }
 0x616   : > { %7314 = vmatmul.mubr.msk.f32.gmra.mrb[20].mxu0 %vm4835_vm13, %v6698_v14  ;;  %v6736_v14 = vld [vmem:[%s10209_s11 + $0xe0] sm:$0xff] }
 0x617   : > { %7820 = vmatpush3.bf16.msra.mxu0 %v7817_v15  ;;  %7324 = vmatprep.mubr.msk.f32.mxu0 %vm4835_vm13, %v6703_v16  ;;  %v6735_v15 = vld [vmem:[%s10209_s11 + $0xd8] sm:$0xff]  ;;  %v6737_v16 = vld [vmem:[%s10209_s11 + $0xe8] sm:$0xff] }
 0x618   : > { %7894 = vmatprep.subr.bf16.mxu0 %v7893_v17  ;;  %v7873_v18 = vpack.c.bf16 %v6737_v16, %v6736_v14 }
 0x61a   : > { %7325 = vmatmul.mubr.msk.f32.vlgmr.msra.gmra.mrb[18].mxu0 %vm4835_vm13, %v6704_v20  ;;  %v6739_v20 = vld [vmem:[%s10209_s11 + $0xf8] sm:$0xff] }
 0x61b   : > { %7327 = vmatprep.mubr.msk.f32.mxu0 %vm4835_vm13, %v6705_v21  ;;  %7896 = vmatpush3.bf16.msra.mxu0 %v7893_v17  ;;  %v7869_v17 = vpack.c.bf16 %v6735_v15, %v6734_v13  ;;  %v7877_v21 = vpack.c.bf16 %v6739_v20, %v6738_v19 }
 0x61c   : > { %7898 = vmatprep.subr.bf16.mxu0 %v7897_v22 }
 0x61e   : > { %7328 = vmatmul.mubr.msk.f32.gmra.mrb[20].mxu0 %vm4835_vm13, %v6706_v25  ;;  %v6742_v25 = vld [vmem:[%s10209_s11 + $0x110] sm:$0xff] }
 0x61f   : > { %7900 = vmatpush3.bf16.msra.mxu0 %v7897_v22  ;;  %v6740_v22 = vld [vmem:[%s10209_s11 + $0x100] sm:$0xff] }
 0x620   : > { %7902 = vmatprep.subr.bf16.mxu0 %v7901_v26  ;;  %v7881_v24 = vpack.c.bf16 %v6741_v23, %v6740_v22 }
 0x623   : > { %7904 = vmatpush3.bf16.msra.mxu0 %v7901_v26  ;;  %v6743_v26 = vld [vmem:[%s10209_s11 + $0x118] sm:$0xff] }
 0x624   : > { %7906 = vmatprep.subr.bf16.mxu0 %v7905_v29  ;;  %v7885_v27 = vpack.c.bf16 %v6743_v26, %v6742_v25 }
 0x627   : > { %7908 = vmatpush3.bf16.msra.mxu0 %v7905_v29  ;;  %v6745_v29 = vld [vmem:[%s10209_s11 + $0x128] sm:$0xff] }
 0x628   : > { %7910 = vmatprep.subr.bf16.mxu0 %v7909_v32  ;;  %v7889_v30 = vpack.c.bf16 %v6745_v29, %v6744_v28 }
 0x62b   : > { %7912 = vmatpush3.bf16.msra.mxu0 %v7909_v32  ;;  %v8389_v32 = vmov 0.0|0.0  }
 0x62c   : > { %7914 = vmatprep.subr.bf16.mxu0 %v7913_v39 }
 0x62f   : > { %7916 = vmatpush3.bf16.msra.mxu0 %v7913_v39 }
 0x630   : > { %7450 = vmatprep.subr.msk.mxu0 %vm2171_vm11, %v6764_v42 }
 0x633   : > { %7451 = vmatpush3.msk.msra.mxu0 %vm2171_vm11, %v6764_v42 }
 0x6ed   : > { %v7326_v47 = vpop.f32.mrb[18].mxu0 }
 0x6ee   : > { %v5893_v48 = vadd.f32 %v7326_v47, %v5880_v45  ;;  %v5845_v49 = vpop.f32.mrb[19].mxu0 }
 0x6ef   : > { %v5892_v50 = vadd.f32 %v5875_v46, %v5845_v49 }
 0x6f0   : > { %v10078_v56 = vmax.f32 %v5893_v48, 0.0 }
 0x6f1   : > { %v10076_v53 = vmax.f32 %v5892_v50, 0.0  ;;  %v7329_v54 = vpop.f32.mrb[20].mxu0 }
 0x6f2   : > { %v5895_v57 = vadd.f32 %v7329_v54, %v5890_v52  ;;  %v5855_v58 = vpop.f32.mrb[21].mxu0 }
 0x6f3   : > { %v5894_v60 = vadd.f32 %v5885_v55, %v5855_v58  ;;  %7356 = vmatprep.mubr.msk.f32.mxu1 %vm5913_vm14, %v10076_v53  ;;  %7452 = vmatprep.mubr.msk.f32.mxu0 %vm5913_vm14, %v10076_v53 }
 0x6f4   : > { %7357 = vmatmul.mubr.msk.f32.vlgmr.msra.gmra.mrb[18].mxu1 %vm5913_vm14, %v10078_v56  ;;  %7453 = vmatmul.mubr.msk.f32.vlgmr.msra.gmra.mrb[22].mxu0 %vm5913_vm14, %v10078_v56  ;;  %v10096_v2 = vmax.f32 %v5895_v57, 0.0 }
 0x6f5   : > { %v10094_v0 = vmax.f32 %v5894_v60, 0.0  ;;  %7848 = vmatpush3.bf16.msra.mxu1 %v7845_v44 }
 0x6f6   : > { %7850 = vmatprep.subr.bf16.mxu1 %v7849_v59 }
 0x6f7   : > { %7359 = vmatprep.mubr.msk.f32.mxu1 %vm5913_vm14, %v10094_v0  ;;  %7455 = vmatprep.mubr.msk.f32.mxu0 %vm5913_vm14, %v10094_v0 }
 0x6f8   : > { %7360 = vmatmul.mubr.msk.f32.gmra.mrb[20].mxu1 %vm5913_vm14, %v10096_v2  ;;  %7456 = vmatmul.mubr.msk.f32.gmra.mrb[24].mxu0 %vm5913_vm14, %v10096_v2 }
 0x6f9   : > { %7852 = vmatpush3.bf16.msra.mxu1 %v7849_v59  ;;  %7388 = vmatprep.mubr.msk.f32.mxu1 %vm5913_vm14, %v10076_v53 }
 0x6fa   : > { %7854 = vmatprep.subr.bf16.mxu1 %v7853_v3 }
 0x6fd   : > { %7856 = vmatpush3.bf16.msra.mxu1 %v7853_v3 }
 0x6fe   : > { %7858 = vmatprep.subr.bf16.mxu1 %v7857_v6 }
 0x701   : > { %7860 = vmatpush3.bf16.msra.mxu1 %v7857_v6 }
 0x702   : > { %7862 = vmatprep.subr.bf16.mxu1 %v7861_v10 }
 0x705   : > { %7864 = vmatpush3.bf16.msra.mxu1 %v7861_v10 }
 0x706   : > { %7866 = vmatprep.subr.bf16.mxu1 %v7865_v9 }
 0x709   : > { %7868 = vmatpush3.bf16.msra.mxu1 %v7865_v9 }
 0x70a   : > { %7386 = vmatprep.subr.msk.mxu1 %vm2171_vm11, %v6728_v7 }
 0x70d   : > { %7387 = vmatpush3.msk.msra.mxu1 %vm2171_vm11, %v6728_v7 }
 0x70e   : > { %7389 = vmatmul.mubr.msk.f32.vlgmr.msra.gmra.mrb[22].mxu1 %vm5913_vm14, %v10078_v56  ;;  %7870 = vmatprep.subr.bf16.mxu1 %v7869_v17 }
 0x70f   : > { %7391 = vmatprep.mubr.msk.f32.mxu1 %vm5913_vm14, %v10094_v0  ;;  %7872 = vmatpush3.bf16.msra.mxu1 %v7869_v17 }
 0x710   : > { %7874 = vmatprep.subr.bf16.mxu1 %v7873_v18 }
 0x712   : > { %7392 = vmatmul.mubr.msk.f32.gmra.mrb[24].mxu1 %vm5913_vm14, %v10096_v2 }
 0x713   : > { %7876 = vmatpush3.bf16.msra.mxu1 %v7873_v18  ;;  %7420 = vmatprep.mubr.msk.f32.mxu1 %vm5913_vm14, %v10076_v53 }
 0x714   : > { %7878 = vmatprep.subr.bf16.mxu1 %v7877_v21 }
 0x717   : > { %7880 = vmatpush3.bf16.msra.mxu1 %v7877_v21 }
 0x718   : > { %7882 = vmatprep.subr.bf16.mxu1 %v7881_v24 }
 0x71b   : > { %7884 = vmatpush3.bf16.msra.mxu1 %v7881_v24 }
 0x71c   : > { %7886 = vmatprep.subr.bf16.mxu1 %v7885_v27 }
 0x71f   : > { %7888 = vmatpush3.bf16.msra.mxu1 %v7885_v27 }
 0x720   : > { %7890 = vmatprep.subr.bf16.mxu1 %v7889_v30 }
 0x723   : > { %7892 = vmatpush3.bf16.msra.mxu1 %v7889_v30 }
 0x724   : > { %7418 = vmatprep.subr.msk.mxu1 %vm2171_vm11, %v6746_v31 }
 0x727   : > { %7419 = vmatpush3.msk.msra.mxu1 %vm2171_vm11, %v6746_v31 }
 0x728   : > { %7421 = vmatmul.mubr.msk.f32.vlgmr.msra.gmra.mrb[26].mxu1 %vm5913_vm14, %v10078_v56  ;;  %7917 = vmatprep.subr.bf16.mxu1 %v8389_v32 }
 0x729   : > { %7423 = vmatprep.mubr.msk.f32.mxu1 %vm5913_vm14, %v10094_v0  ;;  %v6337_v0 = vpop.permute.xlu1 %6336 }
 0x72c   : > { %7424 = vmatmul.mubr.msk.f32.gmra.mrb[28].mxu1 %vm5913_vm14, %v10096_v2 }
 0x72d   : > { %7466 = vmatprep.mubr.msk.f32.mxu1 %vm8390_vm15, %v8373_v1 }
 0x7c7   : > { %v7358_v34 = vpop.f32.mrb[18].mxu1  ;;  %v7454_v35 = vpop.f32.mrb[22].mxu0 }
 0x7c8   : > { %v5995_v36 = vpop.f32.mrb[19].mxu1  ;;  %v6309_v37 = vpop.f32.mrb[23].mxu0 }
 0x7cb   : > { %v7361_v38 = vpop.f32.mrb[20].mxu1  ;;  %v7457_v39 = vpop.f32.mrb[24].mxu0 }
 0x7cc   : > { %v6005_v40 = vpop.f32.mrb[21].mxu1  ;;  %v6319_v41 = vpop.f32.mrb[25].mxu0 }
 0x7e1   : > { %v7390_v43 = vpop.f32.mrb[22].mxu1 }
 0x7e2   : > { %v6117_v42 = vmax.f32 %v7358_v34, %v7390_v43  ;;  %v6097_v44 = vpop.f32.mrb[23].mxu1 }
 0x7e3   : > { %v6116_v45 = vmax.f32 %v5995_v36, %v6097_v44 }
 0x7e5   : > { %v7393_v46 = vpop.f32.mrb[24].mxu1 }
 0x7e6   : > { %v6119_v47 = vmax.f32 %v7361_v38, %v7393_v46  ;;  %v6107_v48 = vpop.f32.mrb[25].mxu1 }
 0x7e7   : > { %v6118_v49 = vmax.f32 %v6005_v40, %v6107_v48 }
 0x7fb   : > { %v7422_v50 = vpop.f32.mrb[26].mxu1 }
 0x7fc   : > { %v6223_v33 = vmax.f32 %v6117_v42, %v7422_v50  ;;  %v6203_v51 = vpop.f32.mrb[27].mxu1 }
 0x7fd   : > { %v6222_v1 = vmax.f32 %v6116_v45, %v6203_v51 }
 0x7fe   : > { %v6329_v52 = vmax.f32 %v6223_v33, %v7454_v35 }
 0x7ff   : > { %v6328_v53 = vmax.f32 %v6222_v1, %v6309_v37  ;;  %v7425_v54 = vpop.f32.mrb[28].mxu1 }
 0x800   : > { %v6225_v55 = vmax.f32 %v6119_v47, %v7425_v54  ;;  %v6213_v56 = vpop.f32.mrb[29].mxu1 }
 0x801   : > { %v7918_v57 = vpack.c.bf16 %v6329_v52, %v6328_v53  ;;  %v6224_v58 = vmax.f32 %v6118_v49, %v6213_v56 }
 0x802   : > { %v6331_v59 = vmax.f32 %v6225_v55, %v7457_v39 }
 0x803   : > { %v6330_v60 = vmax.f32 %v6224_v58, %v6319_v41  ;;  %7919 = vmatpush3.bf16.msra.mxu1 %v7918_v57 }
 0x804   : > { %7920 = vmatprep.subr.bf16.mxu1 %v8389_v32 }
 0x805   : > { %v7921_v61 = vpack.c.bf16 %v6331_v59, %v6330_v60 }
 0x807   : > { %7922 = vmatpush3.bf16.msra.mxu1 %v7921_v61 }
 0x80a   : > { %7467 = vmatmul.mubr.msk.f32.vlgmr.msra.gmra.mrb[30].mxu1 %vm4835_vm13, %v6332_v62 }
 0x8dd   : > { %v6408_v2 = vpop.f32.mrb[30].mxu1 }
 0x8de   : > { %v6409_v3 = vadd.f32 %v6408_v2, %v6337_v0  ;;  %v7468_v4 = vpop.f32.mrb[31].mxu1 }
 0x8e0   : > { %6413 = vst.msk [vmem:[%s411_s23] sm:$0x3f] %vm6412_vm0, %v6409_v3 }
 0x8e1 PF: > { %s22_s21 = sadd.s32 1, %s8371_s21  }
 0x8e2   : > { %p19_p4 = scmp.ge.s32.totalorder %s22_s21, 4  }
 0x8e4   :  { %21 = sbr.rel (!%p19_p4) target bundleno = 1 (0x1), region = 125 }

</bundles_post_ra>
